<compile_context>
chip_gen: v7x
topology: tpu7x:2x2x1
jax: 0.10.0
libtpu: 0.0.40
codegen_flags: <defaults>
</compile_context>

<pallas_src>
import jax
import jax.numpy as jnp
from jax import lax
from jax.experimental import pallas as pl
from jax.experimental.pallas import tpu as pltpu

TM = 1024     # row tile over M = N*OH*OW
LANE = 128    # output channels padded to a multiple of the lane width
SUB = 8       # contraction (input-channel) dim padded to a sublane multiple


def _round_up(x, m):
    return (x + m - 1) // m * m


def _out_size(sz, k, stride, pad, dil):
    return (sz + 2 * pad - dil * (k - 1) - 1) // stride + 1


# ---------------------------------------------------------------------------
# Pallas kernel.  Grid = (M tiles, K taps); K is the reduction axis with an
# f32 VMEM accumulator.  Per step: fuse the bilinear combine of 4 corner
# samples (weights lane-broadcast over C, VPU f32) with a (tm, C) x (C, Npad)
# MXU matmul (bf16 operands, f32 accumulation); bias add + bf16 store on the
# last tap.
# ---------------------------------------------------------------------------
def _deform_matmul_kernel(v00_ref, v01_ref, v10_ref, v11_ref,
                          wt_ref, wm_ref, b_ref, o_ref, acc_ref):
    k = pl.program_id(1)

    @pl.when(k == 0)
    def _init():
        acc_ref[...] = jnp.zeros_like(acc_ref)

    f32 = jnp.float32
    w = wt_ref[0]                                       # (tm, 4) f32
    val = (v00_ref[0].astype(f32) * w[:, 0:1]
           + v01_ref[0].astype(f32) * w[:, 1:2]
           + v10_ref[0].astype(f32) * w[:, 2:3]
           + v11_ref[0].astype(f32) * w[:, 3:4])        # (tm, Cp) f32
    acc_ref[...] += jnp.dot(val.astype(jnp.bfloat16), wm_ref[0],
                            preferred_element_type=f32)

    @pl.when(k == pl.num_programs(1) - 1)
    def _finalize():
        o_ref[...] = (acc_ref[...] + b_ref[...]).astype(o_ref.dtype)


def deform_matmul(v00, v01, v10, v11, wts, w_mat, bias_pad):
    """v**: (K, M, Cp) bf16 corner samples; wts: (K, M, 4) f32 bilinear weights
    (validity folded); w_mat: (K, Cp, Npad) bf16; bias_pad: (1, Npad) f32.

    Returns (M, Npad) bfloat16.
    """
    K, M, Cp = v00.shape
    n_pad = w_mat.shape[-1]
    tm = M if M <= TM else TM            # full-dim block or a multiple of 8
    grid = (pl.cdiv(M, tm), K)           # reduction axis (K) last

    corner_spec = pl.BlockSpec((1, tm, Cp), lambda i, k: (k, i, 0))
    return pl.pallas_call(
        _deform_matmul_kernel,
        out_shape=jax.ShapeDtypeStruct((M, n_pad), jnp.bfloat16),
        grid=grid,
        in_specs=[corner_spec, corner_spec, corner_spec, corner_spec,
                  pl.BlockSpec((1, tm, 4), lambda i, k: (k, i, 0)),
                  pl.BlockSpec((1, Cp, n_pad), lambda i, k: (k, 0, 0)),
                  pl.BlockSpec((1, n_pad), lambda i, k: (0, 0))],
        out_specs=pl.BlockSpec((tm, n_pad), lambda i, k: (i, 0)),
        scratch_shapes=[pltpu.VMEM((tm, n_pad), jnp.float32)],
        compiler_params=pltpu.CompilerParams(
            dimension_semantics=("parallel", "arbitrary"),
            vmem_limit_bytes=48 * 1024 * 1024),   # <= 48 MiB: safe on v7x's 64 MiB
    )(v00, v01, v10, v11, wts, w_mat, bias_pad)


# ---------------------------------------------------------------------------
# XLA glue: deformable sampling preparation.  Only the 4 corner gathers (bf16)
# and one small (K, M, 4) f32 weight array are materialized; the weighted
# combine happens inside the Pallas kernel.
# ---------------------------------------------------------------------------
def _deform_gather(x_nhwc, offset, kh, kw, stride, pad, dil):
    """x_nhwc: (N, H, W, C) f32; offset: (N, OH, OW, 2*K) f32 (dy, dx per tap).

    Returns 4 corner arrays (K, M, Cp) bf16 (k-major rows, channel-padded) and
    one (K, M, 4) f32 bilinear-weight array with validity folded in.
    """
    N, H, W, C = x_nhwc.shape
    OH = _out_size(H, kh, stride, pad, dil)
    OW = _out_size(W, kw, stride, pad, dil)
    K = kh * kw
    M = N * OH * OW
    Cp = _round_up(C, SUB)

    xp = jnp.pad(x_nhwc, ((0, 0), (pad, pad), (pad, pad), (0, Cp - C)))
    Hp, Wp = H + 2 * pad, W + 2 * pad
    xp_flat = xp.reshape(N * Hp * Wp, Cp).astype(jnp.bfloat16)

    off = offset.reshape(N, OH, OW, K, 2)
    ky = (jnp.arange(K) // kw) * dil                          # (K,)
    kx = (jnp.arange(K) % kw) * dil
    py = (off[..., 0] + ky[None, None, None, :]
          + (jnp.arange(OH) * stride)[None, :, None, None])   # (N, OH, OW, K)
    px = (off[..., 1] + kx[None, None, None, :]
          + (jnp.arange(OW) * stride)[None, None, :, None])

    y0f = jnp.floor(py)
    x0f = jnp.floor(px)
    wy1, wx1 = py - y0f, px - x0f
    wy0, wx0 = 1.0 - wy1, 1.0 - wx1
    y0 = y0f.astype(jnp.int32)
    x0 = x0f.astype(jnp.int32)
    n_base = (jnp.arange(N) * (Hp * Wp))[:, None, None, None]  # (N,1,1,1)

    def corner(yi, xi, wgt):
        valid = (yi >= 0) & (yi < Hp) & (xi >= 0) & (xi < Wp)
        yc = jnp.clip(yi, 0, Hp - 1)
        xc = jnp.clip(xi, 0, Wp - 1)
        gidx = (n_base + yc * Wp + xc).transpose(3, 0, 1, 2).reshape(K, M)
        # TODO(synk): this row gather stays in XLA; next step per review is a
        # scalar-prefetched, double-buffered make_async_copy gather in-kernel.
        g = jnp.take(xp_flat, gidx, axis=0)                   # (K, M, Cp) bf16
        w = (wgt * valid.astype(wgt.dtype)).transpose(3, 0, 1, 2).reshape(K, M)
        return g, w

    v00, w00 = corner(y0,     x0,     wy0 * wx0)
    v01, w01 = corner(y0,     x0 + 1, wy0 * wx1)
    v10, w10 = corner(y0 + 1, x0,     wy1 * wx0)
    v11, w11 = corner(y0 + 1, x0 + 1, wy1 * wx1)
    wts = jnp.stack([w00, w01, w10, w11], axis=-1)            # (K, M, 4) f32
    return v00, v01, v10, v11, wts


# ---------------------------------------------------------------------------
# Module port.
# ---------------------------------------------------------------------------
class GaussWrapperPallas:
    """Pallas port of GaussWrapper -> GaussSphereDeformConvPack.

    GaussWrapper only stores `level` and forwards to the inner pack.
    # TODO(synk): GaussSphereDeformConvPack source is unavailable; the inner
    # module is implemented as a standard DCN "pack" (internal conv predicts
    # per-tap (dy, dx) offsets, main conv bilinearly samples at those offsets).
    # Gauss/Sphere-specific offset parameterization is not reproducible.
    """

    def __init__(self, key, in_channels, out_channels, *, level=0,
                 kernel_size=3, stride=1, padding=1, dilation=1,
                 groups=1, deformable_groups=1, bias=True):
        assert groups == 1 and deformable_groups == 1
        self.level = level
        self.in_channels = in_channels
        self.out_channels = out_channels
        self.kh = self.kw = kernel_size
        self.stride = stride
        self.padding = padding
        self.dilation = dilation

        k_w, k_b = jax.random.split(key, 2)
        fan_in = in_channels * kernel_size * kernel_size
        self.weight = (jax.random.normal(
            k_w, (out_channels, in_channels, kernel_size, kernel_size),
            jnp.float32) / jnp.sqrt(float(fan_in)))
        self.bias = (jax.random.normal(k_b, (out_channels,), jnp.float32) * 0.01
                     if bias else jnp.zeros((out_channels,), jnp.float32))

        # Offset branch zero-initialized, matching the reference DeformConvPack
        # (HWIO layout for the pure-NHWC conv).
        K = kernel_size * kernel_size
        off_ch = deformable_groups * 2 * K
        self.off_weight = jnp.zeros(
            (kernel_size, kernel_size, in_channels, off_ch), jnp.float32)
        self.off_bias = jnp.zeros((off_ch,), jnp.float32)

        # Pre-packed main-conv weight for the Pallas matmul: (K, Cp, Npad) bf16
        # (tap-major, channel-padded to a sublane multiple, out-channels padded
        # to a lane multiple) + f32 bias (1, Npad).
        self.n_pad = _round_up(out_channels, LANE)
        self.c_pad = _round_up(in_channels, SUB)
        w_kco = self.weight.transpose(2, 3, 1, 0).reshape(K, in_channels,
                                                          out_channels)
        self.w_mat = jnp.pad(
            w_kco, ((0, 0), (0, self.c_pad - in_channels),
                    (0, self.n_pad - out_channels))).astype(jnp.bfloat16)
        self.bias_pad = jnp.pad(
            self.bias, (0, self.n_pad - out_channels)).reshape(1, self.n_pad)

    def __call__(self, x):
        N, C, H, W = x.shape
        kh, kw = self.kh, self.kw
        s, p, d = self.stride, self.padding, self.dilation
        OH = _out_size(H, kh, s, p, d)
        OW = _out_size(W, kw, s, p, d)

        # NHWC once at entry; everything downstream stays NHWC.
        x_nhwc = jnp.transpose(x, (0, 2, 3, 1))

        # 1) offset-predicting conv, pure NHWC (no layout shuffles of x).
        offset = lax.conv_general_dilated(
            x_nhwc, self.off_weight, window_strides=(s, s),
            padding=[(p, p), (p, p)], rhs_dilation=(d, d),
            dimension_numbers=("NHWC", "HWIO", "NHWC"))
        offset = offset + self.off_bias.reshape(1, 1, 1, -1)   # (N, OH, OW, 2K)

        # 2) bilinear corner gathers (XLA glue); weights are (K, M, 4), the
        #    C-fold broadcast happens inside the Pallas kernel.
        v00, v01, v10, v11, wts = _deform_gather(x_nhwc, offset, kh, kw, s, p, d)

        # 3) fused bilinear-combine + per-tap matmul accumulation + bias.
        out_flat = deform_matmul(v00, v01, v10, v11, wts,
                                 self.w_mat, self.bias_pad)    # (M, Npad) bf16

        # Slice + reshape + transpose + f32 cast: one fused XLA copy of the
        # (small) un-padded result.
        out = out_flat[:, :self.out_channels].reshape(N, OH, OW,
                                                      self.out_channels)
        return out.transpose(0, 3, 1, 2).astype(jnp.float32)


if __name__ == "__main__":
    key = jax.random.PRNGKey(0)
    k_param, k_x = jax.random.split(key)
    N, C, H, W = 2, 4, 16, 16
    out_c = 8
    model = GaussWrapperPallas(k_param, C, out_c, level=0, kernel_size=3,
                               stride=1, padding=1, dilation=1, groups=1,
                               deformable_groups=1, bias=True)
    x = jax.random.normal(k_x, (N, C, H, W), jnp.float32)

    y = jax.jit(model.__call__)(x)
    jax.block_until_ready(y)
    assert y.shape == (N, out_c, H, W), y.shape

    # With the (reference) zero-initialized offset branch, the deformable conv
    # reduces to a plain conv -> cross-check against lax.conv (bf16 tolerance).
    ref = lax.conv_general_dilated(
        x, model.weight, window_strides=(1, 1), padding=[(1, 1), (1, 1)],
        rhs_dilation=(1, 1), dimension_numbers=("NCHW", "OIHW", "NCHW"))
    ref = ref + model.bias.reshape(1, -1, 1, 1)
    err = float(jnp.max(jnp.abs(y - ref)))
    assert err < 0.2, err

    print("KERNEL_OK")
</pallas_src>

<mosaic_0001>
module attributes {stable_mosaic.version = 11 : i64} {
  func.func @_deform_matmul_kernel(%arg0: i32, %arg1: i32, %arg2: memref<1x512x8xbf16, #tpu.memory_space<vmem>>, %arg3: memref<1x512x8xbf16, #tpu.memory_space<vmem>>, %arg4: memref<1x512x8xbf16, #tpu.memory_space<vmem>>, %arg5: memref<1x512x8xbf16, #tpu.memory_space<vmem>>, %arg6: memref<1x512x4xf32, #tpu.memory_space<vmem>>, %arg7: memref<1x8x128xbf16, #tpu.memory_space<vmem>>, %arg8: memref<1x128xf32, #tpu.memory_space<vmem>>, %arg9: memref<512x128xbf16, #tpu.memory_space<vmem>>, %arg10: memref<512x128xf32, #tpu.memory_space<vmem>>) attributes {dimension_semantics = [#tpu.dimension_semantics<parallel>, #tpu.dimension_semantics<arbitrary>], iteration_bounds = array<i64: 1, 9>, scalar_prefetch = 0 : i64, scratch_operands = 1 : i64, tpu.core_type = #tpu.core_type<tc>, window_params = [{transform_indices = @transform_0, window_bounds = array<i64: 1, 512, 8>}, {transform_indices = @transform_1, window_bounds = array<i64: 1, 512, 8>}, {transform_indices = @transform_2, window_bounds = array<i64: 1, 512, 8>}, {transform_indices = @transform_3, window_bounds = array<i64: 1, 512, 8>}, {transform_indices = @transform_4, window_bounds = array<i64: 1, 512, 4>}, {transform_indices = @transform_5, window_bounds = array<i64: 1, 8, 128>}, {pipeline_mode = #tpu.pipeline_mode<synchronous>, transform_indices = @transform_6, window_bounds = array<i64: 1, 128>}, {transform_indices = @transform_7, window_bounds = array<i64: 512, 128>}]} {
    %c0_i32 = arith.constant 0 : i32
    %0 = arith.cmpi eq, %arg1, %c0_i32 : i32
    %1 = arith.extui %0 : i1 to i32
    %c0_i32_0 = arith.constant 0 : i32
    %2 = arith.cmpi ne, %1, %c0_i32_0 : i32
    scf.if %2 {
      %cst_23 = arith.constant 0.000000e+00 : f32
      %42 = vector.broadcast %cst_23 : f32 to vector<512x128xf32>
      %c0_24 = arith.constant 0 : index
      %c0_25 = arith.constant 0 : index
      %43 = vector.load %arg10[%c0_24, %c0_25] : memref<512x128xf32, #tpu.memory_space<vmem>>, vector<512x128xf32>
      tpu.vector_store %arg10[%c0_24, %c0_25], %42 {strides = array<i32>} : memref<512x128xf32, #tpu.memory_space<vmem>>, vector<512x128xf32>,
    } else {
    }
    %c0 = arith.constant 0 : index
    %c0_1 = arith.constant 0 : index
    %c0_2 = arith.constant 0 : index
    %3 = vector.load %arg6[%c0, %c0_1, %c0_2] : memref<1x512x4xf32, #tpu.memory_space<vmem>>, vector<1x512x4xf32>
    %4 = vector.shape_cast %3 : vector<1x512x4xf32> to vector<512x4xf32>
    %c0_3 = arith.constant 0 : index
    %c0_4 = arith.constant 0 : index
    %c0_5 = arith.constant 0 : index
    %5 = vector.load %arg2[%c0_3, %c0_4, %c0_5] : memref<1x512x8xbf16, #tpu.memory_space<vmem>>, vector<1x512x8xbf16>
    %6 = vector.shape_cast %5 : vector<1x512x8xbf16> to vector<512x8xbf16>
    %7 = arith.extf %6 : vector<512x8xbf16> to vector<512x8xf32>
    %8 = vector.extract_strided_slice %4 {offsets = [0, 0], sizes = [512, 1], strides = [1, 1]} : vector<512x4xf32> to vector<512x1xf32>
    %9 = vector.broadcast %8 : vector<512x1xf32> to vector<512x8xf32>
    %10 = arith.mulf %7, %9 : vector<512x8xf32>
    %c0_6 = arith.constant 0 : index
    %c0_7 = arith.constant 0 : index
    %c0_8 = arith.constant 0 : index
    %11 = vector.load %arg3[%c0_6, %c0_7, %c0_8] : memref<1x512x8xbf16, #tpu.memory_space<vmem>>, vector<1x512x8xbf16>
    %12 = vector.shape_cast %11 : vector<1x512x8xbf16> to vector<512x8xbf16>
    %13 = arith.extf %12 : vector<512x8xbf16> to vector<512x8xf32>
    %14 = vector.extract_strided_slice %4 {offsets = [0, 1], sizes = [512, 1], strides = [1, 1]} : vector<512x4xf32> to vector<512x1xf32>
    %15 = vector.broadcast %14 : vector<512x1xf32> to vector<512x8xf32>
    %16 = arith.mulf %13, %15 : vector<512x8xf32>
    %17 = arith.addf %10, %16 : vector<512x8xf32>
    %c0_9 = arith.constant 0 : index
    %c0_10 = arith.constant 0 : index
    %c0_11 = arith.constant 0 : index
    %18 = vector.load %arg4[%c0_9, %c0_10, %c0_11] : memref<1x512x8xbf16, #tpu.memory_space<vmem>>, vector<1x512x8xbf16>
    %19 = vector.shape_cast %18 : vector<1x512x8xbf16> to vector<512x8xbf16>
    %20 = arith.extf %19 : vector<512x8xbf16> to vector<512x8xf32>
    %21 = vector.extract_strided_slice %4 {offsets = [0, 2], sizes = [512, 1], strides = [1, 1]} : vector<512x4xf32> to vector<512x1xf32>
    %22 = vector.broadcast %21 : vector<512x1xf32> to vector<512x8xf32>
    %23 = arith.mulf %20, %22 : vector<512x8xf32>
    %24 = arith.addf %17, %23 : vector<512x8xf32>
    %c0_12 = arith.constant 0 : index
    %c0_13 = arith.constant 0 : index
    %c0_14 = arith.constant 0 : index
    %25 = vector.load %arg5[%c0_12, %c0_13, %c0_14] : memref<1x512x8xbf16, #tpu.memory_space<vmem>>, vector<1x512x8xbf16>
    %26 = vector.shape_cast %25 : vector<1x512x8xbf16> to vector<512x8xbf16>
    %27 = arith.extf %26 : vector<512x8xbf16> to vector<512x8xf32>
    %28 = vector.extract_strided_slice %4 {offsets = [0, 3], sizes = [512, 1], strides = [1, 1]} : vector<512x4xf32> to vector<512x1xf32>
    %29 = vector.broadcast %28 : vector<512x1xf32> to vector<512x8xf32>
    %30 = arith.mulf %27, %29 : vector<512x8xf32>
    %31 = arith.addf %24, %30 : vector<512x8xf32>
    %c0_15 = arith.constant 0 : index
    %c0_16 = arith.constant 0 : index
    %32 = vector.load %arg10[%c0_15, %c0_16] : memref<512x128xf32, #tpu.memory_space<vmem>>, vector<512x128xf32>
    %33 = arith.truncf %31 : vector<512x8xf32> to vector<512x8xbf16>
    %c0_17 = arith.constant 0 : index
    %c0_18 = arith.constant 0 : index
    %c0_19 = arith.constant 0 : index
    %34 = vector.load %arg7[%c0_17, %c0_18, %c0_19] : memref<1x8x128xbf16, #tpu.memory_space<vmem>>, vector<1x8x128xbf16>
    %35 = vector.shape_cast %34 : vector<1x8x128xbf16> to vector<8x128xbf16>
    %cst = arith.constant dense<0.000000e+00> : vector<512x128xf32>
    %36 = tpu.matmul %33, %35, %cst {dimension_numbers = #tpu.dot_dimension_numbers<[1], [0], [0], [1], [0, 0, 1, 1], [], []>} : vector<512x8xbf16>, vector<8x128xbf16>, vector<512x128xf32> -> vector<512x128xf32>
    %37 = arith.addf %32, %36 : vector<512x128xf32>
    %c0_20 = arith.constant 0 : index
    %c0_21 = arith.constant 0 : index
    %38 = vector.load %arg10[%c0_20, %c0_21] : memref<512x128xf32, #tpu.memory_space<vmem>>, vector<512x128xf32>
    tpu.vector_store %arg10[%c0_20, %c0_21], %37 {strides = array<i32>} : memref<512x128xf32, #tpu.memory_space<vmem>>, vector<512x128xf32>,
    %c8_i32 = arith.constant 8 : i32
    %39 = arith.cmpi eq, %arg1, %c8_i32 : i32
    %40 = arith.extui %39 : i1 to i32
    %c0_i32_22 = arith.constant 0 : i32
    %41 = arith.cmpi ne, %40, %c0_i32_22 : i32
    scf.if %41 {
      %c0_23 = arith.constant 0 : index
      %c0_24 = arith.constant 0 : index
      %42 = vector.load %arg10[%c0_23, %c0_24] : memref<512x128xf32, #tpu.memory_space<vmem>>, vector<512x128xf32>
      %c0_25 = arith.constant 0 : index
      %c0_26 = arith.constant 0 : index
      %43 = vector.load %arg8[%c0_25, %c0_26] : memref<1x128xf32, #tpu.memory_space<vmem>>, vector<1x128xf32>
      %44 = vector.broadcast %43 : vector<1x128xf32> to vector<512x128xf32>
      %45 = arith.addf %42, %44 : vector<512x128xf32>
      %46 = arith.truncf %45 : vector<512x128xf32> to vector<512x128xbf16>
      %c0_27 = arith.constant 0 : index
      %c0_28 = arith.constant 0 : index
      %47 = vector.load %arg9[%c0_27, %c0_28] : memref<512x128xbf16, #tpu.memory_space<vmem>>, vector<512x128xbf16>
      tpu.vector_store %arg9[%c0_27, %c0_28], %46 {strides = array<i32>} : memref<512x128xbf16, #tpu.memory_space<vmem>>, vector<512x128xbf16>,
    } else {
    }
    return
  }
  func.func @transform_0(%arg0: i32, %arg1: i32) -> (i32, i32, i32) {
    %c0_i32 = arith.constant 0 : i32
    %c0_i32_0 = arith.constant 0 : i32
    return %arg1, %arg0, %c0_i32 : i32, i32, i32
  }
  func.func @transform_1(%arg0: i32, %arg1: i32) -> (i32, i32, i32) {
    %c0_i32 = arith.constant 0 : i32
    %c0_i32_0 = arith.constant 0 : i32
    return %arg1, %arg0, %c0_i32 : i32, i32, i32
  }
  func.func @transform_2(%arg0: i32, %arg1: i32) -> (i32, i32, i32) {
    %c0_i32 = arith.constant 0 : i32
    %c0_i32_0 = arith.constant 0 : i32
    return %arg1, %arg0, %c0_i32 : i32, i32, i32
  }
  func.func @transform_3(%arg0: i32, %arg1: i32) -> (i32, i32, i32) {
    %c0_i32 = arith.constant 0 : i32
    %c0_i32_0 = arith.constant 0 : i32
    return %arg1, %arg0, %c0_i32 : i32, i32, i32
  }
  func.func @transform_4(%arg0: i32, %arg1: i32) -> (i32, i32, i32) {
    %c0_i32 = arith.constant 0 : i32
    %c0_i32_0 = arith.constant 0 : i32
    return %arg1, %arg0, %c0_i32 : i32, i32, i32
  }
  func.func @transform_5(%arg0: i32, %arg1: i32) -> (i32, i32, i32) {
    %c0_i32 = arith.constant 0 : i32
    %c0_i32_0 = arith.constant 0 : i32
    %c0_i32_1 = arith.constant 0 : i32
    return %arg1, %c0_i32, %c0_i32_0 : i32, i32, i32
  }
  func.func @transform_6(%arg0: i32, %arg1: i32) -> (i32, i32) {
    %c0_i32 = arith.constant 0 : i32
    %c0_i32_0 = arith.constant 0 : i32
    %c0_i32_1 = arith.constant 0 : i32
    return %c0_i32, %c0_i32_0 : i32, i32
  }
  func.func @transform_7(%arg0: i32, %arg1: i32) -> (i32, i32) {
    %c0_i32 = arith.constant 0 : i32
    %c0_i32_0 = arith.constant 0 : i32
    return %arg0, %c0_i32 : i32, i32
  }
}

</mosaic_0001>

<bundles_post_ra>
// kernel: a_call__.1
= control target key start
LH: loop header
LB: loop body
LE: loop exit
PB: predicated region body
PF: predicated region fallthrough
CT: control target
= control target key end

     0   :  { %s5126_s24 = smov 0   ;;  %s5128_s25 = smov 0   ;;  %s7015_s0 = inlined_call_operand.vmem [shape: bf16[9,512,8], index: 0, kind: input, shape index: {}]   ;;  %s7016_s1 = inlined_call_operand.vmem [shape: bf16[9,512,8], index: 1, kind: input, shape index: {}]   ;;  %s7017_s2 = inlined_call_operand.vmem [shape: bf16[9,512,8], index: 2, kind: input, shape index: {}]   ;;  %s7018_s3 = inlined_call_operand.vmem [shape: bf16[9,512,8], index: 3, kind: input, shape index: {}]   ;;  %s7019_s4 = inlined_call_operand.vmem [shape: f32[9,512,4], index: 4, kind: input, shape index: {}]   ;;  %s7020_s5 = inlined_call_operand.vmem [shape: bf16[9,8,128], index: 5, kind: input, shape index: {}]   ;;  %s7021_s6 = inlined_call_operand.vmem [shape: f32[1,128], index: 6, kind: input, shape index: {}]   ;;  %s7022_s7 = inlined_call_operand.vmem [shape: bf16[512,128], index: 7, kind: output, shape index: {}]  }
   0x1   :  { %s5130_s26 = smov 0  }
   0x2 LB: > { %s26_s27 = sadd.s32 1, %s5075_s25  ;;  %p3879_p0 = scmp.ge.s32.totalorder %s5079_s26, 1  ;;  %s5079_s26 = sphi %s5130_s26, %s17_s26   ;;  %s5075_s25 = sphi %s5128_s25, %s7447_s25   ;;  %s5071_s24 = sphi %s5126_s24, %s7446_s24  }
   0x3   : > { %p27_p1 = scmp.ge.s32.totalorder %s26_s27, 9  ;;  %p333_p2 = scmp.lt.s32.totalorder %s5079_s26, 10 }
   0x5   : > { %s7449_s27 = smov (%p27_p1, %s26_s27), 0  ;;  %p334_p3 = pnand %p3879_p0, %p333_p2 }
   0x7   : > { %337 = sbr.rel (%p334_p3) target bundleno = 972 (0x3cc), region = 48 }
   0xe   : > { %p410_p4 = scmp.lt.s32.totalorder %s5071_s24, 8  ;;  %p3891_p5 = scmp.ne.s32.totalorder %s5071_s24, 0 }
   0xf   : > { %v5081_v0 = vmov (!%p3891_p5), 0.0  }
  0x10   : > { %s411_s28 = scalar_select %p410_p4, %s5071_s24, 8 }
  0x11   : > { %473 = sbr.rel (%p3891_p5) target bundleno = 49 (0x31), region = 52  ;;  %474 = vst [vmem:[#allocation2] sm:$0xff] (!%p3891_p5), %v5081_v0  ;;  %475 = vst [vmem:[#allocation2 + $0x8] sm:$0xff] (!%p3891_p5), %v5081_v0 }
  0x12   : > { %s3994_s29 = sshll.u32 %s411_s28, 8  ;;  %s3998_s30 = sshll.u32 %s411_s28, 9  ;;  %476 = vst [vmem:[#allocation2 + $0x10] sm:$0xff] (!%p3891_p5), %v5081_v0  ;;  %477 = vst [vmem:[#allocation2 + $0x18] sm:$0xff] (!%p3891_p5), %v5081_v0 }
  0x13   : > { %s5151_s10 = scalar_lea.vmem %s7015_s0, %s3994_s29  ;;  %s5156_s13 = scalar_lea.vmem %s7016_s1, %s3994_s29  ;;  %478 = vst [vmem:[#allocation2 + $0x20] sm:$0xff] (!%p3891_p5), %v5081_v0  ;;  %479 = vst [vmem:[#allocation2 + $0x28] sm:$0xff] (!%p3891_p5), %v5081_v0 }
  0x14   : > { %s5161_s16 = scalar_lea.vmem %s7017_s2, %s3994_s29  ;;  %s5166_s19 = scalar_lea.vmem %s7018_s3, %s3994_s29  ;;  %480 = vst [vmem:[#allocation2 + $0x30] sm:$0xff] (!%p3891_p5), %v5081_v0  ;;  %481 = vst [vmem:[#allocation2 + $0x38] sm:$0xff] (!%p3891_p5), %v5081_v0 }
  0x15   : > { %s5171_s22 = scalar_lea.vmem %s7019_s4, %s3998_s30  ;;  %s3890_s23 = sshll.u32 %s411_s28, 2  ;;  %482 = vst [vmem:[#allocation2 + $0x40] sm:$0xff] (!%p3891_p5), %v5081_v0  ;;  %483 = vst [vmem:[#allocation2 + $0x48] sm:$0xff] (!%p3891_p5), %v5081_v0 }
  0x16   : > { %s5176_s11 = scalar_lea.vmem %s7020_s5, %s3890_s23  ;;  %484 = vst [vmem:[#allocation2 + $0x50] sm:$0xff] (!%p3891_p5), %v5081_v0  ;;  %485 = vst [vmem:[#allocation2 + $0x58] sm:$0xff] (!%p3891_p5), %v5081_v0 }
  0x17   : > { %486 = vst [vmem:[#allocation2 + $0x60] sm:$0xff] (!%p3891_p5), %v5081_v0  ;;  %487 = vst [vmem:[#allocation2 + $0x68] sm:$0xff] (!%p3891_p5), %v5081_v0 }
  0x18   : > { %488 = vst [vmem:[#allocation2 + $0x70] sm:$0xff] %v5081_v0  ;;  %489 = vst [vmem:[#allocation2 + $0x78] sm:$0xff] %v5081_v0 }
  0x19   : > { %490 = vst [vmem:[#allocation2 + $0x80] sm:$0xff] %v5081_v0  ;;  %491 = vst [vmem:[#allocation2 + $0x88] sm:$0xff] %v5081_v0 }
  0x1a   : > { %492 = vst [vmem:[#allocation2 + $0x90] sm:$0xff] %v5081_v0  ;;  %493 = vst [vmem:[#allocation2 + $0x98] sm:$0xff] %v5081_v0 }
  0x1b   : > { %494 = vst [vmem:[#allocation2 + $0xa0] sm:$0xff] %v5081_v0  ;;  %495 = vst [vmem:[#allocation2 + $0xa8] sm:$0xff] %v5081_v0 }
  0x1c   : > { %496 = vst [vmem:[#allocation2 + $0xb0] sm:$0xff] %v5081_v0  ;;  %497 = vst [vmem:[#allocation2 + $0xb8] sm:$0xff] %v5081_v0 }
  0x1d   : > { %498 = vst [vmem:[#allocation2 + $0xc0] sm:$0xff] %v5081_v0  ;;  %499 = vst [vmem:[#allocation2 + $0xc8] sm:$0xff] %v5081_v0 }
  0x1e   : > { %500 = vst [vmem:[#allocation2 + $0xd0] sm:$0xff] %v5081_v0  ;;  %501 = vst [vmem:[#allocation2 + $0xd8] sm:$0xff] %v5081_v0 }
  0x1f   : > { %502 = vst [vmem:[#allocation2 + $0xe0] sm:$0xff] %v5081_v0  ;;  %503 = vst [vmem:[#allocation2 + $0xe8] sm:$0xff] %v5081_v0 }
  0x20   : > { %504 = vst [vmem:[#allocation2 + $0xf0] sm:$0xff] %v5081_v0  ;;  %505 = vst [vmem:[#allocation2 + $0xf8] sm:$0xff] %v5081_v0 }
  0x21   : > { %506 = vst [vmem:[#allocation2 + $0x100] sm:$0xff] %v5081_v0  ;;  %507 = vst [vmem:[#allocation2 + $0x108] sm:$0xff] %v5081_v0 }
  0x22   : > { %508 = vst [vmem:[#allocation2 + $0x110] sm:$0xff] %v5081_v0  ;;  %509 = vst [vmem:[#allocation2 + $0x118] sm:$0xff] %v5081_v0 }
  0x23   : > { %510 = vst [vmem:[#allocation2 + $0x120] sm:$0xff] %v5081_v0  ;;  %511 = vst [vmem:[#allocation2 + $0x128] sm:$0xff] %v5081_v0 }
  0x24   : > { %512 = vst [vmem:[#allocation2 + $0x130] sm:$0xff] %v5081_v0  ;;  %513 = vst [vmem:[#allocation2 + $0x138] sm:$0xff] %v5081_v0 }
  0x25   : > { %514 = vst [vmem:[#allocation2 + $0x140] sm:$0xff] %v5081_v0  ;;  %515 = vst [vmem:[#allocation2 + $0x148] sm:$0xff] %v5081_v0 }
  0x26   : > { %516 = vst [vmem:[#allocation2 + $0x150] sm:$0xff] %v5081_v0  ;;  %517 = vst [vmem:[#allocation2 + $0x158] sm:$0xff] %v5081_v0 }
  0x27   : > { %518 = vst [vmem:[#allocation2 + $0x160] sm:$0xff] %v5081_v0  ;;  %519 = vst [vmem:[#allocation2 + $0x168] sm:$0xff] %v5081_v0 }
  0x28   : > { %520 = vst [vmem:[#allocation2 + $0x170] sm:$0xff] %v5081_v0  ;;  %521 = vst [vmem:[#allocation2 + $0x178] sm:$0xff] %v5081_v0 }
  0x29   : > { %522 = vst [vmem:[#allocation2 + $0x180] sm:$0xff] %v5081_v0  ;;  %523 = vst [vmem:[#allocation2 + $0x188] sm:$0xff] %v5081_v0 }
  0x2a   : > { %524 = vst [vmem:[#allocation2 + $0x190] sm:$0xff] %v5081_v0  ;;  %525 = vst [vmem:[#allocation2 + $0x198] sm:$0xff] %v5081_v0 }
  0x2b   : > { %526 = vst [vmem:[#allocation2 + $0x1a0] sm:$0xff] %v5081_v0  ;;  %527 = vst [vmem:[#allocation2 + $0x1a8] sm:$0xff] %v5081_v0 }
  0x2c   : > { %528 = vst [vmem:[#allocation2 + $0x1b0] sm:$0xff] %v5081_v0  ;;  %529 = vst [vmem:[#allocation2 + $0x1b8] sm:$0xff] %v5081_v0 }
  0x2d   : > { %530 = vst [vmem:[#allocation2 + $0x1c0] sm:$0xff] %v5081_v0  ;;  %531 = vst [vmem:[#allocation2 + $0x1c8] sm:$0xff] %v5081_v0 }
  0x2e   : > { %532 = vst [vmem:[#allocation2 + $0x1d0] sm:$0xff] %v5081_v0  ;;  %533 = vst [vmem:[#allocation2 + $0x1d8] sm:$0xff] %v5081_v0 }
  0x2f   : > { %534 = vst [vmem:[#allocation2 + $0x1e0] sm:$0xff] %v5081_v0  ;;  %535 = vst [vmem:[#allocation2 + $0x1e8] sm:$0xff] %v5081_v0 }
  0x30   : > { %536 = vst [vmem:[#allocation2 + $0x1f0] sm:$0xff] %v5081_v0  ;;  %537 = vst [vmem:[#allocation2 + $0x1f8] sm:$0xff] %v5081_v0 }
  0x31 PF: > { %v5244_v1 = vld [vmem:[%s5171_s22 + $0x10] sm:$0xff]  ;;  %v5247_v2 = vld [vmem:[%s5171_s22] sm:$0xff]  ;;  %v5082_v3 = vmov 0   ;;  %v5252_v4 = vld [vmem:[%s5171_s22 + $0x18] sm:$0xff]  ;;  %vm2844_vm0 = vcmask 1043456   ;;  %vm2747_vm1 = vcmask 64512  }
  0x32   : > { %5023 = vset.pattern.permute.xlu1 %v5082_v3  ;;  %5022 = vset.pattern.permute.xlu0 %v5082_v3  ;;  %v5255_v5 = vld [vmem:[%s5171_s22 + $0x8] sm:$0xff]  ;;  %v5263_v7 = vld [vmem:[%s5171_s22 + $0x20] sm:$0xff]  ;;  %v5268_v8 = vld [vmem:[%s5171_s22 + $0x38] sm:$0xff]  ;;  %p3924_p6 = scmp.ne.s32.totalorder %s5071_s24, 8 }
  0x33   : > { %742 = vperm.xlu1 %5023, %v5244_v1   ;;  %732 = vperm.xlu0 %5022, %v5247_v2   ;;  %v5260_v6 = vld [vmem:[%s5171_s22 + $0x28] sm:$0xff]  ;;  %v5271_v9 = vld [vmem:[%s5171_s22 + $0x30] sm:$0xff]  ;;  %v5279_v11 = vld [vmem:[%s5171_s22 + $0x40] sm:$0xff] }
  0x34   : > { %v5276_v10 = vld [vmem:[%s5171_s22 + $0x48] sm:$0xff]  ;;  %v5284_v12 = vld [vmem:[%s5171_s22 + $0x58] sm:$0xff]  ;;  %v5287_v13 = vld [vmem:[%s5171_s22 + $0x50] sm:$0xff] }
  0x35   : > { %v5292_v14 = vld [vmem:[%s5171_s22 + $0x68] sm:$0xff]  ;;  %v5295_v15 = vld [vmem:[%s5171_s22 + $0x60] sm:$0xff]  ;;  %v5300_v16 = vld [vmem:[%s5171_s22 + $0x78] sm:$0xff] }
  0x36   : > { %v5303_v17 = vld [vmem:[%s5171_s22 + $0x70] sm:$0xff]  ;;  %v5308_v18 = vld [vmem:[%s5171_s22 + $0x88] sm:$0xff]  ;;  %v5311_v19 = vld [vmem:[%s5171_s22 + $0x80] sm:$0xff] }
  0x37   : > { %747 = vperm.xlu1 %5023, %v5252_v4   ;;  %737 = vperm.xlu0 %5022, %v5255_v5   ;;  %v5316_v20 = vld [vmem:[%s5171_s22 + $0x98] sm:$0xff]  ;;  %v5319_v21 = vld [vmem:[%s5171_s22 + $0x90] sm:$0xff]  ;;  %v5324_v22 = vld [vmem:[%s5171_s22 + $0xa8] sm:$0xff] }
  0x38   : > { %v5327_v23 = vld [vmem:[%s5171_s22 + $0xa0] sm:$0xff]  ;;  %v5332_v24 = vld [vmem:[%s5171_s22 + $0xb8] sm:$0xff]  ;;  %v5335_v25 = vld [vmem:[%s5171_s22 + $0xb0] sm:$0xff] }
  0x39   : > { %v5340_v26 = vld [vmem:[%s5171_s22 + $0xc8] sm:$0xff]  ;;  %v5343_v27 = vld [vmem:[%s5171_s22 + $0xc0] sm:$0xff]  ;;  %v5348_v28 = vld [vmem:[%s5171_s22 + $0xd8] sm:$0xff] }
  0x3a   : > { %v5351_v29 = vld [vmem:[%s5171_s22 + $0xd0] sm:$0xff]  ;;  %v5356_v30 = vld [vmem:[%s5171_s22 + $0xe8] sm:$0xff]  ;;  %v5359_v31 = vld [vmem:[%s5171_s22 + $0xe0] sm:$0xff] }
  0x3b   : > { %757 = vperm.xlu1 %5023, %v5260_v6   ;;  %752 = vperm.xlu0 %5022, %v5263_v7   ;;  %v5364_v32 = vld [vmem:[%s5171_s22 + $0xf8] sm:$0xff]  ;;  %v5367_v33 = vld [vmem:[%s5171_s22 + $0xf0] sm:$0xff]  ;;  %v5372_v34 = vld [vmem:[%s5171_s22 + $0x108] sm:$0xff] }
  0x3c   : > { %v5375_v35 = vld [vmem:[%s5171_s22 + $0x100] sm:$0xff]  ;;  %v5380_v36 = vld [vmem:[%s5171_s22 + $0x118] sm:$0xff]  ;;  %v5383_v37 = vld [vmem:[%s5171_s22 + $0x110] sm:$0xff] }
  0x3d   : > { %v5388_v38 = vld [vmem:[%s5171_s22 + $0x128] sm:$0xff]  ;;  %v5391_v39 = vld [vmem:[%s5171_s22 + $0x120] sm:$0xff]  ;;  %v5396_v40 = vld [vmem:[%s5171_s22 + $0x138] sm:$0xff] }
  0x3e   : > { %v5399_v41 = vld [vmem:[%s5171_s22 + $0x130] sm:$0xff]  ;;  %v5404_v42 = vld [vmem:[%s5171_s22 + $0x148] sm:$0xff]  ;;  %v5407_v43 = vld [vmem:[%s5171_s22 + $0x140] sm:$0xff] }
  0x3f   : > { %767 = vperm.xlu1 %5023, %v5268_v8   ;;  %762 = vperm.xlu0 %5022, %v5271_v9   ;;  %v5412_v44 = vld [vmem:[%s5171_s22 + $0x158] sm:$0xff]  ;;  %v5415_v45 = vld [vmem:[%s5171_s22 + $0x150] sm:$0xff]  ;;  %v5420_v46 = vld [vmem:[%s5171_s22 + $0x168] sm:$0xff] }
  0x40   : > { %v5423_v47 = vld [vmem:[%s5171_s22 + $0x160] sm:$0xff]  ;;  %v5428_v48 = vld [vmem:[%s5171_s22 + $0x178] sm:$0xff]  ;;  %v5431_v49 = vld [vmem:[%s5171_s22 + $0x170] sm:$0xff] }
  0x41   : > { %v5436_v50 = vld [vmem:[%s5171_s22 + $0x188] sm:$0xff]  ;;  %v5439_v51 = vld [vmem:[%s5171_s22 + $0x180] sm:$0xff]  ;;  %v5444_v52 = vld [vmem:[%s5171_s22 + $0x198] sm:$0xff] }
  0x42   : > { %v5447_v53 = vld [vmem:[%s5171_s22 + $0x190] sm:$0xff]  ;;  %v5452_v54 = vld [vmem:[%s5171_s22 + $0x1a8] sm:$0xff]  ;;  %v5455_v55 = vld [vmem:[%s5171_s22 + $0x1a0] sm:$0xff] }
  0x43   : > { %777 = vperm.xlu1 %5023, %v5276_v10   ;;  %772 = vperm.xlu0 %5022, %v5279_v11   ;;  %7049 = vst [vmem:[#allocation3_spill] sm:$0xff] %v5447_v53  ;;  %7050 = vst [vmem:[#allocation4_spill] sm:$0xff] %v5455_v55  ;;  %v5460_v56 = vld [vmem:[%s5171_s22 + $0x1b8] sm:$0xff]  ;;  %v5463_v57 = vld [vmem:[%s5171_s22 + $0x1b0] sm:$0xff] }
  0x44   : > { %7051 = vst [vmem:[#allocation5_spill] sm:$0xff] %v5460_v56  ;;  %7052 = vst [vmem:[#allocation6_spill] sm:$0xff] %v5463_v57  ;;  %v5468_v58 = vld [vmem:[%s5171_s22 + $0x1c8] sm:$0xff]  ;;  %v5471_v59 = vld [vmem:[%s5171_s22 + $0x1c0] sm:$0xff] }
  0x45   : > { %7053 = vst [vmem:[#allocation7_spill] sm:$0xff] %v5468_v58  ;;  %v5476_v60 = vld [vmem:[%s5171_s22 + $0x1d8] sm:$0xff]  ;;  %v5479_v61 = vld [vmem:[%s5171_s22 + $0x1d0] sm:$0xff]  ;;  %v5484_v62 = vld [vmem:[%s5171_s22 + $0x1e8] sm:$0xff] }
  0x46   : > { %7054 = vst [vmem:[#allocation8_spill] sm:$0xff] %v5476_v60  ;;  %7055 = vst [vmem:[#allocation9_spill] sm:$0xff] %v5479_v61  ;;  %v5487_v63 = vld [vmem:[%s5171_s22 + $0x1e0] sm:$0xff]  ;;  %v5492_v0 = vld [vmem:[%s5171_s22 + $0x1f8] sm:$0xff] }
  0x47   : > { %787 = vperm.xlu1 %5023, %v5284_v12   ;;  %782 = vperm.xlu0 %5022, %v5287_v13   ;;  %7056 = vst [vmem:[#allocation10_spill] sm:$0xff] %v5484_v62  ;;  %7057 = vst [vmem:[#allocation11_spill] sm:$0xff] %v5487_v63  ;;  %v5495_v3 = vld [vmem:[%s5171_s22 + $0x1f0] sm:$0xff] }
  0x48   : > { %7058 = vst [vmem:[#allocation12_spill] sm:$0xff] %v5492_v0 }
  0x4b   : > { %797 = vperm.xlu1 %5023, %v5292_v14   ;;  %792 = vperm.xlu0 %5022, %v5295_v15  }
  0x4f   : > { %807 = vperm.xlu1 %5023, %v5300_v16   ;;  %802 = vperm.xlu0 %5022, %v5303_v17  }
  0x53   : > { %817 = vperm.xlu1 %5023, %v5308_v18   ;;  %812 = vperm.xlu0 %5022, %v5311_v19  }
  0x57   : > { %827 = vperm.xlu1 %5023, %v5316_v20   ;;  %822 = vperm.xlu0 %5022, %v5319_v21  }
  0x5b   : > { %837 = vperm.xlu1 %5023, %v5324_v22   ;;  %832 = vperm.xlu0 %5022, %v5327_v23  }
  0x5f   : > { %847 = vperm.xlu1 %5023, %v5332_v24   ;;  %842 = vperm.xlu0 %5022, %v5335_v25  }
  0x63   : > { %857 = vperm.xlu1 %5023, %v5340_v26   ;;  %852 = vperm.xlu0 %5022, %v5343_v27  }
  0x67   : > { %867 = vperm.xlu1 %5023, %v5348_v28   ;;  %862 = vperm.xlu0 %5022, %v5351_v29  }
  0x6b   : > { %877 = vperm.xlu1 %5023, %v5356_v30   ;;  %872 = vperm.xlu0 %5022, %v5359_v31  }
  0x6f   : > { %887 = vperm.xlu1 %5023, %v5364_v32   ;;  %882 = vperm.xlu0 %5022, %v5367_v33  }
  0x73   : > { %897 = vperm.xlu1 %5023, %v5372_v34   ;;  %892 = vperm.xlu0 %5022, %v5375_v35  }
  0x77   : > { %907 = vperm.xlu1 %5023, %v5380_v36   ;;  %902 = vperm.xlu0 %5022, %v5383_v37  }
  0x7b   : > { %917 = vperm.xlu1 %5023, %v5388_v38   ;;  %912 = vperm.xlu0 %5022, %v5391_v39  }
  0x7f   : > { %927 = vperm.xlu1 %5023, %v5396_v40   ;;  %922 = vperm.xlu0 %5022, %v5399_v41  }
  0x83   : > { %937 = vperm.xlu1 %5023, %v5404_v42   ;;  %932 = vperm.xlu0 %5022, %v5407_v43  }
  0x87   : > { %947 = vperm.xlu1 %5023, %v5412_v44   ;;  %942 = vperm.xlu0 %5022, %v5415_v45  }
  0x8b   : > { %957 = vperm.xlu1 %5023, %v5420_v46   ;;  %952 = vperm.xlu0 %5022, %v5423_v47  }
  0x8f   : > { %967 = vperm.xlu1 %5023, %v5428_v48   ;;  %962 = vperm.xlu0 %5022, %v5431_v49  }
  0x93   : > { %977 = vperm.xlu1 %5023, %v5436_v50   ;;  %972 = vperm.xlu0 %5022, %v5439_v51  }
  0x97   : > { %987 = vperm.xlu1 %5023, %v5444_v52   ;;  %982 = vperm.xlu0 %5022, %v5447_v53  }
  0x9b   : > { %997 = vperm.xlu1 %5023, %v5452_v54   ;;  %992 = vperm.xlu0 %5022, %v5455_v55  }
  0x9f   : > { %1007 = vperm.xlu1 %5023, %v5460_v56   ;;  %1002 = vperm.xlu0 %5022, %v5463_v57  }
  0xa3   : > { %1017 = vperm.xlu1 %5023, %v5468_v58   ;;  %1012 = vperm.xlu0 %5022, %v5471_v59  }
  0xa7   : > { %1027 = vperm.xlu1 %5023, %v5476_v60   ;;  %1022 = vperm.xlu0 %5022, %v5479_v61   ;;  %v5083_v61 = vmov 1  }
  0xab   : > { %1037 = vperm.xlu1 %5023, %v5484_v62   ;;  %1032 = vperm.xlu0 %5022, %v5487_v63  }
  0xaf   : > { %1047 = vperm.xlu1 %5023, %v5492_v0   ;;  %1042 = vperm.xlu0 %5022, %v5495_v3  }
  0xb2   : > { %v5499_v58 = vpop.permute.xlu1 %742  ;;  %v5501_v60 = vpop.permute.xlu0 %732 }
  0xb3   : > { %7059 = vst [vmem:[#allocation13_spill] sm:$0xff] %v5499_v58  ;;  %7060 = vst [vmem:[#allocation14_spill] sm:$0xff] %v5501_v60  ;;  %5025 = vset.pattern.permute.xlu1 %v5083_v61  ;;  %5024 = vset.pattern.permute.xlu0 %v5083_v61 }
  0xb4   : > { %1247 = vperm.xlu1 %5025, %v5255_v5   ;;  %1243 = vperm.xlu0 %5024, %v5247_v2  }
  0xb6   : > { %v5505_v62 = vpop.permute.xlu1 %747  ;;  %v5507_v63 = vpop.permute.xlu0 %737 }
  0xb7   : > { %7061 = vst [vmem:[#allocation15_spill] sm:$0xff] %v5505_v62  ;;  %7062 = vst [vmem:[#allocation16_spill] sm:$0xff] %v5507_v63 }
  0xb8   : > { %1251 = vperm.xlu1 %5025, %v5244_v1   ;;  %1255 = vperm.xlu0 %5024, %v5252_v4  }
  0xba   : > { %v5511_v0 = vpop.permute.xlu1 %757  ;;  %v5513_v58 = vpop.permute.xlu0 %752 }
  0xbb   : > { %7063 = vst [vmem:[#allocation17_spill] sm:$0xff] %v5511_v0  ;;  %7064 = vst [vmem:[#allocation18_spill] sm:$0xff] %v5513_v58 }
  0xbc   : > { %1259 = vperm.xlu1 %5025, %v5263_v7   ;;  %1263 = vperm.xlu0 %5024, %v5260_v6  }
  0xbe   : > { %v5517_v61 = vpop.permute.xlu1 %767  ;;  %v5519_v60 = vpop.permute.xlu0 %762 }
  0xbf   : > { %7065 = vst [vmem:[#allocation19_spill] sm:$0xff] %v5517_v61  ;;  %7066 = vst [vmem:[#allocation20_spill] sm:$0xff] %v5519_v60 }
  0xc0   : > { %1267 = vperm.xlu1 %5025, %v5271_v9   ;;  %1271 = vperm.xlu0 %5024, %v5268_v8  }
  0xc2   : > { %v5523_v63 = vpop.permute.xlu1 %777  ;;  %v5525_v62 = vpop.permute.xlu0 %772 }
  0xc3   : > { %7067 = vst [vmem:[#allocation21_spill] sm:$0xff] %v5523_v63  ;;  %7068 = vst [vmem:[#allocation22_spill] sm:$0xff] %v5525_v62 }
  0xc4   : > { %1275 = vperm.xlu1 %5025, %v5279_v11   ;;  %1279 = vperm.xlu0 %5024, %v5276_v10  }
  0xc6   : > { %v5529_v58 = vpop.permute.xlu1 %787  ;;  %v5531_v0 = vpop.permute.xlu0 %782 }
  0xc7   : > { %7069 = vst [vmem:[#allocation23_spill] sm:$0xff] %v5529_v58  ;;  %7070 = vst [vmem:[#allocation24_spill] sm:$0xff] %v5531_v0 }
  0xc8   : > { %1283 = vperm.xlu1 %5025, %v5287_v13   ;;  %1287 = vperm.xlu0 %5024, %v5284_v12  }
  0xca   : > { %v5535_v60 = vpop.permute.xlu1 %797  ;;  %v5537_v61 = vpop.permute.xlu0 %792 }
  0xcb   : > { %7071 = vst [vmem:[#allocation25_spill] sm:$0xff] %v5535_v60  ;;  %7072 = vst [vmem:[#allocation26_spill] sm:$0xff] %v5537_v61 }
  0xcc   : > { %1291 = vperm.xlu1 %5025, %v5295_v15   ;;  %1295 = vperm.xlu0 %5024, %v5292_v14  }
  0xce   : > { %v5541_v62 = vpop.permute.xlu1 %807  ;;  %v5543_v63 = vpop.permute.xlu0 %802 }
  0xcf   : > { %7073 = vst [vmem:[#allocation27_spill] sm:$0xff] %v5541_v62  ;;  %7074 = vst [vmem:[#allocation28_spill] sm:$0xff] %v5543_v63 }
  0xd0   : > { %1299 = vperm.xlu1 %5025, %v5303_v17   ;;  %1303 = vperm.xlu0 %5024, %v5300_v16  }
  0xd2   : > { %v5547_v0 = vpop.permute.xlu1 %817  ;;  %v5549_v58 = vpop.permute.xlu0 %812 }
  0xd3   : > { %7075 = vst [vmem:[#allocation29_spill] sm:$0xff] %v5547_v0  ;;  %7076 = vst [vmem:[#allocation30_spill] sm:$0xff] %v5549_v58 }
  0xd4   : > { %1307 = vperm.xlu1 %5025, %v5311_v19   ;;  %1311 = vperm.xlu0 %5024, %v5308_v18  }
  0xd6   : > { %v5553_v61 = vpop.permute.xlu1 %827  ;;  %v5555_v60 = vpop.permute.xlu0 %822 }
  0xd7   : > { %7077 = vst [vmem:[#allocation31_spill] sm:$0xff] %v5553_v61  ;;  %7078 = vst [vmem:[#allocation32_spill] sm:$0xff] %v5555_v60 }
  0xd8   : > { %1315 = vperm.xlu1 %5025, %v5319_v21   ;;  %1319 = vperm.xlu0 %5024, %v5316_v20  }
  0xda   : > { %v5559_v63 = vpop.permute.xlu1 %837  ;;  %v5561_v62 = vpop.permute.xlu0 %832 }
  0xdb   : > { %7079 = vst [vmem:[#allocation33_spill] sm:$0xff] %v5559_v63  ;;  %7080 = vst [vmem:[#allocation34_spill] sm:$0xff] %v5561_v62 }
  0xdc   : > { %1323 = vperm.xlu1 %5025, %v5327_v23   ;;  %1327 = vperm.xlu0 %5024, %v5324_v22  }
  0xde   : > { %v5565_v58 = vpop.permute.xlu1 %847  ;;  %v5567_v0 = vpop.permute.xlu0 %842 }
  0xdf   : > { %7081 = vst [vmem:[#allocation35_spill] sm:$0xff] %v5565_v58  ;;  %7082 = vst [vmem:[#allocation36_spill] sm:$0xff] %v5567_v0 }
  0xe0   : > { %1331 = vperm.xlu1 %5025, %v5335_v25   ;;  %1335 = vperm.xlu0 %5024, %v5332_v24  }
  0xe2   : > { %v5571_v60 = vpop.permute.xlu1 %857  ;;  %v5573_v61 = vpop.permute.xlu0 %852 }
  0xe3   : > { %7083 = vst [vmem:[#allocation37_spill] sm:$0xff] %v5571_v60  ;;  %7084 = vst [vmem:[#allocation38_spill] sm:$0xff] %v5573_v61 }
  0xe4   : > { %1339 = vperm.xlu1 %5025, %v5343_v27   ;;  %1343 = vperm.xlu0 %5024, %v5340_v26  }
  0xe6   : > { %v5577_v62 = vpop.permute.xlu1 %867  ;;  %v5579_v63 = vpop.permute.xlu0 %862 }
  0xe7   : > { %7085 = vst [vmem:[#allocation39_spill] sm:$0xff] %v5577_v62  ;;  %7086 = vst [vmem:[#allocation40_spill] sm:$0xff] %v5579_v63 }
  0xe8   : > { %1347 = vperm.xlu1 %5025, %v5351_v29   ;;  %1351 = vperm.xlu0 %5024, %v5348_v28  }
  0xea   : > { %v5583_v0 = vpop.permute.xlu1 %877  ;;  %v5585_v58 = vpop.permute.xlu0 %872 }
  0xeb   : > { %7087 = vst [vmem:[#allocation41_spill] sm:$0xff] %v5583_v0  ;;  %7088 = vst [vmem:[#allocation42_spill] sm:$0xff] %v5585_v58 }
  0xec   : > { %1355 = vperm.xlu1 %5025, %v5359_v31   ;;  %1359 = vperm.xlu0 %5024, %v5356_v30  }
  0xee   : > { %v5589_v61 = vpop.permute.xlu1 %887  ;;  %v5591_v60 = vpop.permute.xlu0 %882 }
  0xef   : > { %7089 = vst [vmem:[#allocation43_spill] sm:$0xff] %v5589_v61  ;;  %7090 = vst [vmem:[#allocation44_spill] sm:$0xff] %v5591_v60 }
  0xf0   : > { %1363 = vperm.xlu1 %5025, %v5367_v33   ;;  %1367 = vperm.xlu0 %5024, %v5364_v32  }
  0xf2   : > { %v5595_v63 = vpop.permute.xlu1 %897  ;;  %v5597_v62 = vpop.permute.xlu0 %892 }
  0xf3   : > { %7091 = vst [vmem:[#allocation45_spill] sm:$0xff] %v5595_v63  ;;  %7092 = vst [vmem:[#allocation46_spill] sm:$0xff] %v5597_v62 }
  0xf4   : > { %1371 = vperm.xlu1 %5025, %v5375_v35   ;;  %1375 = vperm.xlu0 %5024, %v5372_v34  }
  0xf6   : > { %v5601_v58 = vpop.permute.xlu1 %907  ;;  %v5603_v0 = vpop.permute.xlu0 %902 }
  0xf7   : > { %7093 = vst [vmem:[#allocation47_spill] sm:$0xff] %v5601_v58  ;;  %7094 = vst [vmem:[#allocation48_spill] sm:$0xff] %v5603_v0 }
  0xf8   : > { %1379 = vperm.xlu1 %5025, %v5383_v37   ;;  %1383 = vperm.xlu0 %5024, %v5380_v36  }
  0xfa   : > { %v5607_v60 = vpop.permute.xlu1 %917  ;;  %v5609_v61 = vpop.permute.xlu0 %912 }
  0xfb   : > { %7095 = vst [vmem:[#allocation49_spill] sm:$0xff] %v5607_v60  ;;  %7096 = vst [vmem:[#allocation50_spill] sm:$0xff] %v5609_v61 }
  0xfc   : > { %1387 = vperm.xlu1 %5025, %v5391_v39   ;;  %1391 = vperm.xlu0 %5024, %v5388_v38  }
  0xfe   : > { %v5613_v62 = vpop.permute.xlu1 %927  ;;  %v5615_v63 = vpop.permute.xlu0 %922 }
  0xff   : > { %7097 = vst [vmem:[#allocation51_spill] sm:$0xff] %v5613_v62  ;;  %7098 = vst [vmem:[#allocation52_spill] sm:$0xff] %v5615_v63 }
 0x100   : > { %1395 = vperm.xlu1 %5025, %v5399_v41   ;;  %1399 = vperm.xlu0 %5024, %v5396_v40  }
 0x102   : > { %v5619_v0 = vpop.permute.xlu1 %937  ;;  %v5621_v58 = vpop.permute.xlu0 %932 }
 0x103   : > { %7099 = vst [vmem:[#allocation53_spill] sm:$0xff] %v5619_v0  ;;  %7100 = vst [vmem:[#allocation54_spill] sm:$0xff] %v5621_v58 }
 0x104   : > { %1403 = vperm.xlu1 %5025, %v5407_v43   ;;  %1407 = vperm.xlu0 %5024, %v5404_v42  }
 0x106   : > { %v5625_v61 = vpop.permute.xlu1 %947  ;;  %v5627_v60 = vpop.permute.xlu0 %942 }
 0x107   : > { %7101 = vst [vmem:[#allocation55_spill] sm:$0xff] %v5625_v61  ;;  %7102 = vst [vmem:[#allocation56_spill] sm:$0xff] %v5627_v60 }
 0x108   : > { %1411 = vperm.xlu1 %5025, %v5415_v45   ;;  %1415 = vperm.xlu0 %5024, %v5412_v44  }
 0x10a   : > { %v5631_v63 = vpop.permute.xlu1 %957  ;;  %v5633_v62 = vpop.permute.xlu0 %952 }
 0x10b   : > { %7103 = vst [vmem:[#allocation57_spill] sm:$0xff] %v5631_v63  ;;  %7104 = vst [vmem:[#allocation58_spill] sm:$0xff] %v5633_v62 }
 0x10c   : > { %1419 = vperm.xlu1 %5025, %v5423_v47   ;;  %1423 = vperm.xlu0 %5024, %v5420_v46  }
 0x10e   : > { %v5637_v58 = vpop.permute.xlu1 %967  ;;  %v5639_v0 = vpop.permute.xlu0 %962 }
 0x10f   : > { %7105 = vst [vmem:[#allocation59_spill] sm:$0xff] %v5637_v58  ;;  %7106 = vst [vmem:[#allocation60_spill] sm:$0xff] %v5639_v0 }
 0x110   : > { %1427 = vperm.xlu1 %5025, %v5431_v49   ;;  %1431 = vperm.xlu0 %5024, %v5428_v48  }
 0x112   : > { %v5643_v60 = vpop.permute.xlu1 %977  ;;  %v5645_v61 = vpop.permute.xlu0 %972 }
 0x113   : > { %7107 = vst [vmem:[#allocation61_spill] sm:$0xff] %v5643_v60  ;;  %7108 = vst [vmem:[#allocation62_spill] sm:$0xff] %v5645_v61 }
 0x114   : > { %1435 = vperm.xlu1 %5025, %v5439_v51   ;;  %1439 = vperm.xlu0 %5024, %v5436_v50  }
 0x116   : > { %v5649_v62 = vpop.permute.xlu1 %987  ;;  %v5651_v63 = vpop.permute.xlu0 %982 }
 0x117   : > { %7109 = vst [vmem:[#allocation63_spill] sm:$0xff] %v5649_v62  ;;  %7110 = vst [vmem:[#allocation64_spill] sm:$0xff] %v5651_v63 }
 0x118   : > { %1443 = vperm.xlu1 %5025, %v5447_v53   ;;  %1447 = vperm.xlu0 %5024, %v5444_v52   ;;  %v7120_v53 = vld [vmem:[#allocation9_spill] sm:$0xff] }
 0x11a   : > { %v5655_v0 = vpop.permute.xlu1 %997  ;;  %v5657_v58 = vpop.permute.xlu0 %992 }
 0x11b   : > { %7111 = vst [vmem:[#allocation65_spill] sm:$0xff] %v5655_v0  ;;  %7112 = vst [vmem:[#allocation66_spill] sm:$0xff] %v5657_v58  ;;  %v7117_v0 = vld [vmem:[#allocation7_spill] sm:$0xff] }
 0x11c   : > { %1451 = vperm.xlu1 %5025, %v5455_v55   ;;  %1455 = vperm.xlu0 %5024, %v5452_v54  }
 0x11e   : > { %v5661_v61 = vpop.permute.xlu1 %1007  ;;  %v5663_v60 = vpop.permute.xlu0 %1002 }
 0x11f   : > { %7113 = vst [vmem:[#allocation67_spill] sm:$0xff] %v5661_v61  ;;  %7114 = vst [vmem:[#allocation68_spill] sm:$0xff] %v5663_v60  ;;  %v7121_v61 = vld [vmem:[#allocation8_spill] sm:$0xff] }
 0x120   : > { %1459 = vperm.xlu1 %5025, %v5463_v57   ;;  %1463 = vperm.xlu0 %5024, %v5460_v56   ;;  %v7124_v56 = vld [vmem:[#allocation11_spill] sm:$0xff] }
 0x122   : > { %v5667_v63 = vpop.permute.xlu1 %1017  ;;  %v5669_v62 = vpop.permute.xlu0 %1012 }
 0x123   : > { %7115 = vst [vmem:[#allocation69_spill] sm:$0xff] %v5667_v63  ;;  %7116 = vst [vmem:[#allocation70_spill] sm:$0xff] %v5669_v62  ;;  %v7125_v63 = vld [vmem:[#allocation10_spill] sm:$0xff] }
 0x124   : > { %1467 = vperm.xlu1 %5025, %v5471_v59   ;;  %1471 = vperm.xlu0 %5024, %v7117_v0  }
 0x126   : > { %v5673_v58 = vpop.permute.xlu1 %1027  ;;  %v5675_v55 = vpop.permute.xlu0 %1022 }
 0x127   : > { %7118 = vst [vmem:[#allocation7_spill] sm:$0xff] %v5673_v58  ;;  %7119 = vst [vmem:[#allocation71_spill] sm:$0xff] %v5675_v55  ;;  %v7128_v58 = vld [vmem:[#allocation12_spill] sm:$0xff] }
 0x128   : > { %1475 = vperm.xlu1 %5025, %v7120_v53   ;;  %1479 = vperm.xlu0 %5024, %v7121_v61   ;;  %v7039_v61 = vmov 2  }
 0x12a   : > { %v5679_v60 = vpop.permute.xlu1 %1037  ;;  %v5681_v57 = vpop.permute.xlu0 %1032 }
 0x12b   : > { %7122 = vst [vmem:[#allocation9_spill] sm:$0xff] %v5679_v60  ;;  %7123 = vst [vmem:[#allocation72_spill] sm:$0xff] %v5681_v57 }
 0x12c   : > { %1483 = vperm.xlu1 %5025, %v7124_v56   ;;  %1487 = vperm.xlu0 %5024, %v7125_v63  }
 0x12e   : > { %v5685_v62 = vpop.permute.xlu1 %1047  ;;  %v5687_v59 = vpop.permute.xlu0 %1042 }
 0x12f   : > { %7126 = vst [vmem:[#allocation11_spill] sm:$0xff] %v5685_v62  ;;  %7127 = vst [vmem:[#allocation10_spill] sm:$0xff] %v5687_v59 }
 0x130   : > { %1491 = vperm.xlu1 %5025, %v5495_v3   ;;  %1495 = vperm.xlu0 %5024, %v7128_v58  }
 0x133   : > { %v5691_v55 = vpop.permute.xlu1 %1247  ;;  %v5693_v53 = vpop.permute.xlu0 %1243 }
 0x134   : > { %5026 = vset.pattern.permute.xlu1 %v7039_v61  ;;  %5027 = vset.pattern.permute.xlu0 %v7039_v61 }
 0x135   : > { %1755 = vperm.xlu1 %5026, %v5247_v2   ;;  %1759 = vperm.xlu0 %5027, %v5255_v5  }
 0x137   : > { %v5699_v56 = vpop.permute.xlu1 %1251  ;;  %v5701_v59 = vpop.permute.xlu0 %1255 }
 0x139   : > { %1763 = vperm.xlu1 %5026, %v5244_v1   ;;  %1771 = vperm.xlu0 %5027, %v5263_v7  }
 0x13b   : > { %v5705_v3 = vpop.permute.xlu1 %1259  ;;  %v5707_v62 = vpop.permute.xlu0 %1263 }
 0x13c   : > { %7129 = vst [vmem:[#allocation73_spill] sm:$0xff] %v5705_v3  ;;  %7130 = vst [vmem:[#allocation74_spill] sm:$0xff] %v5707_v62 }
 0x13d   : > { %1767 = vperm.xlu1 %5026, %v5252_v4   ;;  %1779 = vperm.xlu0 %5027, %v5271_v9  }
 0x13f   : > { %v5711_v61 = vpop.permute.xlu1 %1267  ;;  %v5713_v57 = vpop.permute.xlu0 %1271 }
 0x140   : > { %7131 = vst [vmem:[#allocation75_spill] sm:$0xff] %v5711_v61  ;;  %7132 = vst [vmem:[#allocation76_spill] sm:$0xff] %v5713_v57 }
 0x141   : > { %1775 = vperm.xlu1 %5026, %v5260_v6   ;;  %1787 = vperm.xlu0 %5027, %v5279_v11  }
 0x143   : > { %v5717_v60 = vpop.permute.xlu1 %1275  ;;  %v5719_v58 = vpop.permute.xlu0 %1279 }
 0x144   : > { %7133 = vst [vmem:[#allocation77_spill] sm:$0xff] %v5717_v60  ;;  %7134 = vst [vmem:[#allocation78_spill] sm:$0xff] %v5719_v58 }
 0x145   : > { %1783 = vperm.xlu1 %5026, %v5268_v8   ;;  %1795 = vperm.xlu0 %5027, %v5287_v13  }
 0x147   : > { %v5723_v62 = vpop.permute.xlu1 %1283  ;;  %v5725_v3 = vpop.permute.xlu0 %1287 }
 0x148   : > { %7135 = vst [vmem:[#allocation79_spill] sm:$0xff] %v5723_v62  ;;  %7136 = vst [vmem:[#allocation80_spill] sm:$0xff] %v5725_v3 }
 0x149   : > { %1791 = vperm.xlu1 %5026, %v5276_v10   ;;  %1803 = vperm.xlu0 %5027, %v5295_v15  }
 0x14b   : > { %v5729_v57 = vpop.permute.xlu1 %1291  ;;  %v5731_v61 = vpop.permute.xlu0 %1295 }
 0x14c   : > { %7137 = vst [vmem:[#allocation81_spill] sm:$0xff] %v5729_v57  ;;  %7138 = vst [vmem:[#allocation82_spill] sm:$0xff] %v5731_v61 }
 0x14d   : > { %1799 = vperm.xlu1 %5026, %v5284_v12   ;;  %1811 = vperm.xlu0 %5027, %v5303_v17  }
 0x14f   : > { %v5735_v58 = vpop.permute.xlu1 %1299  ;;  %v5737_v60 = vpop.permute.xlu0 %1303 }
 0x150   : > { %7139 = vst [vmem:[#allocation83_spill] sm:$0xff] %v5735_v58  ;;  %7140 = vst [vmem:[#allocation84_spill] sm:$0xff] %v5737_v60 }
 0x151   : > { %1807 = vperm.xlu1 %5026, %v5292_v14   ;;  %1819 = vperm.xlu0 %5027, %v5311_v19  }
 0x153   : > { %v5741_v3 = vpop.permute.xlu1 %1307  ;;  %v5743_v62 = vpop.permute.xlu0 %1311 }
 0x154   : > { %7141 = vst [vmem:[#allocation85_spill] sm:$0xff] %v5741_v3  ;;  %7142 = vst [vmem:[#allocation86_spill] sm:$0xff] %v5743_v62 }
 0x155   : > { %1815 = vperm.xlu1 %5026, %v5300_v16   ;;  %1827 = vperm.xlu0 %5027, %v5319_v21  }
 0x157   : > { %v5747_v61 = vpop.permute.xlu1 %1315  ;;  %v5749_v57 = vpop.permute.xlu0 %1319 }
 0x158   : > { %7143 = vst [vmem:[#allocation87_spill] sm:$0xff] %v5747_v61  ;;  %7144 = vst [vmem:[#allocation88_spill] sm:$0xff] %v5749_v57 }
 0x159   : > { %1823 = vperm.xlu1 %5026, %v5308_v18   ;;  %1835 = vperm.xlu0 %5027, %v5327_v23  }
 0x15b   : > { %v5753_v60 = vpop.permute.xlu1 %1323  ;;  %v5755_v58 = vpop.permute.xlu0 %1327 }
 0x15c   : > { %7145 = vst [vmem:[#allocation89_spill] sm:$0xff] %v5753_v60  ;;  %7146 = vst [vmem:[#allocation90_spill] sm:$0xff] %v5755_v58 }
 0x15d   : > { %1831 = vperm.xlu1 %5026, %v5316_v20   ;;  %1843 = vperm.xlu0 %5027, %v5335_v25  }
 0x15f   : > { %v5759_v62 = vpop.permute.xlu1 %1331  ;;  %v5761_v3 = vpop.permute.xlu0 %1335 }
 0x160   : > { %7147 = vst [vmem:[#allocation91_spill] sm:$0xff] %v5759_v62  ;;  %7148 = vst [vmem:[#allocation92_spill] sm:$0xff] %v5761_v3 }
 0x161   : > { %1839 = vperm.xlu1 %5026, %v5324_v22   ;;  %1851 = vperm.xlu0 %5027, %v5343_v27  }
 0x163   : > { %v5765_v57 = vpop.permute.xlu1 %1339  ;;  %v5767_v61 = vpop.permute.xlu0 %1343 }
 0x164   : > { %7149 = vst [vmem:[#allocation93_spill] sm:$0xff] %v5765_v57  ;;  %7150 = vst [vmem:[#allocation94_spill] sm:$0xff] %v5767_v61 }
 0x165   : > { %1847 = vperm.xlu1 %5026, %v5332_v24   ;;  %1859 = vperm.xlu0 %5027, %v5351_v29  }
 0x167   : > { %v5771_v58 = vpop.permute.xlu1 %1347  ;;  %v5773_v60 = vpop.permute.xlu0 %1351 }
 0x168   : > { %7151 = vst [vmem:[#allocation95_spill] sm:$0xff] %v5771_v58  ;;  %7152 = vst [vmem:[#allocation96_spill] sm:$0xff] %v5773_v60 }
 0x169   : > { %1855 = vperm.xlu1 %5026, %v5340_v26   ;;  %1867 = vperm.xlu0 %5027, %v5359_v31  }
 0x16b   : > { %v5777_v25 = vpop.permute.xlu1 %1355  ;;  %v5779_v22 = vpop.permute.xlu0 %1359 }
 0x16c   : > { %7153 = vst [vmem:[#allocation97_spill] sm:$0xff] %v5777_v25  ;;  %7154 = vst [vmem:[#allocation98_spill] sm:$0xff] %v5779_v22 }
 0x16d   : > { %1863 = vperm.xlu1 %5026, %v5348_v28   ;;  %1875 = vperm.xlu0 %5027, %v5367_v33  }
 0x16f   : > { %v5783_v61 = vpop.permute.xlu1 %1363  ;;  %v5785_v57 = vpop.permute.xlu0 %1367 }
 0x170   : > { %7155 = vst [vmem:[#allocation99_spill] sm:$0xff] %v5783_v61  ;;  %7156 = vst [vmem:[#allocation100_spill] sm:$0xff] %v5785_v57 }
 0x171   : > { %1871 = vperm.xlu1 %5026, %v5356_v30   ;;  %1883 = vperm.xlu0 %5027, %v5375_v35  }
 0x173   : > { %v5789_v29 = vpop.permute.xlu1 %1371  ;;  %v5791_v26 = vpop.permute.xlu0 %1375 }
 0x175   : > { %1879 = vperm.xlu1 %5026, %v5364_v32   ;;  %1891 = vperm.xlu0 %5027, %v5383_v37  }
 0x177   : > { %v5795_v22 = vpop.permute.xlu1 %1379  ;;  %v5797_v25 = vpop.permute.xlu0 %1383 }
 0x179   : > { %1887 = vperm.xlu1 %5026, %v5372_v34   ;;  %1899 = vperm.xlu0 %5027, %v5391_v39  }
 0x17b   : > { %v5801_v33 = vpop.permute.xlu1 %1387  ;;  %v5803_v30 = vpop.permute.xlu0 %1391 }
 0x17c   : > { %7157 = vst [vmem:[#allocation101_spill] sm:$0xff] %v5801_v33  ;;  %7158 = vst [vmem:[#allocation102_spill] sm:$0xff] %v5803_v30  ;;  %v7239_v30 = vld [vmem:[#allocation22_spill] sm:$0xff] }
 0x17d   : > { %1895 = vperm.xlu1 %5026, %v5380_v36   ;;  %1907 = vperm.xlu0 %5027, %v5399_v41  }
 0x17f   : > { %v5807_v57 = vpop.permute.xlu1 %1395  ;;  %v5809_v32 = vpop.permute.xlu0 %1399 }
 0x180   : > { %7159 = vst [vmem:[#allocation103_spill] sm:$0xff] %v5807_v57  ;;  %7160 = vst [vmem:[#allocation104_spill] sm:$0xff] %v5809_v32  ;;  %v7041_v57 = vmov 3  }
 0x181   : > { %1903 = vperm.xlu1 %5026, %v5388_v38   ;;  %1915 = vperm.xlu0 %5027, %v5407_v43  }
 0x183   : > { %v5813_v61 = vpop.permute.xlu1 %1403  ;;  %v5815_v60 = vpop.permute.xlu0 %1407 }
 0x184   : > { %7161 = vst [vmem:[#allocation105_spill] sm:$0xff] %v5813_v61  ;;  %7162 = vst [vmem:[#allocation106_spill] sm:$0xff] %v5815_v60  ;;  %v7230_v61 = vld [vmem:[#allocation16_spill] sm:$0xff] }
 0x185   : > { %1911 = vperm.xlu1 %5026, %v5396_v40   ;;  %1927 = vperm.xlu0 %5027, %v5412_v44  }
 0x187   : > { %v5819_v58 = vpop.permute.xlu1 %1411  ;;  %v5821_v3 = vpop.permute.xlu0 %1415 }
 0x188   : > { %7163 = vst [vmem:[#allocation107_spill] sm:$0xff] %v5819_v58  ;;  %7164 = vst [vmem:[#allocation108_spill] sm:$0xff] %v5821_v3 }
 0x189   : > { %1919 = vperm.xlu1 %5026, %v5404_v42   ;;  %1935 = vperm.xlu0 %5027, %v5420_v46  }
 0x18b   : > { %v5825_v62 = vpop.permute.xlu1 %1419  ;;  %v5827_v32 = vpop.permute.xlu0 %1423 }
 0x18c   : > { %7165 = vst [vmem:[#allocation109_spill] sm:$0xff] %v5825_v62  ;;  %7166 = vst [vmem:[#allocation110_spill] sm:$0xff] %v5827_v32 }
 0x18d   : > { %5028 = vset.pattern.permute.xlu1 %v7041_v57  ;;  %1951 = vperm.xlu0 %5027, %v5436_v50  }
 0x18e   : > { %2271 = vperm.xlu1 %5028, %v5255_v5  }
 0x18f   : > { %v5832_v60 = vpop.permute.xlu1 %1427  ;;  %v5834_v58 = vpop.permute.xlu0 %1431 }
 0x190   : > { %7167 = vst [vmem:[#allocation111_spill] sm:$0xff] %v5832_v60  ;;  %7168 = vst [vmem:[#allocation112_spill] sm:$0xff] %v5834_v58  ;;  %v6051_v58 = vld [vmem:[%s5151_s10 + $0xa8] sm:$0xff]  }
 0x191   : > { %1967 = vperm.xlu0 %5027, %v5452_v54   ;;  %7222 = vst [vmem:[#allocation160_spill] sm:$0xff] %v6051_v58 }
 0x192   : > { %2395 = vperm.xlu1 %5028, %v5375_v35  }
 0x193   : > { %v5838_v3 = vpop.permute.xlu1 %1435  ;;  %v5840_v62 = vpop.permute.xlu0 %1439 }
 0x194   : > { %7169 = vst [vmem:[#allocation113_spill] sm:$0xff] %v5838_v3  ;;  %7170 = vst [vmem:[#allocation114_spill] sm:$0xff] %v5840_v62  ;;  %v7175_v3 = vmov 3   ;;  %v6040_v62 = vld [vmem:[%s5151_s10 + $0x98] sm:$0xff]  }
 0x195   : > { %1983 = vperm.xlu0 %5027, %v7117_v0  }
 0x196   : > { %2275 = vperm.xlu1 %5028, %v5244_v1  }
 0x197   : > { %v5844_v57 = vpop.permute.xlu1 %1443  ;;  %v5846_v32 = vpop.permute.xlu0 %1447 }
 0x198   : > { %7171 = vst [vmem:[#allocation115_spill] sm:$0xff] %v5844_v57  ;;  %7172 = vst [vmem:[#allocation116_spill] sm:$0xff] %v5846_v32 }
 0x199   : > { %1999 = vperm.xlu0 %5027, %v7125_v63  }
 0x19a   : > { %2403 = vperm.xlu1 %5028, %v5383_v37  }
 0x19b   : > { %v5850_v5 = vpop.permute.xlu1 %1451  ;;  %v5852_v35 = vpop.permute.xlu0 %1455 }
 0x19c   : > { %7173 = vst [vmem:[#allocation117_spill] sm:$0xff] %v5850_v5  ;;  %7174 = vst [vmem:[#allocation118_spill] sm:$0xff] %v5852_v35  ;;  %v6030_v5 = vld [vmem:[%s5151_s10 + $0x88] sm:$0xff]  }
 0x19d   : > { %5040 = vset.pattern.permute.xlu0 %v7175_v3 }
 0x19e   : > { %2283 = vperm.xlu1 %5028, %v5263_v7   ;;  %2267 = vperm.xlu0 %5040, %v5247_v2   ;;  %v2746_v2 = vld [vmem:[%s5176_s11] sm:$0xf] }
 0x19f   : > { %v5857_v1 = vpop.permute.xlu1 %1459  ;;  %v5859_v57 = vpop.permute.xlu0 %1463  ;;  %4991 = vmatprep.subr.msk.bf16.mxu0 %vm2844_vm0, %v2746_v2  ;;  %4992 = vmatprep.subr.msk.bf16.mxu1 %vm2844_vm0, %v2746_v2 }
 0x1a0   : > { %7176 = vst [vmem:[#allocation119_spill] sm:$0xff] %v5857_v1  ;;  %7177 = vst [vmem:[#allocation120_spill] sm:$0xff] %v5859_v57  ;;  %v2846_v1 = vsel %vm2844_vm0, %v2746_v2, 0 }
 0x1a1   : > { %4924 = vmatpush3.bf16.msra.mxu0 %v2846_v1  ;;  %4990 = vmatpush3.bf16.msra.mxu1 %v2846_v1 }
 0x1a2   : > { %2411 = vperm.xlu1 %5028, %v5391_v39   ;;  %2399 = vperm.xlu0 %5040, %v5372_v34  }
 0x1a3   : > { %v5863_v37 = vpop.permute.xlu1 %1467  ;;  %v5865_v32 = vpop.permute.xlu0 %1471 }
 0x1a4   : > { %7178 = vst [vmem:[#allocation121_spill] sm:$0xff] %v5863_v37  ;;  %7179 = vst [vmem:[#allocation122_spill] sm:$0xff] %v5865_v32  ;;  %v6015_v32 = vld [vmem:[%s5151_s10 + $0x20] sm:$0xff]  }
 0x1a6   : > { %2291 = vperm.xlu1 %5028, %v5271_v9   ;;  %2279 = vperm.xlu0 %5040, %v5252_v4   ;;  %v7184_v4 = vmov 2  }
 0x1a7   : > { %v5869_v35 = vpop.permute.xlu1 %1475  ;;  %v5871_v7 = vpop.permute.xlu0 %1479 }
 0x1a8   : > { %7180 = vst [vmem:[#allocation123_spill] sm:$0xff] %v5869_v35  ;;  %7181 = vst [vmem:[#allocation124_spill] sm:$0xff] %v5871_v7 }
 0x1aa   : > { %2419 = vperm.xlu1 %5028, %v5399_v41   ;;  %2407 = vperm.xlu0 %5040, %v5380_v36  }
 0x1ab   : > { %v5876_v34 = vpop.permute.xlu1 %1483  ;;  %v5878_v9 = vpop.permute.xlu0 %1487 }
 0x1ac   : > { %7182 = vst [vmem:[#allocation125_spill] sm:$0xff] %v5876_v34  ;;  %7183 = vst [vmem:[#allocation126_spill] sm:$0xff] %v5878_v9 }
 0x1ae   : > { %5029 = vset.pattern.permute.xlu1 %v7184_v4  ;;  %2287 = vperm.xlu0 %5040, %v5260_v6  }
 0x1af   : > { %v5882_v39 = vpop.permute.xlu1 %1491  ;;  %1923 = vperm.xlu1 %5029, %v5415_v45   ;;  %v5885_v35 = vpop.permute.xlu0 %1495 }
 0x1b0   : > { %7185 = vst [vmem:[#allocation127_spill] sm:$0xff] %v5882_v39  ;;  %7186 = vst [vmem:[#allocation128_spill] sm:$0xff] %v5885_v35 }
 0x1b2   : > { %2415 = vperm.xlu0 %5040, %v5388_v38  }
 0x1b3   : > { %5030 = vset.pattern.permute.xlu1 %v7175_v3 }
 0x1b4   : > { %2299 = vperm.xlu1 %5030, %v5279_v11   ;;  %v5890_v36 = vpop.permute.xlu1 %1755  ;;  %v5892_v41 = vpop.permute.xlu0 %1759 }
 0x1b6   : > { %2295 = vperm.xlu0 %5040, %v5268_v8  }
 0x1b8   : > { %2303 = vperm.xlu1 %5030, %v5276_v10   ;;  %v5896_v6 = vpop.permute.xlu1 %1763  ;;  %v5898_v1 = vpop.permute.xlu0 %1771 }
 0x1b9   : > { %7187 = vst [vmem:[#allocation129_spill] sm:$0xff] %v5898_v1 }
 0x1ba   : > { %2423 = vperm.xlu0 %5040, %v5396_v40  }
 0x1bc   : > { %2431 = vperm.xlu1 %5030, %v5404_v42   ;;  %v5902_v38 = vpop.permute.xlu1 %1767  ;;  %v5904_v2 = vpop.permute.xlu0 %1779 }
 0x1bd   : > { %7188 = vst [vmem:[#allocation130_spill] sm:$0xff] %v5904_v2 }
 0x1be   : > { %2427 = vperm.xlu0 %5040, %v5407_v43  }
 0x1c0   : > { %2307 = vperm.xlu1 %5030, %v5287_v13   ;;  %v5908_v11 = vpop.permute.xlu1 %1775  ;;  %v5910_v8 = vpop.permute.xlu0 %1787 }
 0x1c1   : > { %7189 = vst [vmem:[#allocation131_spill] sm:$0xff] %v5908_v11  ;;  %7190 = vst [vmem:[#allocation132_spill] sm:$0xff] %v5910_v8  ;;  %v7234_v11 = vld [vmem:[#allocation18_spill] sm:$0xff] }
 0x1c2   : > { %2311 = vperm.xlu0 %5040, %v5284_v12  }
 0x1c4   : > { %2435 = vperm.xlu1 %5030, %v5415_v45   ;;  %v5914_v10 = vpop.permute.xlu1 %1783  ;;  %v5916_v40 = vpop.permute.xlu0 %1795 }
 0x1c5   : > { %7191 = vst [vmem:[#allocation133_spill] sm:$0xff] %v5914_v10  ;;  %7192 = vst [vmem:[#allocation134_spill] sm:$0xff] %v5916_v40  ;;  %v6073_v40 = vld [vmem:[%s5156_s13 + $0x10] sm:$0xff]  }
 0x1c6   : > { %2439 = vperm.xlu0 %5040, %v5412_v44  }
 0x1c8   : > { %5031 = vset.pattern.permute.xlu1 %v7184_v4  ;;  %v5920_v42 = vpop.permute.xlu1 %1791  ;;  %v5922_v43 = vpop.permute.xlu0 %1803 }
 0x1c9   : > { %7193 = vst [vmem:[#allocation135_spill] sm:$0xff] %v5920_v42  ;;  %7194 = vst [vmem:[#allocation136_spill] sm:$0xff] %v5922_v43  ;;  %1931 = vperm.xlu1 %5031, %v5423_v47   ;;  %v6081_v42 = vld [vmem:[%s5156_s13 + $0x18] sm:$0xff]  }
 0x1ca   : > { %2315 = vperm.xlu0 %5040, %v5295_v15  }
 0x1cc   : > { %v5926_v13 = vpop.permute.xlu1 %1799  ;;  %v5928_v12 = vpop.permute.xlu0 %1811 }
 0x1cd   : > { %7195 = vst [vmem:[#allocation137_spill] sm:$0xff] %v5926_v13  ;;  %7196 = vst [vmem:[#allocation138_spill] sm:$0xff] %v5928_v12  ;;  %1939 = vperm.xlu1 %5031, %v5431_v49   ;;  %v4133_v12 = vunpack.c.l.bf16 %v6030_v5  ;;  %v7227_v13 = vld [vmem:[#allocation13_spill] sm:$0xff] }
 0x1ce   : > { %2447 = vperm.xlu0 %5040, %v5420_v46  }
 0x1d0   : > { %v5932_v45 = vpop.permute.xlu1 %1807  ;;  %v5934_v44 = vpop.permute.xlu0 %1819 }
 0x1d1   : > { %7197 = vst [vmem:[#allocation139_spill] sm:$0xff] %v5932_v45  ;;  %7198 = vst [vmem:[#allocation140_spill] sm:$0xff] %v5934_v44  ;;  %1943 = vperm.xlu1 %5031, %v5428_v48  }
 0x1d2   : > { %2327 = vperm.xlu0 %5040, %v5300_v16  }
 0x1d4   : > { %v5938_v39 = vpop.permute.xlu1 %1815  ;;  %v5940_v35 = vpop.permute.xlu0 %1827 }
 0x1d5   : > { %7199 = vst [vmem:[#allocation141_spill] sm:$0xff] %v5938_v39  ;;  %7200 = vst [vmem:[#allocation142_spill] sm:$0xff] %v5940_v35  ;;  %5032 = vset.pattern.permute.xlu1 %v7175_v3  ;;  %v4082_v35 = vunpack.c.h.bf16 %v6015_v32  ;;  %v4134_v39 = vunpack.c.h.bf16 %v6030_v5  ;;  %v7228_v5 = vld [vmem:[#allocation14_spill] sm:$0xff] }
 0x1d6   : > { %2319 = vperm.xlu1 %5032, %v5292_v14   ;;  %2455 = vperm.xlu0 %5040, %v5428_v48  }
 0x1d8   : > { %v5945_v15 = vpop.permute.xlu1 %1823  ;;  %v5947_v46 = vpop.permute.xlu0 %1835 }
 0x1d9   : > { %7201 = vst [vmem:[#allocation143_spill] sm:$0xff] %v5945_v15  ;;  %7202 = vst [vmem:[#allocation144_spill] sm:$0xff] %v5947_v46 }
 0x1da   : > { %2443 = vperm.xlu1 %5032, %v5423_v47   ;;  %2331 = vperm.xlu0 %5040, %v5311_v19  }
 0x1dc   : > { %v5951_v9 = vpop.permute.xlu1 %1831  ;;  %v5953_v16 = vpop.permute.xlu0 %1843 }
 0x1dd   : > { %7203 = vst [vmem:[#allocation145_spill] sm:$0xff] %v5951_v9  ;;  %7204 = vst [vmem:[#allocation146_spill] sm:$0xff] %v5953_v16 }
 0x1de   : > { %2323 = vperm.xlu1 %5032, %v5303_v17   ;;  %2463 = vperm.xlu0 %5040, %v5436_v50   ;;  %v7211_v50 = vld [vmem:[#allocation3_spill] sm:$0xff] }
 0x1e0   : > { %v5957_v34 = vpop.permute.xlu1 %1839  ;;  %v5959_v14 = vpop.permute.xlu0 %1851 }
 0x1e1   : > { %7205 = vst [vmem:[#allocation147_spill] sm:$0xff] %v5957_v34  ;;  %7206 = vst [vmem:[#allocation148_spill] sm:$0xff] %v5959_v14  ;;  %v6033_v34 = vld [vmem:[%s5151_s10 + $0x90] sm:$0xff]  }
 0x1e2   : > { %2451 = vperm.xlu1 %5032, %v5431_v49   ;;  %2343 = vperm.xlu0 %5040, %v5316_v20   ;;  %v4137_v43 = vunpack.c.l.bf16 %v6033_v34 }
 0x1e4   : > { %v5963_v48 = vpop.permute.xlu1 %1847  ;;  %v5965_v47 = vpop.permute.xlu0 %1859 }
 0x1e5   : > { %7207 = vst [vmem:[#allocation149_spill] sm:$0xff] %v5963_v48  ;;  %7208 = vst [vmem:[#allocation150_spill] sm:$0xff] %v5965_v47 }
 0x1e6   : > { %5033 = vset.pattern.permute.xlu1 %v7184_v4  ;;  %2471 = vperm.xlu0 %5040, %v5444_v52  }
 0x1e7   : > { %1947 = vperm.xlu1 %5033, %v5439_v51  }
 0x1e8   : > { %v5970_v17 = vpop.permute.xlu1 %1855  ;;  %v5972_v19 = vpop.permute.xlu0 %1867 }
 0x1e9   : > { %7209 = vst [vmem:[#allocation151_spill] sm:$0xff] %v5970_v17  ;;  %7210 = vst [vmem:[#allocation152_spill] sm:$0xff] %v5972_v19  ;;  %v4064_v19 = vld [vmem:[%s5151_s10] sm:$0xff]  }
 0x1ea   : > { %2347 = vperm.xlu0 %5040, %v5327_v23   ;;  %v4065_v48 = vunpack.c.l.bf16 %v4064_v19 }
 0x1eb   : > { %1955 = vperm.xlu1 %5033, %v7211_v50  }
 0x1ec   : > { %v5976_v49 = vpop.permute.xlu1 %1863  ;;  %v5978_v20 = vpop.permute.xlu0 %1875  ;;  %v6088_v10 = vmul.f32 %v4065_v48, %v7228_v5  ;;  %v7233_v5 = vld [vmem:[#allocation17_spill] sm:$0xff] }
 0x1ed   : > { %7212 = vst [vmem:[#allocation3_spill] sm:$0xff] %v5976_v49  ;;  %7213 = vst [vmem:[#allocation153_spill] sm:$0xff] %v5978_v20  ;;  %v6008_v49 = vld [vmem:[%s5151_s10 + $0x10] sm:$0xff]  }
 0x1ee   : > { %2479 = vperm.xlu0 %5040, %v5452_v54   ;;  %v4074_v57 = vunpack.c.h.bf16 %v6008_v49  ;;  %v4073_v46 = vunpack.c.l.bf16 %v6008_v49 }
 0x1ef   : > { %1959 = vperm.xlu1 %5033, %v5444_v52   ;;  %v7216_v52 = vld [vmem:[#allocation5_spill] sm:$0xff] }
 0x1f0   : > { %v5982_v47 = vpop.permute.xlu1 %1871  ;;  %v5984_v7 = vpop.permute.xlu0 %1883 }
 0x1f1   : > { %7214 = vst [vmem:[#allocation154_spill] sm:$0xff] %v5982_v47 }
 0x1f2   : > { %2359 = vperm.xlu0 %5040, %v5332_v24  }
 0x1f3   : > { %5034 = vset.pattern.permute.xlu1 %v7175_v3 }
 0x1f4   : > { %2335 = vperm.xlu1 %5034, %v5308_v18   ;;  %v5989_v23 = vpop.permute.xlu1 %1879  ;;  %v5991_v54 = vpop.permute.xlu0 %1891 }
 0x1f5   : > { %7215 = vst [vmem:[#allocation155_spill] sm:$0xff] %v5989_v23  ;;  %v4735_v23 = vld [vmem:[%s5151_s10 + $0x8] sm:$0xff]  }
 0x1f6   : > { %2487 = vperm.xlu0 %5040, %v7216_v52   ;;  %v4069_v37 = vunpack.c.l.bf16 %v4735_v23  ;;  %v4070_v16 = vunpack.c.h.bf16 %v4735_v23  ;;  %v6043_v23 = vld [vmem:[%s5151_s10 + $0xa0] sm:$0xff]  }
 0x1f8   : > { %2459 = vperm.xlu1 %5034, %v5439_v51   ;;  %v5995_v20 = vpop.permute.xlu1 %1887  ;;  %v5997_v47 = vpop.permute.xlu0 %1899  ;;  %v6012_v51 = vld [vmem:[%s5151_s10 + $0x18] sm:$0xff]   ;;  %v6085_v8 = vmul.f32 %v4069_v37, %v7227_v13  ;;  %v7236_v13 = vld [vmem:[#allocation19_spill] sm:$0xff] }
 0x1f9   : > { %7217 = vst [vmem:[#allocation5_spill] sm:$0xff] %v5997_v47  ;;  %v4078_v9 = vunpack.c.h.bf16 %v6012_v51  ;;  %v6111_v47 = vmul.f32 %v4074_v57, %v7233_v5  ;;  %v7238_v5 = vld [vmem:[#allocation21_spill] sm:$0xff] }
 0x1fa   : > { %2363 = vperm.xlu0 %5040, %v5343_v27   ;;  %v6018_v27 = vld [vmem:[%s5151_s10 + $0x28] sm:$0xff]  }
 0x1fb   : > { %v4086_v15 = vunpack.c.h.bf16 %v6018_v27  ;;  %v4085_v44 = vunpack.c.l.bf16 %v6018_v27 }
 0x1fc   : > { %2339 = vperm.xlu1 %5034, %v5319_v21   ;;  %v6001_v18 = vpop.permute.xlu1 %1895  ;;  %v6003_v24 = vpop.permute.xlu0 %1907  ;;  %v6021_v21 = vld [vmem:[%s5151_s10 + $0x80] sm:$0xff]  }
 0x1fd   : > { %7218 = vst [vmem:[#allocation156_spill] sm:$0xff] %v6001_v18  ;;  %7219 = vst [vmem:[#allocation157_spill] sm:$0xff] %v6003_v24  ;;  %v4130_v49 = vunpack.c.h.bf16 %v6021_v21  ;;  %v4129_v60 = vunpack.c.l.bf16 %v6021_v21  ;;  %v7226_v21 = vld [vmem:[#allocation8_spill] sm:$0xff] }
 0x1fe   : > { %2495 = vperm.xlu0 %5040, %v7117_v0   ;;  %v4066_v0 = vunpack.c.h.bf16 %v4064_v19  ;;  %v4081_v19 = vunpack.c.l.bf16 %v6015_v32  ;;  %v6061_v32 = vld [vmem:[%s5156_s13 + $0x8] sm:$0xff]  }
 0x1ff   : > { %v4198_v37 = vunpack.c.h.bf16 %v6061_v32 }
 0x200   : > { %2467 = vperm.xlu1 %5034, %v7211_v50   ;;  %v6024_v17 = vpop.permute.xlu1 %1903  ;;  %v6026_v14 = vpop.permute.xlu0 %1915  ;;  %v4077_v50 = vunpack.c.l.bf16 %v6012_v51  ;;  %v6054_v51 = vld [vmem:[%s5156_s13] sm:$0xff]  }
 0x201   : > { %7220 = vst [vmem:[#allocation158_spill] sm:$0xff] %v6024_v17  ;;  %7221 = vst [vmem:[#allocation159_spill] sm:$0xff] %v6026_v14  ;;  %v4194_v24 = vunpack.c.h.bf16 %v6054_v51  ;;  %v4197_v14 = vunpack.c.l.bf16 %v6061_v32  ;;  %v6099_v17 = vmul.f32 %v4066_v0, %v7230_v61  ;;  %v4202_v61 = vunpack.c.h.bf16 %v6073_v40  ;;  %v6119_v0 = vld [vmem:[%s5156_s13 + $0x80] sm:$0xff]   ;;  %v7235_v32 = vld [vmem:[#allocation6_spill] sm:$0xff] }
 0x202   : > { %2375 = vperm.xlu0 %5040, %v5348_v28   ;;  %v7225_v28 = vld [vmem:[#allocation4_spill] sm:$0xff] }
 0x204   : > { %5035 = vset.pattern.permute.xlu1 %v7184_v4  ;;  %v6064_v27 = vpop.permute.xlu1 %1911  ;;  %v6066_v45 = vpop.permute.xlu0 %1927 }
 0x205   : > { %7223 = vst [vmem:[#allocation161_spill] sm:$0xff] %v6064_v27  ;;  %7224 = vst [vmem:[#allocation162_spill] sm:$0xff] %v6066_v45  ;;  %1963 = vperm.xlu1 %5035, %v7225_v28   ;;  %v4193_v28 = vunpack.c.l.bf16 %v6054_v51  ;;  %v6093_v27 = vld [vmem:[%s5156_s13 + $0x20] sm:$0xff]  }
 0x206   : > { %2503 = vperm.xlu0 %5040, %v7226_v21   ;;  %v7229_v45 = vld [vmem:[#allocation15_spill] sm:$0xff]  ;;  %v6104_v21 = vld [vmem:[%s5156_s13 + $0x28] sm:$0xff]  }
 0x207   : > { %v6096_v2 = vmul.f32 %v4070_v16, %v7229_v45  ;;  %v6114_v45 = vmul.f32 %v4073_v46, %v7234_v11  ;;  %v6131_v46 = vld [vmem:[%s5156_s13 + $0x88] sm:$0xff]   ;;  %v6135_v16 = vmul.f32 %v4082_v35, %v7238_v5  ;;  %v6154_v5 = vld [vmem:[%s5156_s13 + $0x98] sm:$0xff]  }
 0x208   : > { %v6106_v48 = vpop.permute.xlu1 %1919  ;;  %v6108_v51 = vpop.permute.xlu0 %1935  ;;  %v7242_v11 = vld [vmem:[#allocation24_spill] sm:$0xff] }
 0x209   : > { %7231 = vst [vmem:[#allocation4_spill] sm:$0xff] %v6106_v48  ;;  %7232 = vst [vmem:[#allocation8_spill] sm:$0xff] %v6108_v51  ;;  %1971 = vperm.xlu1 %5035, %v7235_v32   ;;  %v6123_v48 = vmul.f32 %v4078_v9, %v7236_v13  ;;  %v7237_v51 = vld [vmem:[#allocation20_spill] sm:$0xff]  ;;  %v6138_v32 = vmul.f32 %v4081_v19, %v7239_v30  ;;  %v6149_v33 = vmul.f32 %v4085_v44, %v7242_v11  ;;  %v7245_v19 = vld [vmem:[#allocation45_spill] sm:$0xff] }
 0x20a   : > { %v6126_v1 = vmul.f32 %v4077_v50, %v7237_v51  ;;  %2379 = vperm.xlu0 %5040, %v5359_v31   ;;  %v6143_v50 = vld [vmem:[%s5156_s13 + $0x90] sm:$0xff]   ;;  %v7240_v51 = vld [vmem:[#allocation23_spill] sm:$0xff]  ;;  %v6159_v9 = vmul.f32 %v4130_v49, %v7245_v19  ;;  %v7246_v13 = vld [vmem:[#allocation46_spill] sm:$0xff]  ;;  %v7255_v49 = vunpack.c.h.bf16 %v6040_v62 }
 0x20b   : > { %v6146_v57 = vmul.f32 %v4086_v15, %v7240_v51  ;;  %7243 = vst [vmem:[#allocation14_spill] sm:$0xff] %v6149_v33  ;;  %v6162_v18 = vmul.f32 %v4129_v60, %v7246_v13  ;;  %v7247_v51 = vld [vmem:[#allocation47_spill] sm:$0xff]  ;;  %v7248_v35 = vld [vmem:[#allocation48_spill] sm:$0xff]  ;;  %v7250_v13 = vld [vmem:[#allocation49_spill] sm:$0xff]  ;;  %v7257_v33 = vunpack.c.l.bf16 %v6040_v62 }
 0x20c   : > { %v6156_v30 = vpop.permute.xlu0 %1951  ;;  %v6170_v31 = vmul.f32 %v4134_v39, %v7247_v51  ;;  %v6178_v60 = vld [vmem:[%s5156_s13 + $0xa0] sm:$0xff]   ;;  %v7252_v15 = vld [vmem:[#allocation50_spill] sm:$0xff]  ;;  %v6192_v51 = vld [vmem:[%s5156_s13 + $0xa8] sm:$0xff]  }
 0x20d   : > { %7241 = vst [vmem:[#allocation13_spill] sm:$0xff] %v6146_v57  ;;  %7244 = vst [vmem:[#allocation15_spill] sm:$0xff] %v6156_v30  ;;  %1975 = vperm.xlu1 %5035, %v7216_v52   ;;  %v6167_v11 = vpop.permute.xlu1 %2271  ;;  %v6173_v30 = vmul.f32 %v4133_v12, %v7248_v35  ;;  %v7251_v52 = vunpack.c.h.bf16 %v6033_v34  ;;  %v6187_v39 = vmul.f32 %v4137_v43, %v7252_v15  ;;  %v7254_v19 = vld [vmem:[#allocation51_spill] sm:$0xff]  ;;  %v7260_v35 = vunpack.c.h.bf16 %v6043_v23  ;;  %v5042_v62 = vld [vmem:[%s5171_s22 + $0xa8] sm:$0xff] }
 0x20e   : > { %7249 = vst [vmem:[#allocation16_spill] sm:$0xff] %v6178_v60  ;;  %2511 = vperm.xlu0 %5040, %v7125_v63   ;;  %7253 = vst [vmem:[#allocation17_spill] sm:$0xff] %v6192_v51  ;;  %v6197_v57 = vmul.f32 %v7255_v49, %v7254_v19  ;;  %v7256_v63 = vld [vmem:[#allocation52_spill] sm:$0xff]  ;;  %v1499_v43 = vmul.f32 %v4194_v24, %v5691_v55  ;;  %v1498_v19 = vmul.f32 %v4193_v28, %v5693_v53  ;;  %v7262_v24 = vld [vmem:[#allocation54_spill] sm:$0xff] }
 0x20f   : > { %v6184_v44 = vmul.f32 %v7251_v52, %v7250_v13  ;;  %v6202_v34 = vmul.f32 %v7257_v33, %v7256_v63  ;;  %v7259_v52 = vld [vmem:[#allocation53_spill] sm:$0xff]  ;;  %v4320_v63 = vld [vmem:[%s5161_s16] sm:$0xff]   ;;  %v7263_v15 = vunpack.c.l.bf16 %v6043_v23  ;;  %v6229_v28 = vld [vmem:[%s5161_s16 + $0x8] sm:$0xff]   ;;  %v7266_v23 = vunpack.c.h.bf16 %v6051_v58 }
 0x210   : > { %v6206_v13 = vpop.permute.xlu0 %1967  ;;  %v6211_v49 = vmul.f32 %v7260_v35, %v7259_v52  ;;  %v1500_v35 = vmul.f32 %v4197_v14, %v5699_v56  ;;  %v1501_v52 = vmul.f32 %v4198_v37, %v5701_v59  ;;  %v6232_v33 = vld [vmem:[%s5161_s16 + $0x10] sm:$0xff]   ;;  %v7269_v59 = vunpack.c.l.bf16 %v6073_v40  ;;  %v7270_v37 = vld [vmem:[#allocation74_spill] sm:$0xff]  ;;  %v4448_v53 = vld [vmem:[%s5166_s19] sm:$0xff]  }
 0x211   : > { %7258 = vst [vmem:[#allocation18_spill] sm:$0xff] %v6206_v13  ;;  %5036 = vset.pattern.permute.xlu1 %v7175_v3  ;;  %v6218_v55 = vpop.permute.xlu1 %2395  ;;  %v6223_v12 = vmul.f32 %v7263_v15, %v7262_v24  ;;  %v5043_v13 = vld [vmem:[%s5171_s22 + $0xf8] sm:$0xff]  ;;  %v7268_v56 = vld [vmem:[#allocation73_spill] sm:$0xff]  ;;  %v1503_v24 = vmul.f32 %v4202_v61, %v7270_v37  ;;  %v7271_v3 = vld [vmem:[#allocation75_spill] sm:$0xff]  ;;  %v4321_v60 = vunpack.c.l.bf16 %v4320_v63  ;;  %v1562_v40 = vadd.f32 %v1498_v19, %v6088_v10 }
 0x212   : > { %7261 = vst [vmem:[#allocation6_spill] sm:$0xff] %v6211_v49  ;;  %2351 = vperm.xlu1 %5036, %v5042_v62   ;;  %2391 = vperm.xlu0 %5040, %v5043_v13   ;;  %v7265_v49 = vld [vmem:[#allocation55_spill] sm:$0xff]  ;;  %v1502_v14 = vmul.f32 %v7269_v59, %v7268_v56  ;;  %v1563_v62 = vadd.f32 %v1499_v43, %v6099_v17  ;;  %v7272_v13 = vunpack.c.l.bf16 %v6081_v42  ;;  %v7274_v56 = vld [vmem:[#allocation76_spill] sm:$0xff]  ;;  %v7275_v61 = vunpack.c.h.bf16 %v6081_v42 }
 0x213   : > { %7264 = vst [vmem:[#allocation19_spill] sm:$0xff] %v6223_v12  ;;  %v6239_v15 = vmul.f32 %v7266_v23, %v7265_v49  ;;  %v6247_v12 = vld [vmem:[%s5161_s16 + $0x18] sm:$0xff]   ;;  %v4322_v49 = vunpack.c.h.bf16 %v4320_v63  ;;  %v6262_v43 = vld [vmem:[%s5161_s16 + $0x20] sm:$0xff]   ;;  %v6271_v10 = vadd.f32 %v1501_v52, %v6096_v2  ;;  %v4326_v42 = vunpack.c.h.bf16 %v6229_v28 }
 0x214   : > { %v1504_v58 = vmul.f32 %v7272_v13, %v7271_v3  ;;  %v6253_v23 = vpop.permute.xlu0 %1983  ;;  %v1505_v59 = vmul.f32 %v7275_v61, %v7274_v56  ;;  %v6268_v3 = vadd.f32 %v1500_v35, %v6085_v8  ;;  %v5044_v63 = vld [vmem:[%s5171_s22 + $0x1a0] sm:$0xff]  ;;  %v7276_v13 = vld [vmem:[#allocation12_spill] sm:$0xff]  ;;  %v6278_v56 = vadd.f32 %v1502_v14, %v6114_v45  ;;  %v7277_v8 = vld [vmem:[#allocation77_spill] sm:$0xff] }
 0x215   : > { %7267 = vst [vmem:[#allocation20_spill] sm:$0xff] %v6239_v15  ;;  %7273 = vst [vmem:[#allocation21_spill] sm:$0xff] %v6253_v23  ;;  %v6265_v15 = vpop.permute.xlu1 %2275  ;;  %v6281_v61 = vadd.f32 %v1503_v24, %v6111_v47  ;;  %v7278_v35 = vunpack.c.l.bf16 %v6093_v27  ;;  %v7279_v52 = vld [vmem:[#allocation78_spill] sm:$0xff]  ;;  %v7280_v17 = vunpack.c.h.bf16 %v6093_v27  ;;  %v4812_v19 = vld [vmem:[%s5161_s16 + $0x80] sm:$0xff]   ;;  %v4450_v24 = vunpack.c.h.bf16 %v4448_v53 }
 0x216   : > { %2475 = vperm.xlu1 %5036, %v5044_v63   ;;  %2519 = vperm.xlu0 %5040, %v7276_v13   ;;  %v6291_v63 = vadd.f32 %v1504_v58, %v6126_v1  ;;  %v6296_v47 = vld [vmem:[%s5161_s16 + $0x28] sm:$0xff]   ;;  %v7282_v27 = vunpack.c.l.bf16 %v6119_v0  ;;  %v2010_v58 = vmul.f32 %v4321_v60, %v5890_v36  ;;  %v2011_v14 = vmul.f32 %v4322_v49, %v5892_v41  ;;  %v7284_v49 = vld [vmem:[#allocation79_spill] sm:$0xff] }
 0x217   : > { %v1506_v2 = vmul.f32 %v7278_v35, %v7277_v8  ;;  %v1507_v37 = vmul.f32 %v7280_v17, %v7279_v52  ;;  %v6301_v8 = vadd.f32 %v1505_v59, %v6123_v48  ;;  %v4843_v35 = vld [vmem:[%s5166_s19 + $0x80] sm:$0xff]   ;;  %v4385_v45 = vunpack.c.l.bf16 %v4812_v19  ;;  %v6313_v23 = vld [vmem:[%s5161_s16 + $0x88] sm:$0xff]   ;;  %v5045_v48 = vld [vmem:[%s5171_s22 + $0xb0] sm:$0xff] }
 0x218   : > { %v6298_v13 = vpop.permute.xlu0 %1999  ;;  %v1530_v17 = vmul.f32 %v7282_v27, %v5789_v29  ;;  %v4449_v59 = vunpack.c.l.bf16 %v4448_v53  ;;  %v7283_v36 = vunpack.c.h.bf16 %v6119_v0  ;;  %v7285_v27 = vunpack.c.l.bf16 %v6104_v21 }
 0x219   : > { %7281 = vst [vmem:[#allocation22_spill] sm:$0xff] %v6298_v13  ;;  %v6309_v52 = vpop.permute.xlu1 %2403  ;;  %v4386_v13 = vunpack.c.h.bf16 %v4812_v19  ;;  %v6317_v51 = vadd.f32 %v1506_v2, %v6138_v32  ;;  %v6320_v29 = vadd.f32 %v1507_v37, %v6135_v16  ;;  %v2523_v32 = vmul.f32 %v4450_v24, %v6167_v11  ;;  %v5046_v11 = vld [vmem:[%s5171_s22 + $0x1b0] sm:$0xff] }
 0x21a   : > { %2355 = vperm.xlu1 %5036, %v5045_v48   ;;  %v1531_v60 = vmul.f32 %v7283_v36, %v5791_v26  ;;  %v6329_v19 = vmul.f32 %v7285_v27, %v7284_v49  ;;  %v4513_v2 = vunpack.c.l.bf16 %v4843_v35  ;;  %v1594_v16 = vadd.f32 %v1530_v17, %v6162_v18  ;;  %v4828_v26 = vld [vmem:[%s5166_s19 + $0x8] sm:$0xff]  }
 0x21b   : > { %v2074_v37 = vadd.f32 %v2010_v58, %v1562_v40  ;;  %v4389_v0 = vunpack.c.l.bf16 %v6313_v23  ;;  %v4514_v41 = vunpack.c.h.bf16 %v4843_v35  ;;  %v2075_v1 = vadd.f32 %v2011_v14, %v1563_v62  ;;  %v6350_v14 = vld [vmem:[%s5161_s16 + $0x90] sm:$0xff]  }
 0x21c   : > { %v2042_v49 = vmul.f32 %v4385_v45, %v5984_v7  ;;  %v2043_v27 = vmul.f32 %v4386_v13, %v5995_v20  ;;  %v1595_v18 = vadd.f32 %v1531_v60, %v6159_v9  ;;  %v7286_v40 = vunpack.c.l.bf16 %v6131_v46 }
 0x21d   : > { %v6336_v48 = vpop.permute.xlu1 %2283  ;;  %v2268_v36 = vpop.permute.xlu0 %2267  ;;  %v7287_v17 = vunpack.c.h.bf16 %v6131_v46  ;;  %v4390_v62 = vunpack.c.h.bf16 %v6313_v23  ;;  %v2587_v7 = vadd.f32 %v2523_v32, %v2075_v1  ;;  %v2554_v20 = vmul.f32 %v4513_v2, %v6218_v55 }
 0x21e   : > { %v2522_v53 = vmul.f32 %v4449_v59, %v2268_v36  ;;  %2483 = vperm.xlu1 %5036, %v5046_v11   ;;  %v1532_v24 = vmul.f32 %v7286_v40, %v5795_v22  ;;  %v4453_v45 = vunpack.c.l.bf16 %v4828_v26  ;;  %v7288_v9 = vunpack.c.l.bf16 %v6229_v28  ;;  %v4844_v59 = vld [vmem:[%s5166_s19 + $0x88] sm:$0xff]   ;;  %v4829_v11 = vld [vmem:[%s5166_s19 + $0x10] sm:$0xff]  }
 0x21f   : > { %v1533_v58 = vmul.f32 %v7287_v17, %v5797_v25  ;;  %v2013_v22 = vmul.f32 %v4326_v42, %v5902_v38  ;;  %v4454_v23 = vunpack.c.h.bf16 %v4828_v26  ;;  %v2106_v60 = vadd.f32 %v2042_v49, %v1594_v16 }
 0x220   : > { %v2586_v13 = vadd.f32 %v2522_v53, %v2074_v37  ;;  %v2012_v35 = vmul.f32 %v7288_v9, %v5896_v6  ;;  %v2107_v1 = vadd.f32 %v2043_v27, %v1595_v18  ;;  %v7289_v53 = vld [vmem:[#allocation80_spill] sm:$0xff]  ;;  %v7290_v28 = vunpack.c.h.bf16 %v6104_v21  ;;  %v6370_v37 = vld [vmem:[%s5171_s22 + $0x1c0] sm:$0xff] }
 0x221   : > { %v6358_v46 = vpop.permute.xlu1 %2411  ;;  %v2400_v25 = vpop.permute.xlu0 %2399  ;;  %v1596_v38 = vadd.f32 %v1532_v24, %v6173_v30  ;;  %v4342_v42 = vunpack.c.h.bf16 %v6296_v47  ;;  %v4393_v2 = vunpack.c.l.bf16 %v6350_v14  ;;  %v2618_v16 = vadd.f32 %v2554_v20, %v2106_v60  ;;  %v7296_v60 = vld [vmem:[#allocation103_spill] sm:$0xff] }
 0x222   : > { %v2555_v32 = vmul.f32 %v4514_v41, %v2400_v25  ;;  %5037 = vset.pattern.permute.xlu1 %v7184_v4  ;;  %v2714_v55 = vpack.c.bf16 %v2587_v7, %v2586_v13  ;;  %v6364_v6 = vmul.f32 %v7290_v28, %v7289_v53  ;;  %v6374_v41 = vld [vmem:[%s5161_s16 + $0x98] sm:$0xff]   ;;  %v2524_v26 = vmul.f32 %v4453_v45, %v6265_v15  ;;  %v7291_v15 = vld [vmem:[#allocation156_spill] sm:$0xff]  ;;  %v7292_v13 = vld [vmem:[#allocation101_spill] sm:$0xff] }
 0x223   : > { %1979 = vperm.xlu1 %5037, %v6370_v37   ;;  %v4517_v36 = vunpack.c.l.bf16 %v4844_v59  ;;  %v1597_v30 = vadd.f32 %v1533_v58, %v6170_v31  ;;  %v2076_v49 = vadd.f32 %v2012_v35, %v6268_v3  ;;  %v2077_v27 = vadd.f32 %v2013_v22, %v6271_v10  ;;  %v7294_v3 = vld [vmem:[#allocation102_spill] sm:$0xff]  ;;  %v7300_v53 = vld [vmem:[#allocation131_spill] sm:$0xff] }
 0x224   : > { %v2619_v21 = vadd.f32 %v2555_v32, %v2107_v1  ;;  %4925 = vmatprep.mubr.msk.bf16.mxu0 %vm2747_vm1, %v2714_v55  ;;  %v4518_v24 = vunpack.c.h.bf16 %v4844_v59  ;;  %v2044_v17 = vmul.f32 %v4389_v0, %v5991_v54  ;;  %v2045_v7 = vmul.f32 %v4390_v62, %v7291_v15  ;;  %v6395_v59 = vld [vmem:[%s5171_s22 + $0x1d0] sm:$0xff]  ;;  %v6399_v54 = vld [vmem:[%s5161_s16 + $0xa0] sm:$0xff]  }
 0x225   : > { %v6382_v18 = vpop.permute.xlu1 %2291  ;;  %v2280_v40 = vpop.permute.xlu0 %2279  ;;  %v7293_v9 = vunpack.c.l.bf16 %v6143_v50  ;;  %v7295_v58 = vunpack.c.h.bf16 %v6143_v50  ;;  %v4397_v35 = vunpack.c.l.bf16 %v6374_v41  ;;  %v4394_v22 = vunpack.c.h.bf16 %v6350_v14  ;;  %v7298_v32 = vld [vmem:[#allocation129_spill] sm:$0xff] }
 0x226   : > { %v2525_v20 = vmul.f32 %v4454_v23, %v2280_v40  ;;  %v2730_v45 = vpack.c.bf16 %v2619_v21, %v2618_v16  ;;  %v2588_v0 = vadd.f32 %v2524_v26, %v2076_v49  ;;  %v2556_v62 = vmul.f32 %v4517_v36, %v6309_v52  ;;  %v4845_v26 = vld [vmem:[%s5166_s19 + $0x90] sm:$0xff]  }
 0x227   : > { %v1534_v31 = vmul.f32 %v7293_v9, %v7292_v13  ;;  %v1535_v10 = vmul.f32 %v7295_v58, %v7294_v3  ;;  %1987 = vperm.xlu1 %5037, %v6395_v59   ;;  %v4457_v25 = vunpack.c.l.bf16 %v4829_v11  ;;  %v7297_v50 = vunpack.c.l.bf16 %v6154_v5  ;;  %v7302_v13 = vld [vmem:[#allocation104_spill] sm:$0xff]  ;;  %v5049_v58 = vld [vmem:[%s5171_s22 + $0x1d8] sm:$0xff] }
 0x228   : > { %v2589_v23 = vadd.f32 %v2525_v20, %v2077_v27  ;;  %4957 = vmatprep.mubr.msk.bf16.mxu1 %vm2747_vm1, %v2730_v45  ;;  %v7299_v14 = vunpack.c.l.bf16 %v6232_v33  ;;  %v7301_v28 = vunpack.c.h.bf16 %v6232_v33  ;;  %v4458_v36 = vunpack.c.h.bf16 %v4829_v11 }
 0x229   : > { %v1536_v1 = vmul.f32 %v7297_v50, %v7296_v60  ;;  %v6413_v21 = vpop.permute.xlu1 %2419  ;;  %v2408_v52 = vpop.permute.xlu0 %2407  ;;  %v2108_v49 = vadd.f32 %v2044_v17, %v1596_v38  ;;  %v2109_v27 = vadd.f32 %v2045_v7, %v1597_v30  ;;  %v1598_v20 = vadd.f32 %v1534_v31, %v6187_v39  ;;  %v7304_v31 = vld [vmem:[#allocation5_spill] sm:$0xff]  ;;  %v4831_v50 = vld [vmem:[%s5166_s19 + $0x20] sm:$0xff]  }
 0x22a   : > { %v2014_v55 = vmul.f32 %v7299_v14, %v7298_v32  ;;  %v2015_v16 = vmul.f32 %v7301_v28, %v7300_v53  ;;  %v2715_v40 = vpack.c.bf16 %v2589_v23, %v2588_v0  ;;  %v2557_v15 = vmul.f32 %v4518_v24, %v2408_v52  ;;  %v4830_v24 = vld [vmem:[%s5166_s19 + $0x18] sm:$0xff]  }
 0x22b   : > { %v1599_v45 = vadd.f32 %v1535_v10, %v6184_v44  ;;  %v7303_v9 = vunpack.c.h.bf16 %v6154_v5  ;;  %v4401_v33 = vunpack.c.l.bf16 %v6399_v54  ;;  %1991 = vperm.xlu1 %5037, %v5049_v58   ;;  %v2620_v60 = vadd.f32 %v2556_v62, %v2108_v49  ;;  %v7305_v0 = vld [vmem:[#allocation158_spill] sm:$0xff] }
 0x22c   : > { %v2526_v38 = vmul.f32 %v4457_v25, %v6336_v48  ;;  %v4521_v30 = vunpack.c.l.bf16 %v4845_v26  ;;  %v2621_v11 = vadd.f32 %v2557_v15, %v2109_v27  ;;  %4926 = vmatmul.mubr.msk.bf16.vlgmr.msra.gmra.mrb[0].mxu0 %vm2747_vm1, %v2715_v40  ;;  %v6425_v39 = vadd.f32 %v1536_v1, %v6202_v34  ;;  %v7306_v1 = vld [vmem:[#allocation105_spill] sm:$0xff]  ;;  %v7309_v14 = vld [vmem:[#allocation106_spill] sm:$0xff] }
 0x22d   : > { %v1537_v3 = vmul.f32 %v7303_v9, %v7302_v13  ;;  %v2078_v44 = vadd.f32 %v2014_v55, %v6278_v56  ;;  %v2079_v5 = vadd.f32 %v2015_v16, %v6281_v61  ;;  %v2288_v17 = vpop.permute.xlu0 %2287  ;;  %v4522_v7 = vunpack.c.h.bf16 %v4845_v26  ;;  %v7307_v56 = vld [vmem:[#allocation16_spill] sm:$0xff]  ;;  %v4846_v52 = vld [vmem:[%s5166_s19 + $0x98] sm:$0xff]   ;;  %v7314_v15 = vld [vmem:[#allocation133_spill] sm:$0xff] }
 0x22e   : > { %v2046_v10 = vmul.f32 %v4393_v2, %v7304_v31  ;;  %v2047_v48 = vmul.f32 %v4394_v22, %v7305_v0  ;;  %v2731_v62 = vpack.c.bf16 %v2621_v11, %v2620_v60  ;;  %v2527_v25 = vmul.f32 %v4458_v36, %v2288_v17  ;;  %v6432_v23 = vpop.permute.xlu1 %1923  ;;  %v5050_v36 = vld [vmem:[%s5171_s22 + $0xc8] sm:$0xff]  ;;  %v7312_v49 = vld [vmem:[#allocation130_spill] sm:$0xff]  ;;  %v7318_v31 = vld [vmem:[#allocation135_spill] sm:$0xff] }
 0x22f   : > { %v1601_v34 = vadd.f32 %v1537_v3, %v6197_v57  ;;  %v7308_v32 = vunpack.c.l.bf16 %v7307_v56  ;;  %v7310_v55 = vunpack.c.h.bf16 %v7307_v56  ;;  %v4398_v2 = vunpack.c.h.bf16 %v6374_v41 }
 0x230   : > { %v7311_v22 = vmov 3   ;;  %v2590_v28 = vadd.f32 %v2526_v38, %v2078_v44  ;;  %v2558_v16 = vmul.f32 %v4521_v30, %v6358_v46  ;;  %v4461_v26 = vunpack.c.l.bf16 %v4830_v24  ;;  %4958 = vmatmul.mubr.msk.bf16.vlgmr.msra.gmra.mrb[0].mxu1 %vm2747_vm1, %v2731_v62  ;;  %v7316_v44 = vld [vmem:[#allocation132_spill] sm:$0xff] }
 0x231   : > { %v6439_v61 = vmul.f32 %v7308_v32, %v7306_v1  ;;  %v6444_v53 = vmul.f32 %v7310_v55, %v7309_v14  ;;  %5038 = vset.pattern.permute.xlu1 %v7311_v22  ;;  %v2591_v57 = vadd.f32 %v2527_v25, %v2079_v5  ;;  %v7313_v27 = vunpack.c.l.bf16 %v6247_v12  ;;  %v2416_v3 = vpop.permute.xlu0 %2415 }
 0x232   : > { %2367 = vperm.xlu1 %5038, %v5050_v36   ;;  %v7315_v13 = vunpack.c.h.bf16 %v6247_v12  ;;  %v4465_v58 = vunpack.c.l.bf16 %v4831_v50  ;;  %v4462_v60 = vunpack.c.h.bf16 %v4830_v24  ;;  %v2110_v46 = vadd.f32 %v2046_v10, %v1598_v20  ;;  %v7320_v10 = vld [vmem:[#allocation157_spill] sm:$0xff] }
 0x233   : > { %v2016_v40 = vmul.f32 %v7313_v27, %v7312_v49  ;;  %v2111_v38 = vadd.f32 %v2047_v48, %v1599_v45  ;;  %v2716_v30 = vpack.c.bf16 %v2591_v57, %v2590_v28  ;;  %v2559_v11 = vmul.f32 %v4522_v7, %v2416_v3  ;;  %v2300_v1 = vpop.permute.xlu1 %2299  ;;  %v4847_v45 = vld [vmem:[%s5166_s19 + $0xa0] sm:$0xff]   ;;  %v7321_v48 = vld [vmem:[#allocation161_spill] sm:$0xff]  ;;  %v4832_v3 = vld [vmem:[%s5166_s19 + $0x28] sm:$0xff]  }
 0x234   : > { %v2017_v9 = vmul.f32 %v7315_v13, %v7314_v15  ;;  %v7317_v5 = vunpack.c.l.bf16 %v6262_v43  ;;  %v7319_v0 = vunpack.c.h.bf16 %v6262_v43  ;;  %v4402_v25 = vunpack.c.h.bf16 %v6399_v54  ;;  %v7322_v15 = vld [vmem:[#allocation159_spill] sm:$0xff] }
 0x235   : > { %v4525_v12 = vunpack.c.l.bf16 %v4846_v52  ;;  %v2622_v56 = vadd.f32 %v2558_v16, %v2110_v46  ;;  %v2528_v24 = vmul.f32 %v4461_v26, %v6382_v18  ;;  %v2623_v32 = vadd.f32 %v2559_v11, %v2111_v38  ;;  %4929 = vmatprep.mubr.msk.bf16.mxu0 %vm2747_vm1, %v2716_v30  ;;  %v2296_v55 = vpop.permute.xlu0 %2295  ;;  %v7324_v30 = vld [vmem:[#allocation19_spill] sm:$0xff] }
 0x236   : > { %v2018_v17 = vmul.f32 %v7317_v5, %v7316_v44  ;;  %v2019_v62 = vmul.f32 %v7319_v0, %v7318_v31  ;;  %2491 = vperm.xlu1 %5038, %v6370_v37   ;;  %v4466_v20 = vunpack.c.h.bf16 %v4831_v50  ;;  %v2080_v7 = vadd.f32 %v2016_v40, %v6291_v63  ;;  %v5051_v40 = vld [vmem:[%s5171_s22 + $0xd0] sm:$0xff]  ;;  %v7325_v44 = vld [vmem:[#allocation6_spill] sm:$0xff] }
 0x237   : > { %v2048_v43 = vmul.f32 %v4397_v35, %v7320_v10  ;;  %v2049_v14 = vmul.f32 %v4398_v2, %v7321_v48  ;;  %v4526_v28 = vunpack.c.h.bf16 %v4846_v52  ;;  %v2081_v18 = vadd.f32 %v2017_v9, %v6301_v8  ;;  %v2304_v36 = vpop.permute.xlu1 %2303  ;;  %v4817_v35 = vld [vmem:[%s5161_s16 + $0xa8] sm:$0xff]   ;;  %v7330_v48 = vld [vmem:[#allocation13_spill] sm:$0xff] }
 0x238   : > { %v2732_v16 = vpack.c.bf16 %v2623_v32, %v2622_v56  ;;  %v2530_v37 = vmul.f32 %v4465_v58, %v2300_v1  ;;  %v2529_v26 = vmul.f32 %v4462_v60, %v2296_v55  ;;  %v2082_v50 = vadd.f32 %v2018_v17, %v6317_v51  ;;  %v4848_v32 = vld [vmem:[%s5166_s19 + $0xa8] sm:$0xff]   ;;  %v7331_v55 = vld [vmem:[#allocation107_spill] sm:$0xff] }
 0x239   : > { %v2083_v57 = vadd.f32 %v2019_v62, %v6320_v29  ;;  %v2560_v63 = vmul.f32 %v4525_v12, %v6413_v21  ;;  %v4530_v41 = vunpack.c.h.bf16 %v4847_v45  ;;  %v2592_v49 = vadd.f32 %v2528_v24, %v2080_v7  ;;  %v7323_v21 = vld [vmem:[#allocation4_spill] sm:$0xff]  ;;  %v2424_v9 = vpop.permute.xlu0 %2423  ;;  %v7326_v62 = vld [vmem:[#allocation134_spill] sm:$0xff] }
 0x23a   : > { %v2593_v2 = vadd.f32 %v2529_v26, %v2081_v18  ;;  %v2531_v27 = vmul.f32 %v4466_v20, %v2304_v36  ;;  %2371 = vperm.xlu1 %5038, %v5051_v40   ;;  %4961 = vmatprep.mubr.msk.bf16.mxu1 %vm2747_vm1, %v2732_v16  ;;  %v4529_v8 = vunpack.c.l.bf16 %v4847_v45  ;;  %v2112_v52 = vadd.f32 %v2048_v43, %v6425_v39  ;;  %v7334_v18 = vld [vmem:[#allocation108_spill] sm:$0xff] }
 0x23b   : > { %v2050_v51 = vmul.f32 %v4401_v33, %v7322_v15  ;;  %v2113_v29 = vadd.f32 %v2049_v14, %v1601_v34  ;;  %v2051_v13 = vmul.f32 %v4402_v25, %v7323_v21  ;;  %v2594_v58 = vadd.f32 %v2530_v37, %v2082_v50  ;;  %v2432_v54 = vpop.permute.xlu1 %2431  ;;  %v7336_v36 = vld [vmem:[#allocation56_spill] sm:$0xff] }
 0x23c   : > { %v2717_v60 = vpack.c.bf16 %v2593_v2, %v2592_v49  ;;  %v2595_v46 = vadd.f32 %v2531_v27, %v2083_v57  ;;  %v2561_v38 = vmul.f32 %v4526_v28, %v2424_v9  ;;  %v1602_v11 = vadd.f32 %v6439_v61, %v7324_v30  ;;  %v7328_v61 = vld [vmem:[#allocation137_spill] sm:$0xff]  ;;  %v6517_v27 = vld [vmem:[%s5171_s22 + $0x1e0] sm:$0xff]  ;;  %v7340_v9 = vld [vmem:[#allocation20_spill] sm:$0xff] }
 0x23d   : > { %v1603_v39 = vadd.f32 %v6444_v53, %v7325_v44  ;;  %v4406_v5 = vunpack.c.h.bf16 %v4817_v35  ;;  %v2624_v17 = vadd.f32 %v2560_v63, %v2112_v52  ;;  %v2563_v31 = vmul.f32 %v4530_v41, %v2432_v54  ;;  %v2428_v56 = vpop.permute.xlu0 %2427  ;;  %v7337_v41 = vld [vmem:[#allocation160_spill] sm:$0xff]  ;;  %v7339_v52 = vld [vmem:[#allocation162_spill] sm:$0xff] }
 0x23e   : > { %v2718_v33 = vpack.c.bf16 %v2595_v46, %v2594_v58  ;;  %v2625_v34 = vadd.f32 %v2561_v38, %v2113_v29  ;;  %2499 = vperm.xlu1 %5038, %v6395_v59   ;;  %4930 = vmatmul.mubr.msk.bf16.gmra.mrb[4].mxu0 %vm2747_vm1, %v2717_v60  ;;  %v4469_v0 = vunpack.c.l.bf16 %v4832_v3  ;;  %v7327_v25 = vunpack.c.l.bf16 %v6296_v47  ;;  %v7329_v59 = vld [vmem:[#allocation14_spill] sm:$0xff]  ;;  %v7332_v47 = vld [vmem:[#allocation17_spill] sm:$0xff] }
 0x23f   : > { %v2021_v1 = vmul.f32 %v4342_v42, %v7328_v61  ;;  %v4405_v53 = vunpack.c.l.bf16 %v4817_v35  ;;  %v4470_v24 = vunpack.c.h.bf16 %v4832_v3  ;;  %v2114_v20 = vadd.f32 %v2050_v51, %v1602_v11  ;;  %v2308_v26 = vpop.permute.xlu1 %2307  ;;  %v6525_v38 = vld [vmem:[%s5171_s22 + $0x1f0] sm:$0xff]  ;;  %v6537_v61 = vld [vmem:[%s5151_s10 + $0xb8] sm:$0xff]  }
 0x240   : > { %v2020_v12 = vmul.f32 %v7327_v25, %v7326_v62  ;;  %v2115_v45 = vadd.f32 %v2051_v13, %v1603_v39  ;;  %v2733_v7 = vpack.c.bf16 %v2625_v34, %v2624_v17  ;;  %v2562_v10 = vmul.f32 %v4529_v8, %v2428_v56  ;;  %4933 = vmatprep.mubr.msk.bf16.mxu0 %vm2747_vm1, %v2718_v33  ;;  %v4771_v17 = vld [vmem:[%s5156_s13 + $0x30] sm:$0xff]   ;;  %v5054_v62 = vld [vmem:[%s5171_s22 + $0x1f8] sm:$0xff] }
 0x241   : > { %v1572_v43 = vadd.f32 %v6329_v19, %v7329_v59  ;;  %v1573_v14 = vadd.f32 %v6364_v6, %v7330_v48  ;;  %v7333_v42 = vunpack.c.l.bf16 %v7332_v47  ;;  %v7335_v16 = vunpack.c.h.bf16 %v7332_v47  ;;  %v2312_v40 = vpop.permute.xlu0 %2311 }
 0x242   : > { %v2627_v50 = vadd.f32 %v2563_v31, %v2115_v45  ;;  %v2626_v57 = vadd.f32 %v2562_v10, %v2114_v20  ;;  %v2532_v63 = vmul.f32 %v4469_v0, %v2308_v26  ;;  %5039 = vset.pattern.permute.xlu1 %v7184_v4  ;;  %4962 = vmatmul.mubr.msk.bf16.gmra.mrb[4].mxu1 %vm2747_vm1, %v2733_v7  ;;  %v4533_v19 = vunpack.c.l.bf16 %v4848_v32  ;;  %v4741_v31 = vld [vmem:[%s5151_s10 + $0x38] sm:$0xff]   ;;  %v4756_v0 = vld [vmem:[%s5151_s10 + $0xb0] sm:$0xff]  }
 0x243   : > { %v1540_v28 = vmul.f32 %v7333_v42, %v7331_v55  ;;  %v1541_v37 = vmul.f32 %v7335_v16, %v7334_v18  ;;  %v7338_v6 = vunpack.c.l.bf16 %v7337_v41  ;;  %v2084_v49 = vadd.f32 %v2020_v12, %v1572_v43  ;;  %1995 = vperm.xlu1 %5039, %v6517_v27   ;;  %v2436_v13 = vpop.permute.xlu1 %2435  ;;  %v4787_v43 = vld [vmem:[%s5156_s13 + $0xb0] sm:$0xff]  }
 0x244   : > { %v2085_v2 = vadd.f32 %v2021_v1, %v1573_v14  ;;  %v4534_v8 = vunpack.c.h.bf16 %v4848_v32  ;;  %v2053_v15 = vmul.f32 %v4406_v5, %v7339_v52  ;;  %v2052_v4 = vmul.f32 %v4405_v53, %v6432_v23  ;;  %v4740_v5 = vld [vmem:[%s5151_s10 + $0x30] sm:$0xff]   ;;  %v6541_v32 = vld [vmem:[%s5156_s13 + $0x38] sm:$0xff]   ;;  %v7346_v52 = vld [vmem:[#allocation28_spill] sm:$0xff] }
 0x245   : > { %v1092_v35 = vmul.f32 %v7338_v6, %v7336_v36  ;;  %v2734_v51 = vpack.c.bf16 %v2627_v50, %v2626_v57  ;;  %v2533_v29 = vmul.f32 %v4470_v24, %v2312_v40  ;;  %v1605_v3 = vadd.f32 %v1541_v37, %v7340_v9  ;;  %v2440_v23 = vpop.permute.xlu0 %2439  ;;  %v4802_v1 = vld [vmem:[%s5161_s16 + $0x30] sm:$0xff]   ;;  %v7342_v37 = vld [vmem:[#allocation26_spill] sm:$0xff]  ;;  %v7345_v40 = vld [vmem:[#allocation27_spill] sm:$0xff] }
 0x246   : > { %v2596_v58 = vadd.f32 %v2532_v63, %v2084_v49  ;;  %v2564_v46 = vmul.f32 %v4533_v19, %v2436_v13  ;;  %v2565_v39 = vmul.f32 %v4534_v8, %v2440_v23  ;;  %v4090_v25 = vunpack.c.h.bf16 %v4740_v5  ;;  %v7341_v18 = vld [vmem:[#allocation25_spill] sm:$0xff]  ;;  %v6556_v63 = vld [vmem:[%s5156_s13 + $0xb8] sm:$0xff]   ;;  %v5055_v19 = vld [vmem:[%s5171_s22 + $0xe8] sm:$0xff] }
 0x247   : > { %v1604_v21 = vadd.f32 %v1540_v28, %v1092_v35  ;;  %v2597_v60 = vadd.f32 %v2533_v29, %v2085_v2  ;;  %4965 = vmatprep.mubr.msk.bf16.mxu1 %vm2747_vm1, %v2734_v51  ;;  %2003 = vperm.xlu1 %5039, %v6525_v38   ;;  %v2117_v30 = vadd.f32 %v2053_v15, %v1605_v3  ;;  %v4089_v12 = vunpack.c.l.bf16 %v4740_v5  ;;  %v4833_v28 = vld [vmem:[%s5166_s19 + $0x30] sm:$0xff]   ;;  %v7344_v6 = vld [vmem:[#allocation82_spill] sm:$0xff]  ;;  %v7350_v23 = vld [vmem:[#allocation139_spill] sm:$0xff] }
 0x248   : > { %v6530_v34 = vpop.permute.xlu1 %1931  ;;  %v4217_v56 = vunpack.c.l.bf16 %v4771_v17  ;;  %v4218_v24 = vunpack.c.h.bf16 %v4771_v17  ;;  %v4094_v45 = vunpack.c.h.bf16 %v4741_v31  ;;  %v4093_v7 = vunpack.c.l.bf16 %v4741_v31  ;;  %v7343_v36 = vld [vmem:[#allocation81_spill] sm:$0xff]  ;;  %v7348_v13 = vld [vmem:[#allocation58_spill] sm:$0xff] }
 0x249   : > { %v2116_v11 = vadd.f32 %v2052_v4, %v1604_v21  ;;  %v2719_v44 = vpack.c.bf16 %v2597_v60, %v2596_v58  ;;  %v2629_v33 = vadd.f32 %v2565_v39, %v2117_v30  ;;  %v2316_v20 = vpop.permute.xlu0 %2315  ;;  %v4154_v10 = vunpack.c.h.bf16 %v4756_v0  ;;  %v4818_v2 = vld [vmem:[%s5161_s16 + $0xb0] sm:$0xff]   ;;  %v7349_v58 = vld [vmem:[#allocation136_spill] sm:$0xff] }
 0x24a   : > { %v4153_v59 = vunpack.c.l.bf16 %v4756_v0  ;;  %v4158_v14 = vunpack.c.h.bf16 %v6537_v61  ;;  %v4157_v55 = vunpack.c.l.bf16 %v6537_v61  ;;  %v4345_v47 = vunpack.c.l.bf16 %v4802_v1  ;;  %v7347_v4 = vld [vmem:[#allocation57_spill] sm:$0xff] }
 0x24b   : > { %v2628_v54 = vadd.f32 %v2564_v46, %v2116_v11  ;;  %4934 = vmatmul.mubr.msk.bf16.gmra.mrb[8].mxu0 %vm2747_vm1, %v2719_v44  ;;  %2007 = vperm.xlu1 %5039, %v5054_v62   ;;  %v4346_v42 = vunpack.c.h.bf16 %v4802_v1  ;;  %v1063_v16 = vmul.f32 %v4090_v25, %v7341_v18  ;;  %v1062_v26 = vmul.f32 %v4089_v12, %v7342_v37  ;;  %v4803_v46 = vld [vmem:[%s5161_s16 + $0x38] sm:$0xff]   ;;  %v4849_v11 = vld [vmem:[%s5166_s19 + $0xb0] sm:$0xff]   ;;  %v7353_v1 = vld [vmem:[#allocation59_spill] sm:$0xff] }
 0x24c   : > { %v6544_v48 = vpop.permute.xlu1 %1939  ;;  %v4221_v50 = vunpack.c.l.bf16 %v6541_v32  ;;  %v4222_v57 = vunpack.c.h.bf16 %v6541_v32  ;;  %v1510_v41 = vmul.f32 %v4217_v56, %v7343_v36  ;;  %v1511_v35 = vmul.f32 %v4218_v24, %v7344_v6  ;;  %v7351_v0 = vld [vmem:[#allocation109_spill] sm:$0xff]  ;;  %v7352_v25 = vld [vmem:[#allocation110_spill] sm:$0xff] }
 0x24d   : > { %v2735_v53 = vpack.c.bf16 %v2629_v33, %v2628_v54  ;;  %v4281_v49 = vunpack.c.l.bf16 %v4787_v43  ;;  %v1065_v8 = vmul.f32 %v4094_v45, %v7345_v40  ;;  %v1064_v15 = vmul.f32 %v4093_v7, %v7346_v52  ;;  %v2448_v44 = vpop.permute.xlu0 %2447  ;;  %v4819_v32 = vld [vmem:[%s5161_s16 + $0xb8] sm:$0xff]   ;;  %v7354_v7 = vld [vmem:[#allocation83_spill] sm:$0xff]  ;;  %v7358_v52 = vld [vmem:[#allocation141_spill] sm:$0xff] }
 0x24e   : > { %v1095_v51 = vmul.f32 %v4154_v10, %v7347_v4  ;;  %v4473_v29 = vunpack.c.l.bf16 %v4833_v28  ;;  %v1094_v9 = vmul.f32 %v4153_v59, %v7348_v13  ;;  %v4285_v3 = vunpack.c.l.bf16 %v6556_v63 }
 0x24f   : > { %4966 = vmatmul.mubr.msk.bf16.gmra.mrb[8].mxu1 %vm2747_vm1, %v2735_v53  ;;  %5041 = vset.pattern.permute.xlu1 %v7311_v22  ;;  %v4282_v22 = vunpack.c.h.bf16 %v4787_v43  ;;  %v2022_v60 = vmul.f32 %v4345_v47, %v7349_v58  ;;  %v2023_v30 = vmul.f32 %v4346_v42, %v7350_v23  ;;  %v4286_v39 = vunpack.c.h.bf16 %v6556_v63  ;;  %v7356_v63 = vld [vmem:[#allocation84_spill] sm:$0xff] }
 0x250   : > { %2383 = vperm.xlu1 %5041, %v5055_v19   ;;  %v6565_v21 = vpop.permute.xlu1 %1943  ;;  %v4410_v5 = vunpack.c.h.bf16 %v4818_v2  ;;  %v4409_v17 = vunpack.c.l.bf16 %v4818_v2  ;;  %v4474_v54 = vunpack.c.h.bf16 %v4833_v28  ;;  %v1574_v33 = vadd.f32 %v1510_v41, %v1062_v26  ;;  %v7355_v28 = vld [vmem:[#allocation8_spill] sm:$0xff]  ;;  %v5056_v26 = vld [vmem:[%s5171_s22 + $0xf0] sm:$0xff]  ;;  %v7357_v2 = vld [vmem:[#allocation138_spill] sm:$0xff] }
 0x251   : > { %v1575_v31 = vadd.f32 %v1511_v35, %v1063_v16  ;;  %v1542_v62 = vmul.f32 %v4281_v49, %v7351_v0  ;;  %v1543_v12 = vmul.f32 %v4282_v22, %v7352_v25  ;;  %v1097_v53 = vmul.f32 %v4158_v14, %v7353_v1  ;;  %v7361_v0 = vld [vmem:[#allocation60_spill] sm:$0xff] }
 0x252   : > { %v4349_v56 = vunpack.c.l.bf16 %v4803_v46  ;;  %v2534_v24 = vmul.f32 %v4473_v29, %v2316_v20  ;;  %v4538_v45 = vunpack.c.h.bf16 %v4849_v11  ;;  %v1512_v10 = vmul.f32 %v4221_v50, %v7354_v7  ;;  %v2328_v50 = vpop.permute.xlu0 %2327  ;;  %v4850_v29 = vld [vmem:[%s5166_s19 + $0xb8] sm:$0xff]  }
 0x253   : > { %v2086_v59 = vadd.f32 %v2022_v60, %v1574_v33  ;;  %v2087_v43 = vadd.f32 %v2023_v30, %v1575_v31  ;;  %v4350_v47 = vunpack.c.h.bf16 %v4803_v46  ;;  %v2055_v18 = vmul.f32 %v4410_v5, %v7355_v28  ;;  %v7359_v30 = vld [vmem:[#allocation111_spill] sm:$0xff] }
 0x254   : > { %2507 = vperm.xlu1 %5041, %v6517_v27   ;;  %v4834_v27 = vld [vmem:[%s5166_s19 + $0x38] sm:$0xff]   ;;  %v2054_v16 = vmul.f32 %v4409_v17, %v6530_v34  ;;  %v4537_v14 = vunpack.c.l.bf16 %v4849_v11  ;;  %v1513_v20 = vmul.f32 %v4222_v57, %v7356_v63  ;;  %v1606_v19 = vadd.f32 %v1542_v62, %v1094_v9 }
 0x255   : > { %v2320_v42 = vpop.permute.xlu1 %2319  ;;  %v1607_v36 = vadd.f32 %v1543_v12, %v1095_v51  ;;  %v4413_v41 = vunpack.c.l.bf16 %v4819_v32  ;;  %v2598_v6 = vadd.f32 %v2534_v24, %v2086_v59  ;;  %v2567_v35 = vmul.f32 %v4538_v45, %v2448_v44  ;;  %v7360_v44 = vld [vmem:[#allocation112_spill] sm:$0xff] }
 0x256   : > { %v2535_v37 = vmul.f32 %v4474_v54, %v2320_v42  ;;  %v4478_v49 = vunpack.c.h.bf16 %v4834_v27  ;;  %v2024_v40 = vmul.f32 %v4349_v56, %v7357_v2  ;;  %v2025_v4 = vmul.f32 %v4350_v47, %v7358_v52  ;;  %v2456_v1 = vpop.permute.xlu0 %2455  ;;  %v4773_v42 = vld [vmem:[%s5156_s13 + $0x40] sm:$0xff]  }
 0x257   : > { %v4414_v34 = vunpack.c.h.bf16 %v4819_v32  ;;  %v4477_v58 = vunpack.c.l.bf16 %v4834_v27  ;;  %v2119_v60 = vadd.f32 %v2055_v18, %v1607_v36  ;;  %v2118_v46 = vadd.f32 %v2054_v16, %v1606_v19 }
 0x258   : > { %2387 = vperm.xlu1 %5041, %v5056_v26   ;;  %v2599_v22 = vadd.f32 %v2535_v37, %v2087_v43  ;;  %v1576_v51 = vadd.f32 %v1512_v10, %v1064_v15  ;;  %v1577_v9 = vadd.f32 %v1513_v20, %v1065_v8  ;;  %v1544_v11 = vmul.f32 %v4285_v3, %v7359_v30  ;;  %v4758_v37 = vld [vmem:[%s5151_s10 + $0xc0] sm:$0xff]   ;;  %v6606_v26 = vld [vmem:[%s5151_s10 + $0xc8] sm:$0xff]  }
 0x259   : > { %v2444_v13 = vpop.permute.xlu1 %2443  ;;  %v1545_v5 = vmul.f32 %v4286_v39, %v7360_v44  ;;  %v2631_v17 = vadd.f32 %v2567_v35, %v2119_v60  ;;  %v2537_v54 = vmul.f32 %v4478_v49, %v2328_v50  ;;  %v4542_v33 = vunpack.c.h.bf16 %v4850_v29  ;;  %v4804_v20 = vld [vmem:[%s5161_s16 + $0x40] sm:$0xff]   ;;  %v7363_v60 = vld [vmem:[#allocation30_spill] sm:$0xff]  ;;  %v6623_v30 = vld [vmem:[%s5156_s13 + $0xc8] sm:$0xff]  }
 0x25a   : > { %v2720_v23 = vpack.c.bf16 %v2599_v22, %v2598_v6  ;;  %v2566_v57 = vmul.f32 %v4537_v14, %v2444_v13  ;;  %v1096_v62 = vmul.f32 %v4157_v55, %v7361_v0  ;;  %v2088_v25 = vadd.f32 %v2024_v40, %v1576_v51  ;;  %v4789_v22 = vld [vmem:[%s5156_s13 + $0xc0] sm:$0xff]   ;;  %v7362_v40 = vld [vmem:[#allocation29_spill] sm:$0xff]  ;;  %v7367_v0 = vld [vmem:[#allocation32_spill] sm:$0xff] }
 0x25b   : > { %v2089_v12 = vadd.f32 %v2025_v4, %v1577_v9  ;;  %v4541_v15 = vunpack.c.l.bf16 %v4850_v29  ;;  %v2056_v8 = vmul.f32 %v4413_v41, %v6544_v48  ;;  %v2057_v3 = vmul.f32 %v4414_v34, %v6565_v21  ;;  %v4742_v21 = vld [vmem:[%s5151_s10 + $0x40] sm:$0xff]   ;;  %v4774_v41 = vld [vmem:[%s5156_s13 + $0x48] sm:$0xff]  }
 0x25c   : > { %2515 = vperm.xlu1 %5041, %v6525_v38   ;;  %v2630_v31 = vadd.f32 %v2566_v57, %v2118_v46  ;;  %4937 = vmatprep.mubr.msk.bf16.mxu0 %vm2747_vm1, %v2720_v23  ;;  %v1608_v24 = vadd.f32 %v1544_v11, %v1096_v62  ;;  %v1609_v32 = vadd.f32 %v1545_v5, %v1097_v53  ;;  %v4743_v53 = vld [vmem:[%s5151_s10 + $0x48] sm:$0xff]   ;;  %v4098_v16 = vunpack.c.h.bf16 %v4742_v21  ;;  %v4835_v13 = vld [vmem:[%s5166_s19 + $0x40] sm:$0xff]   ;;  %v7365_v11 = vld [vmem:[#allocation85_spill] sm:$0xff] }
 0x25d   : > { %v2324_v38 = vpop.permute.xlu1 %2323  ;;  %v2601_v45 = vadd.f32 %v2537_v54, %v2089_v12  ;;  %v2569_v7 = vmul.f32 %v4542_v33, %v2456_v1  ;;  %v4097_v14 = vunpack.c.l.bf16 %v4742_v21  ;;  %v4102_v63 = vunpack.c.h.bf16 %v4743_v53  ;;  %v7364_v23 = vld [vmem:[#allocation31_spill] sm:$0xff]  ;;  %v7366_v5 = vld [vmem:[#allocation86_spill] sm:$0xff] }
 0x25e   : > { %v2736_v39 = vpack.c.bf16 %v2631_v17, %v2630_v31  ;;  %v2536_v56 = vmul.f32 %v4477_v58, %v2324_v38  ;;  %v2120_v10 = vadd.f32 %v2056_v8, %v1608_v24  ;;  %v2121_v59 = vadd.f32 %v2057_v3, %v1609_v32  ;;  %v2332_v58 = vpop.permute.xlu0 %2331  ;;  %v4820_v31 = vld [vmem:[%s5161_s16 + $0xc0] sm:$0xff]   ;;  %v7369_v1 = vld [vmem:[#allocation62_spill] sm:$0xff]  ;;  %v4805_v32 = vld [vmem:[%s5161_s16 + $0x48] sm:$0xff]  }
 0x25f   : > { %v4225_v19 = vunpack.c.l.bf16 %v4773_v42  ;;  %v4226_v36 = vunpack.c.h.bf16 %v4773_v42  ;;  %v4101_v50 = vunpack.c.l.bf16 %v4743_v53  ;;  %v4162_v6 = vunpack.c.h.bf16 %v4758_v37  ;;  %v7374_v42 = vld [vmem:[#allocation114_spill] sm:$0xff] }
 0x260   : > { %v2600_v61 = vadd.f32 %v2536_v56, %v2088_v25  ;;  %4969 = vmatprep.mubr.msk.bf16.mxu1 %vm2747_vm1, %v2736_v39  ;;  %v2633_v47 = vadd.f32 %v2569_v7, %v2121_v59  ;;  %v4161_v35 = vunpack.c.l.bf16 %v4758_v37  ;;  %v4166_v49 = vunpack.c.h.bf16 %v6606_v26  ;;  %v7368_v25 = vld [vmem:[#allocation61_spill] sm:$0xff]  ;;  %v7370_v56 = vld [vmem:[#allocation140_spill] sm:$0xff]  ;;  %v7375_v37 = vld [vmem:[#allocation87_spill] sm:$0xff] }
 0x261   : > { %v2452_v55 = vpop.permute.xlu1 %2451  ;;  %v1067_v52 = vmul.f32 %v4098_v16, %v7362_v40  ;;  %v4165_v4 = vunpack.c.l.bf16 %v6606_v26  ;;  %v4353_v34 = vunpack.c.l.bf16 %v4804_v20  ;;  %v4354_v29 = vunpack.c.h.bf16 %v4804_v20  ;;  %v7377_v40 = vld [vmem:[#allocation15_spill] sm:$0xff] }
 0x262   : > { %v2721_v48 = vpack.c.bf16 %v2601_v45, %v2600_v61  ;;  %v2568_v43 = vmul.f32 %v4541_v15, %v2452_v55  ;;  %v1066_v46 = vmul.f32 %v4097_v14, %v7363_v60  ;;  %v6620_v57 = vmul.f32 %v4102_v63, %v7364_v23  ;;  %v7371_v45 = vld [vmem:[#allocation143_spill] sm:$0xff]  ;;  %v2464_v16 = vpop.permute.xlu0 %2463 }
 0x263   : > { %v4229_v51 = vunpack.c.l.bf16 %v4774_v41  ;;  %v4230_v9 = vunpack.c.h.bf16 %v4774_v41  ;;  %v1514_v44 = vmul.f32 %v4225_v19, %v7365_v11  ;;  %v1515_v17 = vmul.f32 %v4226_v36, %v7366_v5  ;;  %v4851_v61 = vld [vmem:[%s5166_s19 + $0xc0] sm:$0xff]   ;;  %v4836_v36 = vld [vmem:[%s5166_s19 + $0x48] sm:$0xff]  }
 0x264   : > { %v2632_v27 = vadd.f32 %v2568_v43, %v2120_v10  ;;  %4938 = vmatmul.mubr.msk.bf16.gmra.mrb[12].mxu0 %vm2747_vm1, %v2721_v48  ;;  %v4289_v54 = vunpack.c.l.bf16 %v4789_v22  ;;  %v4290_v33 = vunpack.c.h.bf16 %v4789_v22  ;;  %v1068_v62 = vmul.f32 %v4101_v50, %v7367_v0  ;;  %v7372_v55 = vld [vmem:[#allocation63_spill] sm:$0xff]  ;;  %v7376_v41 = vld [vmem:[#allocation88_spill] sm:$0xff] }
 0x265   : > { %v1099_v12 = vmul.f32 %v4162_v6, %v7368_v25  ;;  %v1098_v38 = vmul.f32 %v4161_v35, %v7369_v1  ;;  %v4481_v15 = vunpack.c.l.bf16 %v4835_v13  ;;  %v4293_v3 = vunpack.c.l.bf16 %v6623_v30 }
 0x266   : > { %v2737_v28 = vpack.c.bf16 %v2633_v47, %v2632_v27  ;;  %v6602_v18 = vpop.permute.xlu1 %1947  ;;  %v4294_v39 = vunpack.c.h.bf16 %v6623_v30  ;;  %v2026_v24 = vmul.f32 %v4353_v34, %v7370_v56  ;;  %v2027_v7 = vmul.f32 %v4354_v29, %v7371_v45  ;;  %v7373_v27 = vld [vmem:[#allocation113_spill] sm:$0xff]  ;;  %v4821_v29 = vld [vmem:[%s5161_s16 + $0xc8] sm:$0xff]   ;;  %v2344_v0 = vpop.permute.xlu0 %2343 }
 0x267   : > { %v1101_v10 = vmul.f32 %v4166_v49, %v7372_v55  ;;  %v4418_v59 = vunpack.c.h.bf16 %v4820_v31  ;;  %v4417_v48 = vunpack.c.l.bf16 %v4820_v31  ;;  %v4482_v43 = vunpack.c.h.bf16 %v4835_v13  ;;  %v4852_v56 = vld [vmem:[%s5166_s19 + $0xc8] sm:$0xff]  }
 0x268   : > { %4970 = vmatmul.mubr.msk.bf16.gmra.mrb[12].mxu1 %vm2747_vm1, %v2737_v28  ;;  %v1578_v21 = vadd.f32 %v1514_v44, %v1066_v46  ;;  %v1579_v47 = vadd.f32 %v1515_v17, %v1067_v52  ;;  %v1546_v53 = vmul.f32 %v4289_v54, %v7373_v27  ;;  %v1547_v28 = vmul.f32 %v4290_v33, %v7374_v42  ;;  %v7379_v17 = vld [vmem:[#allocation142_spill] sm:$0xff]  ;;  %v7380_v33 = vld [vmem:[#allocation145_spill] sm:$0xff] }
 0x269   : > { %v1516_v14 = vmul.f32 %v4229_v51, %v7375_v37  ;;  %v4357_v63 = vunpack.c.l.bf16 %v4805_v32  ;;  %v2538_v20 = vmul.f32 %v4481_v15, %v2332_v58  ;;  %v4546_v19 = vunpack.c.h.bf16 %v4851_v61  ;;  %v7378_v51 = vld [vmem:[#allocation116_spill] sm:$0xff] }
 0x26a   : > { %v6613_v2 = vpop.permute.xlu1 %1955  ;;  %v1517_v50 = vmul.f32 %v4230_v9, %v7376_v41  ;;  %v2090_v6 = vadd.f32 %v2026_v24, %v1578_v21  ;;  %v2091_v35 = vadd.f32 %v2027_v7, %v1579_v47  ;;  %v4358_v49 = vunpack.c.h.bf16 %v4805_v32  ;;  %v7381_v32 = vld [vmem:[#allocation64_spill] sm:$0xff] }
 0x26b   : > { %v2059_v52 = vmul.f32 %v4418_v59, %v7377_v40  ;;  %v2058_v34 = vmul.f32 %v4417_v48, %v6602_v18  ;;  %v4545_v60 = vunpack.c.l.bf16 %v4851_v61  ;;  %v1610_v46 = vadd.f32 %v1546_v53, %v1098_v38  ;;  %v7382_v61 = vld [vmem:[#allocation115_spill] sm:$0xff] }
 0x26c   : > { %v1611_v23 = vadd.f32 %v1547_v28, %v1099_v12  ;;  %v1549_v58 = vmul.f32 %v4294_v39, %v7378_v51  ;;  %v4486_v30 = vunpack.c.h.bf16 %v4836_v36  ;;  %v2602_v11 = vadd.f32 %v2538_v20, %v2090_v6  ;;  %v4745_v6 = vld [vmem:[%s5151_s10 + $0x58] sm:$0xff]  }
 0x26d   : > { %v2571_v44 = vmul.f32 %v4546_v19, %v2464_v16  ;;  %v4422_v9 = vunpack.c.h.bf16 %v4821_v29  ;;  %v2028_v54 = vmul.f32 %v4357_v63, %v7379_v17  ;;  %v2029_v31 = vmul.f32 %v4358_v49, %v7380_v33  ;;  %v4776_v51 = vld [vmem:[%s5156_s13 + $0x58] sm:$0xff]   ;;  %v7383_v17 = vld [vmem:[#allocation33_spill] sm:$0xff] }
 0x26e   : > { %v1960_v8 = vpop.permute.xlu1 %1959  ;;  %v4421_v25 = vunpack.c.l.bf16 %v4821_v29  ;;  %v4485_v1 = vunpack.c.l.bf16 %v4836_v36  ;;  %v2123_v15 = vadd.f32 %v2059_v52, %v1611_v23  ;;  %v2122_v24 = vadd.f32 %v2058_v34, %v1610_v46  ;;  %v4744_v36 = vld [vmem:[%s5151_s10 + $0x50] sm:$0xff]   ;;  %v6666_v29 = vld [vmem:[%s5151_s10 + $0xd8] sm:$0xff]  }
 0x26f   : > { %v1100_v39 = vmul.f32 %v4165_v4, %v7381_v32  ;;  %v1580_v45 = vadd.f32 %v1516_v14, %v1068_v62  ;;  %v1581_v7 = vadd.f32 %v1517_v50, %v6620_v57  ;;  %v1548_v55 = vmul.f32 %v4293_v3, %v7382_v61  ;;  %v2472_v57 = vpop.permute.xlu0 %2471  ;;  %v4760_v34 = vld [vmem:[%s5151_s10 + $0xd0] sm:$0xff]   ;;  %v7384_v33 = vld [vmem:[#allocation34_spill] sm:$0xff] }
 0x270   : > { %v2635_v59 = vadd.f32 %v2571_v44, %v2123_v15  ;;  %v2541_v48 = vmul.f32 %v4486_v30, %v2344_v0  ;;  %v1613_v47 = vadd.f32 %v1549_v58, %v1101_v10  ;;  %v4550_v42 = vunpack.c.h.bf16 %v4852_v56  ;;  %v7385_v15 = vld [vmem:[#allocation35_spill] sm:$0xff]  ;;  %v7387_v61 = vld [vmem:[#allocation89_spill] sm:$0xff] }
 0x271   : > { %v2092_v27 = vadd.f32 %v2028_v54, %v1580_v45  ;;  %v2093_v53 = vadd.f32 %v2029_v31, %v1581_v7  ;;  %v2060_v26 = vmul.f32 %v4421_v25, %v6613_v2  ;;  %v4549_v16 = vunpack.c.l.bf16 %v4852_v56  ;;  %v7386_v45 = vld [vmem:[#allocation36_spill] sm:$0xff] }
 0x272   : > { %v1612_v3 = vadd.f32 %v1548_v55, %v1100_v39  ;;  %v2573_v63 = vmul.f32 %v4550_v42, %v2472_v57  ;;  %v4106_v40 = vunpack.c.h.bf16 %v4744_v36  ;;  %v4105_v52 = vunpack.c.l.bf16 %v4744_v36  ;;  %v4822_v39 = vld [vmem:[%s5161_s16 + $0xd0] sm:$0xff]   ;;  %v7391_v57 = vld [vmem:[#allocation144_spill] sm:$0xff] }
 0x273   : > { %v2336_v22 = vpop.permute.xlu1 %2335  ;;  %v2605_v37 = vadd.f32 %v2541_v48, %v2093_v53  ;;  %v4109_v46 = vunpack.c.l.bf16 %v4745_v6  ;;  %v4170_v58 = vunpack.c.h.bf16 %v4760_v34  ;;  %v4169_v30 = vunpack.c.l.bf16 %v4760_v34  ;;  %v7390_v53 = vld [vmem:[#allocation90_spill] sm:$0xff]  ;;  %v7396_v34 = vld [vmem:[#allocation91_spill] sm:$0xff] }
 0x274   : > { %v2539_v13 = vmul.f32 %v4482_v43, %v2336_v22  ;;  %v2061_v43 = vmul.f32 %v4422_v9, %v1960_v8  ;;  %v2124_v20 = vadd.f32 %v2060_v26, %v1612_v3  ;;  %v4791_v9 = vld [vmem:[%s5156_s13 + $0xd0] sm:$0xff]   ;;  %v1071_v54 = vmul.f32 %v4106_v40, %v7383_v17 }
 0x275   : > { %v1070_v31 = vmul.f32 %v4105_v52, %v7384_v33  ;;  %v4173_v0 = vunpack.c.l.bf16 %v6666_v29  ;;  %v1072_v7 = vmul.f32 %v4109_v46, %v7386_v45  ;;  %v4298_v48 = vunpack.c.h.bf16 %v4791_v9 }
 0x276   : > { %v2603_v5 = vadd.f32 %v2539_v13, %v2091_v35  ;;  %v2125_v8 = vadd.f32 %v2061_v43, %v1613_v47  ;;  %v4775_v35 = vld [vmem:[%s5156_s13 + $0x50] sm:$0xff]   ;;  %v4110_v13 = vunpack.c.h.bf16 %v4745_v6  ;;  %v7389_v47 = vld [vmem:[#allocation66_spill] sm:$0xff] }
 0x277   : > { %v2460_v18 = vpop.permute.xlu1 %2459  ;;  %v4233_v23 = vunpack.c.l.bf16 %v4775_v35  ;;  %v4234_v44 = vunpack.c.h.bf16 %v4775_v35  ;;  %v7388_v43 = vld [vmem:[#allocation65_spill] sm:$0xff]  ;;  %v7395_v6 = vld [vmem:[#allocation118_spill] sm:$0xff] }
 0x278   : > { %v2722_v38 = vpack.c.bf16 %v2603_v5, %v2602_v11  ;;  %v2570_v12 = vmul.f32 %v4545_v60, %v2460_v18  ;;  %v2637_v41 = vadd.f32 %v2573_v63, %v2125_v8  ;;  %v4806_v60 = vld [vmem:[%s5161_s16 + $0x50] sm:$0xff]   ;;  %v4174_v11 = vunpack.c.h.bf16 %v6666_v29  ;;  %v7393_v63 = vld [vmem:[#allocation147_spill] sm:$0xff] }
 0x279   : > { %v4361_v25 = vunpack.c.l.bf16 %v4806_v60  ;;  %v4837_v18 = vld [vmem:[%s5166_s19 + $0x50] sm:$0xff]   ;;  %v6680_v56 = vmul.f32 %v4110_v13, %v7385_v15  ;;  %v4362_v32 = vunpack.c.h.bf16 %v4806_v60  ;;  %v1518_v55 = vmul.f32 %v4233_v23, %v7387_v61  ;;  %v4838_v23 = vld [vmem:[%s5166_s19 + $0x58] sm:$0xff]  }
 0x27a   : > { %v2634_v21 = vadd.f32 %v2570_v12, %v2122_v24  ;;  %4941 = vmatprep.mubr.msk.bf16.mxu0 %vm2747_vm1, %v2722_v38  ;;  %v4237_v24 = vunpack.c.l.bf16 %v4776_v51  ;;  %v4238_v38 = vunpack.c.h.bf16 %v4776_v51  ;;  %v6683_v12 = vld [vmem:[%s5156_s13 + $0xd8] sm:$0xff]   ;;  %v1519_v42 = vmul.f32 %v4234_v44, %v7390_v53  ;;  %v4853_v8 = vld [vmem:[%s5166_s19 + $0xd0] sm:$0xff]   ;;  %v7397_v51 = vld [vmem:[#allocation92_spill] sm:$0xff] }
 0x27b   : > { %v2340_v28 = vpop.permute.xlu1 %2339  ;;  %v4489_v26 = vunpack.c.l.bf16 %v4837_v18  ;;  %v2030_v3 = vmul.f32 %v4361_v25, %v7391_v57  ;;  %v1582_v36 = vadd.f32 %v1518_v55, %v1070_v31  ;;  %v1551_v35 = vmul.f32 %v4298_v48, %v7395_v6  ;;  %v7398_v44 = vld [vmem:[#allocation18_spill] sm:$0xff]  ;;  %v7401_v48 = vld [vmem:[#allocation149_spill] sm:$0xff] }
 0x27c   : > { %v2738_v4 = vpack.c.bf16 %v2635_v59, %v2634_v21  ;;  %v2540_v62 = vmul.f32 %v4485_v1, %v2340_v28  ;;  %v2348_v1 = vpop.permute.xlu0 %2347  ;;  %v4297_v59 = vunpack.c.l.bf16 %v4791_v9  ;;  %v1103_v21 = vmul.f32 %v4170_v58, %v7388_v43  ;;  %v4807_v28 = vld [vmem:[%s5161_s16 + $0x58] sm:$0xff]  }
 0x27d   : > { %v1583_v52 = vadd.f32 %v1519_v42, %v1071_v54  ;;  %v1520_v13 = vmul.f32 %v4237_v24, %v7396_v34  ;;  %v2542_v60 = vmul.f32 %v4489_v26, %v2348_v1  ;;  %v4554_v46 = vunpack.c.h.bf16 %v4853_v8  ;;  %v4823_v25 = vld [vmem:[%s5161_s16 + $0xd8] sm:$0xff]   ;;  %v7399_v24 = vld [vmem:[#allocation120_spill] sm:$0xff] }
 0x27e   : > { %v2604_v14 = vadd.f32 %v2540_v62, %v2092_v27  ;;  %4973 = vmatprep.mubr.msk.bf16.mxu1 %vm2747_vm1, %v2738_v4  ;;  %v1102_v27 = vmul.f32 %v4169_v30, %v7389_v47  ;;  %v4301_v62 = vunpack.c.l.bf16 %v6683_v12  ;;  %v1521_v58 = vmul.f32 %v4238_v38, %v7397_v51  ;;  %v7400_v55 = vld [vmem:[#allocation146_spill] sm:$0xff] }
 0x27f   : > { %v2468_v10 = vpop.permute.xlu1 %2467  ;;  %v2094_v30 = vadd.f32 %v2030_v3, %v1582_v36  ;;  %v4553_v15 = vunpack.c.l.bf16 %v4853_v8  ;;  %v4430_v38 = vunpack.c.h.bf16 %v4823_v25  ;;  %v7402_v3 = vld [vmem:[#allocation68_spill] sm:$0xff] }
 0x280   : > { %v2723_v19 = vpack.c.bf16 %v2605_v37, %v2604_v14  ;;  %v2572_v2 = vmul.f32 %v4549_v16, %v2468_v10  ;;  %v4302_v16 = vunpack.c.h.bf16 %v6683_v12  ;;  %v4426_v37 = vunpack.c.h.bf16 %v4822_v39  ;;  %v7392_v14 = vld [vmem:[#allocation67_spill] sm:$0xff]  ;;  %v2480_v40 = vpop.permute.xlu0 %2479 }
 0x281   : > { %v1105_v10 = vmul.f32 %v4174_v11, %v7392_v14  ;;  %v4366_v11 = vunpack.c.h.bf16 %v4807_v28  ;;  %v1615_v12 = vadd.f32 %v1551_v35, %v1103_v21  ;;  %v2575_v45 = vmul.f32 %v4554_v46, %v2480_v40  ;;  %v7403_v14 = vld [vmem:[#allocation119_spill] sm:$0xff] }
 0x282   : > { %v2636_v50 = vadd.f32 %v2572_v2, %v2124_v20  ;;  %4942 = vmatmul.mubr.msk.bf16.gmra.mrb[16].mxu0 %vm2747_vm1, %v2723_v19  ;;  %v2031_v20 = vmul.f32 %v4362_v32, %v7393_v63  ;;  %v4425_v19 = vunpack.c.l.bf16 %v4822_v39  ;;  %v4490_v2 = vunpack.c.h.bf16 %v4837_v18 }
 0x283   : > { %v2063_v9 = vmul.f32 %v4426_v37, %v7398_v44  ;;  %v1553_v1 = vmul.f32 %v4302_v16, %v7399_v24  ;;  %v4494_v32 = vunpack.c.h.bf16 %v4838_v23  ;;  %v2606_v39 = vadd.f32 %v2542_v60, %v2094_v30  ;;  %v4747_v30 = vld [vmem:[%s5151_s10 + $0x68] sm:$0xff]  }
 0x284   : > { %v2739_v49 = vpack.c.bf16 %v2637_v41, %v2636_v50  ;;  %v6662_v22 = vpop.permute.xlu1 %1963  ;;  %v7394_v41 = vld [vmem:[#allocation117_spill] sm:$0xff]  ;;  %v2095_v33 = vadd.f32 %v2031_v20, %v1583_v52  ;;  %v2033_v43 = vmul.f32 %v4366_v11, %v7401_v48  ;;  %v2360_v53 = vpop.permute.xlu0 %2359  ;;  %v4493_v21 = vunpack.c.l.bf16 %v4838_v23  ;;  %v4746_v23 = vld [vmem:[%s5151_s10 + $0x60] sm:$0xff]   ;;  %v4778_v24 = vld [vmem:[%s5156_s13 + $0x68] sm:$0xff]  }
 0x285   : > { %v1550_v50 = vmul.f32 %v4297_v59, %v7394_v41  ;;  %v2062_v31 = vmul.f32 %v4425_v19, %v6662_v22  ;;  %v2127_v47 = vadd.f32 %v2063_v9, %v1615_v12  ;;  %v4429_v22 = vunpack.c.l.bf16 %v4823_v25  ;;  %v4777_v11 = vld [vmem:[%s5156_s13 + $0x60] sm:$0xff]   ;;  %v6726_v25 = vld [vmem:[%s5151_s10 + $0xe8] sm:$0xff]   ;;  %v7405_v48 = vld [vmem:[#allocation38_spill] sm:$0xff] }
 0x286   : > { %4974 = vmatmul.mubr.msk.bf16.gmra.mrb[16].mxu1 %vm2747_vm1, %v2739_v49  ;;  %v4365_v49 = vunpack.c.l.bf16 %v4807_v28  ;;  %v4854_v28 = vld [vmem:[%s5166_s19 + $0xd8] sm:$0xff]   ;;  %v1104_v16 = vmul.f32 %v4173_v0, %v7402_v3  ;;  %v1584_v37 = vadd.f32 %v1520_v13, %v1072_v7  ;;  %v1585_v8 = vadd.f32 %v1521_v58, %v6680_v56 }
 0x287   : > { %v1614_v54 = vadd.f32 %v1550_v50, %v1102_v27  ;;  %v1552_v63 = vmul.f32 %v4301_v62, %v7403_v14  ;;  %v2639_v20 = vadd.f32 %v2575_v45, %v2127_v47  ;;  %v2545_v19 = vmul.f32 %v4494_v32, %v2360_v53  ;;  %v7408_v14 = vld [vmem:[#allocation93_spill] sm:$0xff] }
 0x288   : > { %v6673_v5 = vpop.permute.xlu1 %1971  ;;  %v2032_v59 = vmul.f32 %v4365_v49, %v7400_v55  ;;  %v1617_v41 = vadd.f32 %v1553_v1, %v1105_v10  ;;  %v2097_v6 = vadd.f32 %v2033_v43, %v1585_v8  ;;  %v4558_v35 = vunpack.c.h.bf16 %v4854_v28  ;;  %v2488_v56 = vpop.permute.xlu0 %2487  ;;  %v7404_v55 = vld [vmem:[#allocation37_spill] sm:$0xff] }
 0x289   : > { %v2126_v26 = vadd.f32 %v2062_v31, %v1614_v54  ;;  %v2064_v29 = vmul.f32 %v4429_v22, %v6673_v5  ;;  %v4557_v40 = vunpack.c.l.bf16 %v4854_v28  ;;  %v1616_v62 = vadd.f32 %v1552_v63, %v1104_v16  ;;  %v4762_v31 = vld [vmem:[%s5151_s10 + $0xe0] sm:$0xff]  }
 0x28a   : > { %v2096_v50 = vadd.f32 %v2032_v59, %v1584_v37  ;;  %v2609_v52 = vadd.f32 %v2545_v19, %v2097_v6  ;;  %v2577_v13 = vmul.f32 %v4558_v35, %v2488_v56  ;;  %v4117_v54 = vunpack.c.l.bf16 %v4747_v30  ;;  %v4839_v22 = vld [vmem:[%s5166_s19 + $0x60] sm:$0xff]   ;;  %v7407_v37 = vld [vmem:[#allocation40_spill] sm:$0xff]  ;;  %v7411_v6 = vld [vmem:[#allocation94_spill] sm:$0xff] }
 0x28b   : > { %v2128_v60 = vadd.f32 %v2064_v29, %v1616_v62  ;;  %v4241_v12 = vunpack.c.l.bf16 %v4777_v11  ;;  %v4178_v1 = vunpack.c.h.bf16 %v4762_v31  ;;  %v4177_v32 = vunpack.c.l.bf16 %v4762_v31  ;;  %v7406_v28 = vld [vmem:[#allocation39_spill] sm:$0xff]  ;;  %v7412_v56 = vld [vmem:[#allocation148_spill] sm:$0xff] }
 0x28c   : > { %v1976_v4 = vpop.permute.xlu1 %1975  ;;  %v4242_v45 = vunpack.c.h.bf16 %v4777_v11  ;;  %v4181_v47 = vunpack.c.l.bf16 %v6726_v25  ;;  %v4824_v16 = vld [vmem:[%s5161_s16 + $0xe0] sm:$0xff]   ;;  %v1076_v8 = vmul.f32 %v4117_v54, %v7407_v37  ;;  %v4497_v29 = vunpack.c.l.bf16 %v4839_v22 }
 0x28d   : > { %v1522_v63 = vmul.f32 %v4241_v12, %v7408_v14  ;;  %v7417_v31 = vld [vmem:[#allocation95_spill] sm:$0xff]  ;;  %v4840_v12 = vld [vmem:[%s5166_s19 + $0x68] sm:$0xff]  }
 0x28e   : > { %v1523_v35 = vmul.f32 %v4242_v45, %v7411_v6  ;;  %v7419_v45 = vld [vmem:[#allocation21_spill] sm:$0xff] }
 0x291   : > { %v2352_v17 = vpop.permute.xlu1 %2351 }
 0x292   : > { %v2543_v18 = vmul.f32 %v4490_v2, %v2352_v17  ;;  %v2065_v2 = vmul.f32 %v4430_v38, %v1976_v4  ;;  %v4114_v17 = vunpack.c.h.bf16 %v4746_v23  ;;  %v4793_v38 = vld [vmem:[%s5156_s13 + $0xe0] sm:$0xff]  }
 0x293   : > { %v4306_v19 = vunpack.c.h.bf16 %v4793_v38 }
 0x294   : > { %v2607_v61 = vadd.f32 %v2543_v18, %v2095_v33  ;;  %v2129_v4 = vadd.f32 %v2065_v2, %v1617_v41  ;;  %v4113_v33 = vunpack.c.l.bf16 %v4746_v23  ;;  %v4118_v18 = vunpack.c.h.bf16 %v4747_v30  ;;  %v7409_v2 = vld [vmem:[#allocation69_spill] sm:$0xff]  ;;  %v7410_v41 = vld [vmem:[#allocation70_spill] sm:$0xff] }
 0x295   : > { %v2476_v42 = vpop.permute.xlu1 %2475  ;;  %v1075_v59 = vmul.f32 %v4114_v17, %v7404_v55  ;;  %v7416_v30 = vld [vmem:[#allocation122_spill] sm:$0xff] }
 0x296   : > { %v2724_v57 = vpack.c.bf16 %v2607_v61, %v2606_v39  ;;  %v2574_v27 = vmul.f32 %v4553_v15, %v2476_v42  ;;  %v2641_v51 = vadd.f32 %v2577_v13, %v2129_v4  ;;  %v4808_v15 = vld [vmem:[%s5161_s16 + $0x60] sm:$0xff]   ;;  %v4182_v39 = vunpack.c.h.bf16 %v6726_v25  ;;  %v2364_v42 = vpop.permute.xlu0 %2363 }
 0x297   : > { %v1074_v43 = vmul.f32 %v4113_v33, %v7405_v48  ;;  %v4369_v53 = vunpack.c.l.bf16 %v4808_v15  ;;  %v4370_v3 = vunpack.c.h.bf16 %v4808_v15  ;;  %v4855_v4 = vld [vmem:[%s5166_s19 + $0xe0] sm:$0xff]   ;;  %v1555_v11 = vmul.f32 %v4306_v19, %v7416_v30 }
 0x298   : > { %v2638_v36 = vadd.f32 %v2574_v27, %v2126_v26  ;;  %4945 = vmatprep.mubr.msk.bf16.mxu0 %vm2747_vm1, %v2724_v57  ;;  %v6740_v26 = vmul.f32 %v4118_v18, %v7406_v28  ;;  %v4245_v57 = vunpack.c.l.bf16 %v4778_v24  ;;  %v4246_v27 = vunpack.c.h.bf16 %v4778_v24  ;;  %v7414_v13 = vld [vmem:[#allocation151_spill] sm:$0xff]  ;;  %v7418_v24 = vld [vmem:[#allocation96_spill] sm:$0xff] }
 0x299   : > { %v2356_v49 = vpop.permute.xlu1 %2355  ;;  %v2034_v62 = vmul.f32 %v4369_v53, %v7412_v56  ;;  %v1586_v23 = vadd.f32 %v1522_v63, %v1074_v43  ;;  %v1587_v33 = vadd.f32 %v1523_v35, %v1075_v59  ;;  %v2546_v15 = vmul.f32 %v4497_v29, %v2364_v42  ;;  %v4825_v53 = vld [vmem:[%s5161_s16 + $0xe8] sm:$0xff]   ;;  %v7421_v63 = vld [vmem:[#allocation150_spill] sm:$0xff]  ;;  %v7422_v19 = vld [vmem:[#allocation3_spill] sm:$0xff] }
 0x29a   : > { %v2740_v0 = vpack.c.bf16 %v2639_v20, %v2638_v36  ;;  %v2544_v7 = vmul.f32 %v4493_v21, %v2356_v49  ;;  %v6743_v21 = vld [vmem:[%s5156_s13 + $0xe8] sm:$0xff]   ;;  %v4305_v20 = vunpack.c.l.bf16 %v4793_v38  ;;  %v1107_v36 = vmul.f32 %v4178_v1, %v7409_v2  ;;  %v2496_v17 = vpop.permute.xlu0 %2495 }
 0x29b   : > { %v4809_v49 = vld [vmem:[%s5161_s16 + $0x68] sm:$0xff]   ;;  %v1524_v18 = vmul.f32 %v4245_v57, %v7417_v31  ;;  %v4562_v54 = vunpack.c.h.bf16 %v4855_v4  ;;  %v1525_v1 = vmul.f32 %v4246_v27, %v7418_v24  ;;  %v4561_v28 = vunpack.c.l.bf16 %v4855_v4 }
 0x29c   : > { %v2608_v34 = vadd.f32 %v2544_v7, %v2096_v50  ;;  %4977 = vmatprep.mubr.msk.bf16.mxu1 %vm2747_vm1, %v2740_v0  ;;  %v1106_v50 = vmul.f32 %v4177_v32, %v7410_v41  ;;  %v4309_v7 = vunpack.c.l.bf16 %v6743_v21  ;;  %v2098_v32 = vadd.f32 %v2034_v62, %v1586_v23  ;;  %v7420_v57 = vld [vmem:[#allocation124_spill] sm:$0xff]  ;;  %v7423_v62 = vld [vmem:[#allocation71_spill] sm:$0xff] }
 0x29d   : > { %v2484_v10 = vpop.permute.xlu1 %2483  ;;  %v2579_v37 = vmul.f32 %v4562_v54, %v2496_v17  ;;  %v4438_v27 = vunpack.c.h.bf16 %v4825_v53  ;;  %v1589_v4 = vadd.f32 %v1525_v1, %v6740_v26 }
 0x29e   : > { %v2725_v46 = vpack.c.bf16 %v2609_v52, %v2608_v34  ;;  %v2576_v5 = vmul.f32 %v4557_v40, %v2484_v10  ;;  %v4310_v40 = vunpack.c.h.bf16 %v6743_v21  ;;  %v4434_v52 = vunpack.c.h.bf16 %v4824_v16  ;;  %v7413_v34 = vld [vmem:[#allocation7_spill] sm:$0xff]  ;;  %v2376_v6 = vpop.permute.xlu0 %2375 }
 0x29f   : > { %v1109_v10 = vmul.f32 %v4182_v39, %v7413_v34  ;;  %v4374_v39 = vunpack.c.h.bf16 %v4809_v49  ;;  %v1619_v21 = vadd.f32 %v1555_v11, %v1107_v36  ;;  %v4501_v36 = vunpack.c.l.bf16 %v4840_v12  ;;  %v7424_v34 = vld [vmem:[#allocation123_spill] sm:$0xff] }
 0x2a0   : > { %v2640_v58 = vadd.f32 %v2576_v5, %v2128_v60  ;;  %4946 = vmatmul.mubr.msk.bf16.gmra.mrb[20].mxu0 %vm2747_vm1, %v2725_v46  ;;  %v2035_v60 = vmul.f32 %v4370_v3, %v7414_v13  ;;  %v4433_v46 = vunpack.c.l.bf16 %v4824_v16  ;;  %v4498_v5 = vunpack.c.h.bf16 %v4839_v22 }
 0x2a1   : > { %v2067_v38 = vmul.f32 %v4434_v52, %v7419_v45  ;;  %v1557_v42 = vmul.f32 %v4310_v40, %v7420_v57  ;;  %v4502_v3 = vunpack.c.h.bf16 %v4840_v12  ;;  %v2610_v16 = vadd.f32 %v2546_v15, %v2098_v32  ;;  %v4748_v12 = vld [vmem:[%s5151_s10 + $0x70] sm:$0xff]   ;;  %v4749_v32 = vld [vmem:[%s5151_s10 + $0x78] sm:$0xff]  }
 0x2a2   : > { %v2741_v44 = vpack.c.bf16 %v2641_v51, %v2640_v58  ;;  %v6722_v9 = vpop.permute.xlu1 %1979  ;;  %v7415_v51 = vld [vmem:[#allocation121_spill] sm:$0xff]  ;;  %v2099_v48 = vadd.f32 %v2035_v60, %v1587_v33  ;;  %v2037_v2 = vmul.f32 %v4374_v39, %v7422_v19  ;;  %v1108_v40 = vmul.f32 %v4181_v47, %v7423_v62  ;;  %v2504_v26 = vpop.permute.xlu0 %2503  ;;  %v4780_v57 = vld [vmem:[%s5156_s13 + $0x78] sm:$0xff]  }
 0x2a3   : > { %v1554_v58 = vmul.f32 %v4305_v20, %v7415_v51  ;;  %v2066_v43 = vmul.f32 %v4433_v46, %v6722_v9  ;;  %v2131_v41 = vadd.f32 %v2067_v38, %v1619_v21  ;;  %v4437_v9 = vunpack.c.l.bf16 %v4825_v53  ;;  %v4779_v39 = vld [vmem:[%s5156_s13 + $0x70] sm:$0xff]   ;;  %v6786_v53 = vld [vmem:[%s5151_s10 + $0xf8] sm:$0xff]  }
 0x2a4   : > { %4978 = vmatmul.mubr.msk.bf16.gmra.mrb[20].mxu1 %vm2747_vm1, %v2741_v44  ;;  %v4373_v44 = vunpack.c.l.bf16 %v4809_v49  ;;  %v4856_v49 = vld [vmem:[%s5166_s19 + $0xe8] sm:$0xff]   ;;  %v1588_v52 = vadd.f32 %v1524_v18, %v1076_v8  ;;  %v1556_v13 = vmul.f32 %v4309_v7, %v7424_v34  ;;  %v2549_v46 = vmul.f32 %v4502_v3, %v2376_v6  ;;  %v7426_v19 = vld [vmem:[#allocation42_spill] sm:$0xff]  ;;  %v7429_v34 = vld [vmem:[#allocation97_spill] sm:$0xff] }
 0x2a5   : > { %v1618_v59 = vadd.f32 %v1554_v58, %v1106_v50  ;;  %v2643_v60 = vadd.f32 %v2579_v37, %v2131_v41  ;;  %v1621_v51 = vadd.f32 %v1557_v42, %v1109_v10  ;;  %v2101_v30 = vadd.f32 %v2037_v2, %v1589_v4 }
 0x2a6   : > { %v6733_v61 = vpop.permute.xlu1 %1987  ;;  %v2036_v20 = vmul.f32 %v4373_v44, %v7421_v63  ;;  %v4566_v11 = vunpack.c.h.bf16 %v4856_v49  ;;  %v4565_v17 = vunpack.c.l.bf16 %v4856_v49  ;;  %v1620_v7 = vadd.f32 %v1556_v13, %v1108_v40  ;;  %v7425_v63 = vld [vmem:[#allocation41_spill] sm:$0xff]  ;;  %v7427_v49 = vld [vmem:[#allocation43_spill] sm:$0xff] }
 0x2a7   : > { %v2130_v29 = vadd.f32 %v2066_v43, %v1618_v59  ;;  %v2068_v25 = vmul.f32 %v4437_v9, %v6733_v61  ;;  %v2613_v33 = vadd.f32 %v2549_v46, %v2101_v30  ;;  %v4764_v43 = vld [vmem:[%s5151_s10 + $0xf0] sm:$0xff]   ;;  %v4125_v59 = vunpack.c.l.bf16 %v4749_v32  ;;  %v7432_v30 = vld [vmem:[#allocation98_spill] sm:$0xff] }
 0x2a8   : > { %v2100_v58 = vadd.f32 %v2036_v20, %v1588_v52  ;;  %v2581_v18 = vmul.f32 %v4566_v11, %v2504_v26  ;;  %v4249_v21 = vunpack.c.l.bf16 %v4779_v39  ;;  %v4186_v42 = vunpack.c.h.bf16 %v4764_v43  ;;  %v4841_v9 = vld [vmem:[%s5166_s19 + $0x70] sm:$0xff]   ;;  %v7428_v52 = vld [vmem:[#allocation44_spill] sm:$0xff] }
 0x2a9   : > { %v2132_v15 = vadd.f32 %v2068_v25, %v1620_v7  ;;  %v4185_v3 = vunpack.c.l.bf16 %v4764_v43  ;;  %v4250_v37 = vunpack.c.h.bf16 %v4779_v39  ;;  %v4189_v41 = vunpack.c.l.bf16 %v6786_v53  ;;  %v4826_v40 = vld [vmem:[%s5161_s16 + $0xf0] sm:$0xff]   ;;  %v7433_v26 = vld [vmem:[#allocation152_spill] sm:$0xff]  ;;  %v7438_v43 = vld [vmem:[#allocation99_spill] sm:$0xff] }
 0x2aa   : > { %v1992_v0 = vpop.permute.xlu1 %1991  ;;  %v1080_v4 = vmul.f32 %v4125_v59, %v7428_v52  ;;  %v1526_v13 = vmul.f32 %v4249_v21, %v7429_v34  ;;  %v4505_v25 = vunpack.c.l.bf16 %v4841_v9  ;;  %v4842_v21 = vld [vmem:[%s5166_s19 + $0x78] sm:$0xff]  }
 0x2ab   : > { %v1527_v11 = vmul.f32 %v4250_v37, %v7432_v30  ;;  %v7440_v37 = vld [vmem:[#allocation22_spill] sm:$0xff] }
 0x2b1   : > { %v2368_v55 = vpop.permute.xlu1 %2367 }
 0x2b2   : > { %v2547_v22 = vmul.f32 %v4498_v5, %v2368_v55  ;;  %v2069_v5 = vmul.f32 %v4438_v27, %v1992_v0  ;;  %v4122_v55 = vunpack.c.h.bf16 %v4748_v12  ;;  %v4795_v27 = vld [vmem:[%s5156_s13 + $0xf0] sm:$0xff]  }
 0x2b3   : > { %v4314_v46 = vunpack.c.h.bf16 %v4795_v27 }
 0x2b4   : > { %v2611_v14 = vadd.f32 %v2547_v22, %v2099_v48  ;;  %v2133_v0 = vadd.f32 %v2069_v5, %v1621_v51  ;;  %v4121_v48 = vunpack.c.l.bf16 %v4748_v12  ;;  %v4126_v22 = vunpack.c.h.bf16 %v4749_v32  ;;  %v7430_v5 = vld [vmem:[#allocation9_spill] sm:$0xff]  ;;  %v7431_v51 = vld [vmem:[#allocation72_spill] sm:$0xff]  ;;  %v7437_v32 = vld [vmem:[#allocation126_spill] sm:$0xff] }
 0x2b5   : > { %v2492_v35 = vpop.permute.xlu1 %2491  ;;  %v1079_v20 = vmul.f32 %v4122_v55, %v7425_v63  ;;  %v1559_v39 = vmul.f32 %v4314_v46, %v7437_v32  ;;  %v7443_v46 = vld [vmem:[#allocation155_spill] sm:$0xff] }
 0x2b6   : > { %v2726_v56 = vpack.c.bf16 %v2611_v14, %v2610_v16  ;;  %v2578_v50 = vmul.f32 %v4561_v28, %v2492_v35  ;;  %v2645_v24 = vadd.f32 %v2581_v18, %v2133_v0  ;;  %v4810_v28 = vld [vmem:[%s5161_s16 + $0x70] sm:$0xff]   ;;  %v4190_v16 = vunpack.c.h.bf16 %v6786_v53  ;;  %v2380_v35 = vpop.permute.xlu0 %2379  ;;  %v7435_v18 = vld [vmem:[#allocation154_spill] sm:$0xff] }
 0x2b7   : > { %v1078_v2 = vmul.f32 %v4121_v48, %v7426_v19  ;;  %v4377_v6 = vunpack.c.l.bf16 %v4810_v28  ;;  %v4378_v62 = vunpack.c.h.bf16 %v4810_v28  ;;  %v4857_v0 = vld [vmem:[%s5166_s19 + $0xf0] sm:$0xff]   ;;  %v1591_v48 = vadd.f32 %v1527_v11, %v1079_v20 }
 0x2b8   : > { %v2642_v23 = vadd.f32 %v2578_v50, %v2130_v29  ;;  %4949 = vmatprep.mubr.msk.bf16.mxu0 %vm2747_vm1, %v2726_v56  ;;  %v6800_v29 = vmul.f32 %v4126_v22, %v7427_v49  ;;  %v4253_v56 = vunpack.c.l.bf16 %v4780_v57  ;;  %v4254_v50 = vunpack.c.h.bf16 %v4780_v57  ;;  %v7439_v57 = vld [vmem:[#allocation100_spill] sm:$0xff] }
 0x2b9   : > { %v2372_v44 = vpop.permute.xlu1 %2371  ;;  %v2038_v7 = vmul.f32 %v4377_v6, %v7433_v26  ;;  %v1590_v12 = vadd.f32 %v1526_v13, %v1078_v2  ;;  %v2550_v28 = vmul.f32 %v4505_v25, %v2380_v35  ;;  %v4570_v59 = vunpack.c.h.bf16 %v4857_v0  ;;  %v4827_v6 = vld [vmem:[%s5161_s16 + $0xf8] sm:$0xff]   ;;  %v7442_v13 = vld [vmem:[#allocation153_spill] sm:$0xff] }
 0x2ba   : > { %v2742_v47 = vpack.c.bf16 %v2643_v60, %v2642_v23  ;;  %v2548_v8 = vmul.f32 %v4501_v36, %v2372_v44  ;;  %v6803_v36 = vld [vmem:[%s5156_s13 + $0xf8] sm:$0xff]   ;;  %v4313_v60 = vunpack.c.l.bf16 %v4795_v27  ;;  %v1111_v23 = vmul.f32 %v4186_v42, %v7430_v5  ;;  %v2512_v55 = vpop.permute.xlu0 %2511 }
 0x2bb   : > { %v4811_v44 = vld [vmem:[%s5161_s16 + $0x78] sm:$0xff]   ;;  %v1528_v22 = vmul.f32 %v4253_v56, %v7438_v43  ;;  %v1529_v42 = vmul.f32 %v4254_v50, %v7439_v57  ;;  %v4569_v49 = vunpack.c.l.bf16 %v4857_v0  ;;  %v7441_v56 = vld [vmem:[#allocation128_spill] sm:$0xff]  ;;  %v2583_v52 = vmul.f32 %v4570_v59, %v2512_v55 }
 0x2bc   : > { %v2612_v31 = vadd.f32 %v2548_v8, %v2100_v58  ;;  %4981 = vmatprep.mubr.msk.bf16.mxu1 %vm2747_vm1, %v2742_v47  ;;  %v1110_v58 = vmul.f32 %v4185_v3, %v7431_v51  ;;  %v4317_v8 = vunpack.c.l.bf16 %v6803_v36  ;;  %v2102_v3 = vadd.f32 %v2038_v7, %v1590_v12  ;;  %v7444_v7 = vld [vmem:[#allocation10_spill] sm:$0xff] }
 0x2bd   : > { %v2500_v10 = vpop.permute.xlu1 %2499  ;;  %v4446_v50 = vunpack.c.h.bf16 %v4827_v6  ;;  %v1593_v0 = vadd.f32 %v1529_v42, %v6800_v29 }
 0x2be   : > { %v2727_v54 = vpack.c.bf16 %v2613_v33, %v2612_v31  ;;  %v2580_v61 = vmul.f32 %v4565_v17, %v2500_v10  ;;  %v4318_v17 = vunpack.c.h.bf16 %v6803_v36  ;;  %v4442_v33 = vunpack.c.h.bf16 %v4826_v40  ;;  %v7434_v31 = vld [vmem:[#allocation11_spill] sm:$0xff]  ;;  %v2392_v30 = vpop.permute.xlu0 %2391 }
 0x2bf   : > { %v1113_v10 = vmul.f32 %v4190_v16, %v7434_v31  ;;  %v4382_v16 = vunpack.c.h.bf16 %v4811_v44  ;;  %v1623_v36 = vadd.f32 %v1559_v39, %v1111_v23  ;;  %v4509_v23 = vunpack.c.l.bf16 %v4842_v21  ;;  %v7445_v31 = vld [vmem:[#allocation127_spill] sm:$0xff] }
 0x2c0   : > { %v2644_v1 = vadd.f32 %v2580_v61, %v2132_v15  ;;  %4950 = vmatmul.mubr.msk.bf16.gmra.mrb[24].mxu0 %vm2747_vm1, %v2727_v54  ;;  %v2039_v15 = vmul.f32 %v4378_v62, %v7435_v18  ;;  %v4441_v54 = vunpack.c.l.bf16 %v4826_v40  ;;  %v4506_v61 = vunpack.c.h.bf16 %v4841_v9 }
 0x2c1   : > { %v2071_v27 = vmul.f32 %v4442_v33, %v7440_v37  ;;  %v1561_v35 = vmul.f32 %v4318_v17, %v7441_v56  ;;  %v4510_v62 = vunpack.c.h.bf16 %v4842_v21  ;;  %v2614_v40 = vadd.f32 %v2550_v28, %v2102_v3  ;;  %v2652_v3 = vld [vmem:[#allocation2 + $0x10] sm:$0xff]  ;;  %v2682_v56 = vld [vmem:[#allocation2 + $0x100] sm:$0xff] }
 0x2c2   : > { %v2743_v45 = vpack.c.bf16 %v2645_v24, %v2644_v1  ;;  %v6782_v38 = vpop.permute.xlu1 %1995  ;;  %v7436_v24 = vld [vmem:[#allocation125_spill] sm:$0xff]  ;;  %v2103_v19 = vadd.f32 %v2039_v15, %v1591_v48  ;;  %v2041_v5 = vmul.f32 %v4382_v16, %v7443_v46  ;;  %v1112_v17 = vmul.f32 %v4189_v41, %v7444_v7  ;;  %v2520_v48 = vpop.permute.xlu0 %2519  ;;  %v2650_v16 = vld [vmem:[#allocation2] sm:$0xff] }
 0x2c3   : > { %v1558_v1 = vmul.f32 %v4313_v60, %v7436_v24  ;;  %v2070_v2 = vmul.f32 %v4441_v54, %v6782_v38  ;;  %v2135_v51 = vadd.f32 %v2071_v27, %v1623_v36  ;;  %v4445_v38 = vunpack.c.l.bf16 %v4827_v6  ;;  %v2653_v27 = vld [vmem:[#allocation2 + $0x18] sm:$0xff] }
 0x2c4   : > { %4982 = vmatmul.mubr.msk.bf16.gmra.mrb[24].mxu1 %vm2747_vm1, %v2743_v45  ;;  %v4381_v45 = vunpack.c.l.bf16 %v4811_v44  ;;  %v4858_v44 = vld [vmem:[%s5166_s19 + $0xf8] sm:$0xff]   ;;  %v1592_v33 = vadd.f32 %v1528_v22, %v1080_v4  ;;  %v1560_v18 = vmul.f32 %v4317_v8, %v7445_v31  ;;  %v2553_v54 = vmul.f32 %v4510_v62, %v2392_v30  ;;  %v2656_v30 = vld [vmem:[#allocation2 + $0x30] sm:$0xff]  ;;  %v2686_v31 = vld [vmem:[#allocation2 + $0x120] sm:$0xff] }
 0x2c5   : > { %v1622_v20 = vadd.f32 %v1558_v1, %v1110_v58  ;;  %v2647_v15 = vadd.f32 %v2583_v52, %v2135_v51  ;;  %v1625_v24 = vadd.f32 %v1561_v35, %v1113_v10  ;;  %v2105_v32 = vadd.f32 %v2041_v5, %v1593_v0 }
 0x2c6   : > { %v6793_v14 = vpop.permute.xlu1 %2003  ;;  %v2040_v60 = vmul.f32 %v4381_v45, %v7442_v13  ;;  %v4574_v39 = vunpack.c.h.bf16 %v4858_v44  ;;  %v4573_v4 = vunpack.c.l.bf16 %v4858_v44  ;;  %v1624_v29 = vadd.f32 %v1560_v18, %v1112_v17  ;;  %v2657_v44 = vld [vmem:[#allocation2 + $0x38] sm:$0xff]  ;;  %v2688_v17 = vld [vmem:[#allocation2 + $0x130] sm:$0xff] }
 0x2c7   : > { %v2134_v25 = vadd.f32 %v2070_v2, %v1622_v20  ;;  %v2072_v55 = vmul.f32 %v4445_v38, %v6793_v14  ;;  %v2617_v43 = vadd.f32 %v2553_v54, %v2105_v32  ;;  %v2651_v2 = vld [vmem:[#allocation2 + $0x8] sm:$0xff]  ;;  %v2654_v38 = vld [vmem:[#allocation2 + $0x20] sm:$0xff]  ;;  %v2689_v54 = vld [vmem:[#allocation2 + $0x138] sm:$0xff] }
 0x2c8   : > { %v2104_v1 = vadd.f32 %v2040_v60, %v1592_v33  ;;  %v2585_v28 = vmul.f32 %v4574_v39, %v2520_v48  ;;  %v2661_v48 = vld [vmem:[#allocation2 + $0x58] sm:$0xff] }
 0x2c9   : > { %v2136_v59 = vadd.f32 %v2072_v55, %v1624_v29 }
 0x2ca   : > { %v2008_v47 = vpop.permute.xlu1 %2007 }
 0x2cf   : > { %v2384_v63 = vpop.permute.xlu1 %2383 }
 0x2d0   : > { %v2551_v9 = vmul.f32 %v4506_v61, %v2384_v63  ;;  %v2073_v61 = vmul.f32 %v4446_v50, %v2008_v47 }
 0x2d2   : > { %v2615_v34 = vadd.f32 %v2551_v9, %v2103_v19  ;;  %v2137_v8 = vadd.f32 %v2073_v61, %v1625_v24  ;;  %v2687_v24 = vld [vmem:[#allocation2 + $0x128] sm:$0xff] }
 0x2d3   : > { %v2508_v11 = vpop.permute.xlu1 %2507 }
 0x2d4   : > { %v2728_v26 = vpack.c.bf16 %v2615_v34, %v2614_v40  ;;  %v2582_v58 = vmul.f32 %v4569_v49, %v2508_v11  ;;  %v2649_v57 = vadd.f32 %v2585_v28, %v2137_v8  ;;  %v2684_v49 = vld [vmem:[#allocation2 + $0x110] sm:$0xff]  ;;  %v2685_v40 = vld [vmem:[#allocation2 + $0x118] sm:$0xff]  ;;  %v2683_v34 = vld [vmem:[#allocation2 + $0x108] sm:$0xff] }
 0x2d5   : > { %v2659_v8 = vld [vmem:[#allocation2 + $0x48] sm:$0xff]  ;;  %v2692_v28 = vld [vmem:[#allocation2 + $0x150] sm:$0xff] }
 0x2d6   : > { %v2646_v12 = vadd.f32 %v2582_v58, %v2134_v25  ;;  %4953 = vmatprep.mubr.msk.bf16.mxu0 %vm2747_vm1, %v2728_v26  ;;  %v2655_v58 = vld [vmem:[#allocation2 + $0x28] sm:$0xff] }
 0x2d7   : > { %v2388_v45 = vpop.permute.xlu1 %2387 }
 0x2d8   : > { %v2744_v53 = vpack.c.bf16 %v2647_v15, %v2646_v12  ;;  %v2552_v41 = vmul.f32 %v4509_v23, %v2388_v45 }
 0x2da   : > { %v2616_v22 = vadd.f32 %v2552_v41, %v2104_v1  ;;  %4985 = vmatprep.mubr.msk.bf16.mxu1 %vm2747_vm1, %v2744_v53  ;;  %v2660_v53 = vld [vmem:[#allocation2 + $0x50] sm:$0xff]  ;;  %v2658_v41 = vld [vmem:[#allocation2 + $0x40] sm:$0xff] }
 0x2db   : > { %v2516_v47 = vpop.permute.xlu1 %2515 }
 0x2dc   : > { %v2729_v10 = vpack.c.bf16 %v2617_v43, %v2616_v22  ;;  %v2584_v21 = vmul.f32 %v4573_v4, %v2516_v47 }
 0x2de   : > { %v2648_v42 = vadd.f32 %v2584_v21, %v2136_v59  ;;  %4954 = vmatmul.mubr.msk.bf16.gmra.mrb[28].mxu0 %vm2747_vm1, %v2729_v10  ;;  %v2690_v21 = vld [vmem:[#allocation2 + $0x140] sm:$0xff] }
 0x2e0   : > { %v2745_v14 = vpack.c.bf16 %v2649_v57, %v2648_v42 }
 0x2e2   : > { %4986 = vmatmul.mubr.msk.bf16.gmra.mrb[28].mxu1 %vm2747_vm1, %v2745_v14  ;;  %v2693_v14 = vld [vmem:[#allocation2 + $0x158] sm:$0xff] }
 0x2ff   : > { %v4927_v37 = vpop.f32.mrb[0].mxu0 }
 0x300   : > { %v3139_v63 = vadd.f32 %v4927_v37, %v2652_v3  ;;  %v2882_v19 = vpop.f32.mrb[1].mxu0  ;;  %v2691_v37 = vld [vmem:[#allocation2 + $0x148] sm:$0xff] }
 0x301   : > { %v3137_v6 = vadd.f32 %v2882_v19, %v2650_v16  ;;  %v4928_v9 = vpop.f32.mrb[2].mxu0 }
 0x302   : > { %3203 = vst [vmem:[#allocation2 + $0x10] sm:$0xff] %v3139_v63  ;;  %v3140_v20 = vadd.f32 %v4928_v9, %v2653_v27  ;;  %v2885_v36 = vpop.f32.mrb[3].mxu0  ;;  %v2664_v9 = vld [vmem:[#allocation2 + $0x70] sm:$0xff] }
 0x303   : > { %3201 = vst [vmem:[#allocation2] sm:$0xff] %v3137_v6  ;;  %v3138_v35 = vadd.f32 %v2885_v36, %v2651_v2  ;;  %v4959_v62 = vpop.f32.mrb[0].mxu1  ;;  %v2665_v36 = vld [vmem:[#allocation2 + $0x78] sm:$0xff] }
 0x304   : > { %3204 = vst [vmem:[#allocation2 + $0x18] sm:$0xff] %v3140_v20  ;;  %v3171_v52 = vadd.f32 %v4959_v62, %v2684_v49  ;;  %v3010_v50 = vpop.f32.mrb[1].mxu1  ;;  %v2662_v49 = vld [vmem:[#allocation2 + $0x60] sm:$0xff]  ;;  %v2663_v62 = vld [vmem:[#allocation2 + $0x68] sm:$0xff] }
 0x305   : > { %3202 = vst [vmem:[#allocation2 + $0x8] sm:$0xff] %v3138_v35  ;;  %v3169_v13 = vadd.f32 %v3010_v50, %v2682_v56  ;;  %v4960_v60 = vpop.f32.mrb[2].mxu1  ;;  %v2696_v50 = vld [vmem:[#allocation2 + $0x170] sm:$0xff] }
 0x306   : > { %3235 = vst [vmem:[#allocation2 + $0x110] sm:$0xff] %v3171_v52  ;;  %v3172_v46 = vadd.f32 %v4960_v60, %v2685_v40  ;;  %v3013_v5 = vpop.f32.mrb[3].mxu1  ;;  %v2694_v60 = vld [vmem:[#allocation2 + $0x160] sm:$0xff] }
 0x307   : > { %3233 = vst [vmem:[#allocation2 + $0x100] sm:$0xff] %v3169_v13  ;;  %v3170_v51 = vadd.f32 %v3013_v5, %v2683_v34 }
 0x308   : > { %3236 = vst [vmem:[#allocation2 + $0x118] sm:$0xff] %v3172_v46 }
 0x309   : > { %3234 = vst [vmem:[#allocation2 + $0x108] sm:$0xff] %v3170_v51  ;;  %v2697_v51 = vld [vmem:[#allocation2 + $0x178] sm:$0xff] }
 0x311   : > { %v4931_v11 = vpop.f32.mrb[4].mxu0 }
 0x312   : > { %v3143_v25 = vadd.f32 %v4931_v11, %v2656_v30  ;;  %v2898_v26 = vpop.f32.mrb[5].mxu0  ;;  %v2695_v11 = vld [vmem:[#allocation2 + $0x168] sm:$0xff] }
 0x313   : > { %v3141_v23 = vadd.f32 %v2898_v26, %v2654_v38  ;;  %v4932_v7 = vpop.f32.mrb[6].mxu0 }
 0x314   : > { %3207 = vst [vmem:[#allocation2 + $0x30] sm:$0xff] %v3143_v25  ;;  %v3144_v33 = vadd.f32 %v4932_v7, %v2657_v44  ;;  %v2901_v0 = vpop.f32.mrb[7].mxu0  ;;  %v2668_v7 = vld [vmem:[#allocation2 + $0x90] sm:$0xff] }
 0x315   : > { %3205 = vst [vmem:[#allocation2 + $0x20] sm:$0xff] %v3141_v23  ;;  %v3142_v18 = vadd.f32 %v2901_v0, %v2655_v58  ;;  %v4963_v15 = vpop.f32.mrb[4].mxu1  ;;  %v2669_v0 = vld [vmem:[#allocation2 + $0x98] sm:$0xff] }
 0x316   : > { %3208 = vst [vmem:[#allocation2 + $0x38] sm:$0xff] %v3144_v33  ;;  %v3175_v61 = vadd.f32 %v4963_v15, %v2688_v17  ;;  %v3026_v12 = vpop.f32.mrb[5].mxu1  ;;  %v2666_v17 = vld [vmem:[#allocation2 + $0x80] sm:$0xff]  ;;  %v2667_v15 = vld [vmem:[#allocation2 + $0x88] sm:$0xff] }
 0x317   : > { %3206 = vst [vmem:[#allocation2 + $0x28] sm:$0xff] %v3142_v18  ;;  %v3173_v1 = vadd.f32 %v3026_v12, %v2686_v31  ;;  %v4964_v32 = vpop.f32.mrb[6].mxu1  ;;  %v2700_v12 = vld [vmem:[#allocation2 + $0x190] sm:$0xff] }
 0x318   : > { %3239 = vst [vmem:[#allocation2 + $0x130] sm:$0xff] %v3175_v61  ;;  %v3176_v39 = vadd.f32 %v4964_v32, %v2689_v54  ;;  %v3029_v45 = vpop.f32.mrb[7].mxu1  ;;  %v2698_v32 = vld [vmem:[#allocation2 + $0x180] sm:$0xff] }
 0x319   : > { %3237 = vst [vmem:[#allocation2 + $0x120] sm:$0xff] %v3173_v1  ;;  %v3174_v55 = vadd.f32 %v3029_v45, %v2687_v24 }
 0x31a   : > { %3240 = vst [vmem:[#allocation2 + $0x138] sm:$0xff] %v3176_v39 }
 0x31b   : > { %3238 = vst [vmem:[#allocation2 + $0x128] sm:$0xff] %v3174_v55  ;;  %v2701_v55 = vld [vmem:[#allocation2 + $0x198] sm:$0xff] }
 0x31e   : > { %v4935_v4 = vpop.f32.mrb[8].mxu0 }
 0x31f   : > { %v3147_v29 = vadd.f32 %v4935_v4, %v2660_v53  ;;  %v2914_v43 = vpop.f32.mrb[9].mxu0  ;;  %v2699_v4 = vld [vmem:[#allocation2 + $0x188] sm:$0xff] }
 0x320   : > { %v3145_v22 = vadd.f32 %v2914_v43, %v2658_v41  ;;  %v4936_v47 = vpop.f32.mrb[10].mxu0 }
 0x321   : > { %3211 = vst [vmem:[#allocation2 + $0x50] sm:$0xff] %v3147_v29  ;;  %v3148_v59 = vadd.f32 %v4936_v47, %v2661_v48  ;;  %v2917_v10 = vpop.f32.mrb[11].mxu0  ;;  %v2672_v47 = vld [vmem:[#allocation2 + $0xb0] sm:$0xff] }
 0x322   : > { %3209 = vst [vmem:[#allocation2 + $0x40] sm:$0xff] %v3145_v22  ;;  %v3146_v57 = vadd.f32 %v2917_v10, %v2659_v8  ;;  %v4967_v42 = vpop.f32.mrb[8].mxu1  ;;  %v2673_v10 = vld [vmem:[#allocation2 + $0xb8] sm:$0xff] }
 0x323   : > { %3212 = vst [vmem:[#allocation2 + $0x58] sm:$0xff] %v3148_v59  ;;  %v3179_v3 = vadd.f32 %v4967_v42, %v2692_v28  ;;  %v3042_v16 = vpop.f32.mrb[9].mxu1  ;;  %v2670_v28 = vld [vmem:[#allocation2 + $0xa0] sm:$0xff]  ;;  %v2671_v42 = vld [vmem:[#allocation2 + $0xa8] sm:$0xff] }
 0x324   : > { %3210 = vst [vmem:[#allocation2 + $0x48] sm:$0xff] %v3146_v57  ;;  %v3177_v27 = vadd.f32 %v3042_v16, %v2690_v21  ;;  %v4968_v63 = vpop.f32.mrb[10].mxu1  ;;  %v2704_v16 = vld [vmem:[#allocation2 + $0x1b0] sm:$0xff] }
 0x325   : > { %3243 = vst [vmem:[#allocation2 + $0x150] sm:$0xff] %v3179_v3  ;;  %v3180_v19 = vadd.f32 %v4968_v63, %v2693_v14  ;;  %v3045_v2 = vpop.f32.mrb[11].mxu1  ;;  %v2702_v63 = vld [vmem:[#allocation2 + $0x1a0] sm:$0xff] }
 0x326   : > { %3241 = vst [vmem:[#allocation2 + $0x140] sm:$0xff] %v3177_v27  ;;  %v3178_v6 = vadd.f32 %v3045_v2, %v2691_v37 }
 0x327   : > { %3244 = vst [vmem:[#allocation2 + $0x158] sm:$0xff] %v3180_v19 }
 0x328   : > { %3242 = vst [vmem:[#allocation2 + $0x148] sm:$0xff] %v3178_v6  ;;  %v2705_v6 = vld [vmem:[#allocation2 + $0x1b8] sm:$0xff] }
 0x337   : > { %v4939_v20 = vpop.f32.mrb[12].mxu0 }
 0x338   : > { %v3151_v56 = vadd.f32 %v4939_v20, %v2664_v9  ;;  %v2930_v35 = vpop.f32.mrb[13].mxu0  ;;  %v2703_v20 = vld [vmem:[#allocation2 + $0x1a8] sm:$0xff] }
 0x339   : > { %v3149_v40 = vadd.f32 %v2930_v35, %v2662_v49  ;;  %v4940_v52 = vpop.f32.mrb[14].mxu0 }
 0x33a   : > { %3215 = vst [vmem:[#allocation2 + $0x70] sm:$0xff] %v3151_v56  ;;  %v3152_v34 = vadd.f32 %v4940_v52, %v2665_v36  ;;  %v2933_v13 = vpop.f32.mrb[15].mxu0  ;;  %v2676_v52 = vld [vmem:[#allocation2 + $0xd0] sm:$0xff] }
 0x33b   : > { %3213 = vst [vmem:[#allocation2 + $0x60] sm:$0xff] %v3149_v40  ;;  %v3150_v46 = vadd.f32 %v2933_v13, %v2663_v62  ;;  %v4971_v5 = vpop.f32.mrb[12].mxu1  ;;  %v2677_v13 = vld [vmem:[#allocation2 + $0xd8] sm:$0xff] }
 0x33c   : > { %3216 = vst [vmem:[#allocation2 + $0x78] sm:$0xff] %v3152_v34  ;;  %v3183_v30 = vadd.f32 %v4971_v5, %v2696_v50  ;;  %v3058_v38 = vpop.f32.mrb[13].mxu1  ;;  %v2674_v50 = vld [vmem:[#allocation2 + $0xc0] sm:$0xff]  ;;  %v2675_v5 = vld [vmem:[#allocation2 + $0xc8] sm:$0xff] }
 0x33d   : > { %3214 = vst [vmem:[#allocation2 + $0x68] sm:$0xff] %v3150_v46  ;;  %v3181_v44 = vadd.f32 %v3058_v38, %v2694_v60  ;;  %v4972_v25 = vpop.f32.mrb[14].mxu1  ;;  %v2708_v38 = vld [vmem:[#allocation2 + $0x1d0] sm:$0xff] }
 0x33e   : > { %3247 = vst [vmem:[#allocation2 + $0x170] sm:$0xff] %v3183_v30  ;;  %v3184_v26 = vadd.f32 %v4972_v25, %v2697_v51  ;;  %v3061_v58 = vpop.f32.mrb[15].mxu1  ;;  %v2706_v25 = vld [vmem:[#allocation2 + $0x1c0] sm:$0xff] }
 0x33f   : > { %3245 = vst [vmem:[#allocation2 + $0x160] sm:$0xff] %v3181_v44  ;;  %v3182_v23 = vadd.f32 %v3061_v58, %v2695_v11 }
 0x340   : > { %3248 = vst [vmem:[#allocation2 + $0x178] sm:$0xff] %v3184_v26 }
 0x341   : > { %3246 = vst [vmem:[#allocation2 + $0x168] sm:$0xff] %v3182_v23  ;;  %v2709_v23 = vld [vmem:[#allocation2 + $0x1d8] sm:$0xff] }
 0x355   : > { %v4943_v33 = vpop.f32.mrb[16].mxu0 }
 0x356   : > { %v3155_v31 = vadd.f32 %v4943_v33, %v2668_v7  ;;  %v2946_v18 = vpop.f32.mrb[17].mxu0  ;;  %v2707_v33 = vld [vmem:[#allocation2 + $0x1c8] sm:$0xff] }
 0x357   : > { %v3153_v54 = vadd.f32 %v2946_v18, %v2666_v17  ;;  %v4944_v61 = vpop.f32.mrb[18].mxu0 }
 0x358   : > { %3219 = vst [vmem:[#allocation2 + $0x90] sm:$0xff] %v3155_v31  ;;  %v3156_v24 = vadd.f32 %v4944_v61, %v2669_v0  ;;  %v2949_v1 = vpop.f32.mrb[19].mxu0  ;;  %v2680_v61 = vld [vmem:[#allocation2 + $0xf0] sm:$0xff] }
 0x359   : > { %3217 = vst [vmem:[#allocation2 + $0x80] sm:$0xff] %v3153_v54  ;;  %v3154_v39 = vadd.f32 %v2949_v1, %v2667_v15  ;;  %v4975_v45 = vpop.f32.mrb[16].mxu1  ;;  %v2681_v1 = vld [vmem:[#allocation2 + $0xf8] sm:$0xff] }
 0x35a   : > { %3220 = vst [vmem:[#allocation2 + $0x98] sm:$0xff] %v3156_v24  ;;  %v3187_v53 = vadd.f32 %v4975_v45, %v2700_v12  ;;  %v3074_v41 = vpop.f32.mrb[17].mxu1  ;;  %v2678_v12 = vld [vmem:[#allocation2 + $0xe0] sm:$0xff]  ;;  %v2679_v45 = vld [vmem:[#allocation2 + $0xe8] sm:$0xff] }
 0x35b   : > { %3218 = vst [vmem:[#allocation2 + $0x88] sm:$0xff] %v3154_v39  ;;  %v3185_v48 = vadd.f32 %v3074_v41, %v2698_v32  ;;  %v4976_v29 = vpop.f32.mrb[18].mxu1  ;;  %v2712_v41 = vld [vmem:[#allocation2 + $0x1f0] sm:$0xff] }
 0x35c   : > { %3251 = vst [vmem:[#allocation2 + $0x190] sm:$0xff] %v3187_v53  ;;  %v3188_v43 = vadd.f32 %v4976_v29, %v2701_v55  ;;  %v3077_v8 = vpop.f32.mrb[19].mxu1  ;;  %v2710_v29 = vld [vmem:[#allocation2 + $0x1e0] sm:$0xff] }
 0x35d   : > { %3249 = vst [vmem:[#allocation2 + $0x180] sm:$0xff] %v3185_v48  ;;  %v3186_v22 = vadd.f32 %v3077_v8, %v2699_v4 }
 0x35e   : > { %3252 = vst [vmem:[#allocation2 + $0x198] sm:$0xff] %v3188_v43 }
 0x35f   : > { %3250 = vst [vmem:[#allocation2 + $0x188] sm:$0xff] %v3186_v22  ;;  %v2713_v22 = vld [vmem:[#allocation2 + $0x1f8] sm:$0xff] }
 0x373   : > { %v4947_v59 = vpop.f32.mrb[20].mxu0 }
 0x374   : > { %v3159_v21 = vadd.f32 %v4947_v59, %v2672_v47  ;;  %v2962_v57 = vpop.f32.mrb[21].mxu0  ;;  %v2711_v59 = vld [vmem:[#allocation2 + $0x1e8] sm:$0xff] }
 0x375   : > { %v3157_v14 = vadd.f32 %v2962_v57, %v2670_v28  ;;  %v4948_v3 = vpop.f32.mrb[22].mxu0 }
 0x376   : > { %3223 = vst [vmem:[#allocation2 + $0xb0] sm:$0xff] %v3159_v21  ;;  %v3160_v37 = vadd.f32 %v4948_v3, %v2673_v10  ;;  %v2965_v27 = vpop.f32.mrb[23].mxu0  ;;  %v3269_v3 = vld [vmem:[#allocation2] sm:$0xff] (!%p3924_p6) }
 0x377   : > { %3221 = vst [vmem:[#allocation2 + $0xa0] sm:$0xff] %v3157_v14  ;;  %v3158_v19 = vadd.f32 %v2965_v27, %v2671_v42  ;;  %v4979_v2 = vpop.f32.mrb[20].mxu1 }
 0x378   : > { %3224 = vst [vmem:[#allocation2 + $0xb8] sm:$0xff] %v3160_v37  ;;  %v3191_v9 = vadd.f32 %v4979_v2, %v2704_v16  ;;  %v3090_v49 = vpop.f32.mrb[21].mxu1  ;;  %v3270_v16 = vld [vmem:[#allocation2 + $0x8] sm:$0xff] (!%p3924_p6)  ;;  %v6844_v37 = vld [vmem:[%s7021_s6] ss:$0 sm:$0xff] (!%p3924_p6)  ;;  %v3272_v2 = vld [vmem:[#allocation2 + $0x18] sm:$0xff] (!%p3924_p6) }
 0x379   : > { %3222 = vst [vmem:[#allocation2 + $0xa8] sm:$0xff] %v3158_v19  ;;  %v3189_v36 = vadd.f32 %v3090_v49, %v2702_v63  ;;  %v4980_v56 = vpop.f32.mrb[22].mxu1  ;;  %v3340_v27 = vadd.f32 (!%p3924_p6), %v6844_v37, %v3269_v3  ;;  %v3341_v63 = vadd.f32 (!%p3924_p6), %v6844_v37, %v3270_v16  ;;  %v3271_v19 = vld [vmem:[#allocation2 + $0x10] sm:$0xff] (!%p3924_p6)  ;;  %v3343_v49 = vadd.f32 (!%p3924_p6), %v6844_v37, %v3272_v2 }
 0x37a   : > { %3255 = vst [vmem:[#allocation2 + $0x1b0] sm:$0xff] %v3191_v9  ;;  %v3192_v35 = vadd.f32 %v4980_v56, %v2705_v6  ;;  %v3093_v62 = vpop.f32.mrb[23].mxu1  ;;  %v3273_v6 = vld [vmem:[#allocation2 + $0x20] sm:$0xff] (!%p3924_p6)  ;;  %v3342_v9 = vadd.f32 (!%p3924_p6), %v6844_v37, %v3271_v19  ;;  %v3275_v56 = vld [vmem:[#allocation2 + $0x30] sm:$0xff] (!%p3924_p6) }
 0x37b   : > { %3253 = vst [vmem:[#allocation2 + $0x1a0] sm:$0xff] %v3189_v36  ;;  %v3190_v40 = vadd.f32 %v3093_v62, %v2703_v20  ;;  %v3274_v20 = vld [vmem:[#allocation2 + $0x28] sm:$0xff] (!%p3924_p6)  ;;  %v3344_v36 = vadd.f32 (!%p3924_p6), %v6844_v37, %v3273_v6  ;;  %v4578_v62 = vpack.c.bf16 (!%p3924_p6), %v3341_v63, %v3340_v27 }
 0x37c   : > { %3256 = vst [vmem:[#allocation2 + $0x1b8] sm:$0xff] %v3192_v35  ;;  %v3276_v35 = vld [vmem:[#allocation2 + $0x38] sm:$0xff] (!%p3924_p6) }
 0x37d   : > { %3254 = vst [vmem:[#allocation2 + $0x1a8] sm:$0xff] %v3190_v40  ;;  %v3345_v40 = vadd.f32 (!%p3924_p6), %v6844_v37, %v3274_v20  ;;  %4579 = vst [vmem:[%s7022_s7] sm:$0xff] (!%p3924_p6), %v4578_v62  }
 0x393   : > { %v4951_v34 = vpop.f32.mrb[24].mxu0 }
 0x394   : > { %v3163_v60 = vadd.f32 %v4951_v34, %v2676_v52  ;;  %v2978_v46 = vpop.f32.mrb[25].mxu0  ;;  %v3346_v52 = vadd.f32 (!%p3924_p6), %v6844_v37, %v3275_v56  ;;  %v3277_v34 = vld [vmem:[#allocation2 + $0x40] sm:$0xff] (!%p3924_p6)  ;;  %v3302_v56 = vld [vmem:[#allocation2 + $0x108] sm:$0xff] (!%p3924_p6) }
 0x395   : > { %v3161_v51 = vadd.f32 %v2978_v46, %v2674_v50  ;;  %v4952_v30 = vpop.f32.mrb[26].mxu0  ;;  %v3347_v50 = vadd.f32 (!%p3924_p6), %v6844_v37, %v3276_v35  ;;  %v4583_v46 = vpack.c.bf16 (!%p3924_p6), %v3343_v49, %v3342_v9  ;;  %v3303_v35 = vld [vmem:[#allocation2 + $0x110] sm:$0xff] (!%p3924_p6) }
 0x396   : > { %3227 = vst [vmem:[#allocation2 + $0xd0] sm:$0xff] %v3163_v60  ;;  %v3164_v11 = vadd.f32 %v4952_v30, %v2677_v13  ;;  %v2981_v44 = vpop.f32.mrb[27].mxu0  ;;  %v3278_v13 = vld [vmem:[#allocation2 + $0x48] sm:$0xff] (!%p3924_p6)  ;;  %v3279_v60 = vld [vmem:[#allocation2 + $0x50] sm:$0xff] (!%p3924_p6)  ;;  %v3280_v30 = vld [vmem:[#allocation2 + $0x58] sm:$0xff] (!%p3924_p6) }
 0x397   : > { %3225 = vst [vmem:[#allocation2 + $0xc0] sm:$0xff] %v3161_v51  ;;  %v3162_v26 = vadd.f32 %v2981_v44, %v2675_v5  ;;  %v4983_v58 = vpop.f32.mrb[24].mxu1  ;;  %v3348_v5 = vadd.f32 (!%p3924_p6), %v6844_v37, %v3277_v34  ;;  %v3349_v51 = vadd.f32 (!%p3924_p6), %v6844_v37, %v3278_v13  ;;  %v3282_v44 = vld [vmem:[#allocation2 + $0x68] sm:$0xff] (!%p3924_p6)  ;;  %4859 = vst [vmem:[%s7022_s7 + $0x8] sm:$0xff] (!%p3924_p6), %v4583_v46   ;;  %v3304_v34 = vld [vmem:[#allocation2 + $0x118] sm:$0xff] (!%p3924_p6) }
 0x398   : > { %3228 = vst [vmem:[#allocation2 + $0xd8] sm:$0xff] %v3164_v11  ;;  %v3195_v7 = vadd.f32 %v4983_v58, %v2708_v38  ;;  %v3106_v17 = vpop.f32.mrb[25].mxu1  ;;  %v3350_v38 = vadd.f32 (!%p3924_p6), %v6844_v37, %v3279_v60  ;;  %v3281_v11 = vld [vmem:[#allocation2 + $0x60] sm:$0xff] (!%p3924_p6)  ;;  %v3351_v58 = vadd.f32 (!%p3924_p6), %v6844_v37, %v3280_v30  ;;  %v3306_v60 = vld [vmem:[#allocation2 + $0x128] sm:$0xff] (!%p3924_p6)  ;;  %v3374_v30 = vadd.f32 (!%p3924_p6), %v6844_v37, %v3303_v35 }
 0x399   : > { %3226 = vst [vmem:[#allocation2 + $0xc8] sm:$0xff] %v3162_v26  ;;  %v3193_v0 = vadd.f32 %v3106_v17, %v2706_v25  ;;  %v4984_v31 = vpop.f32.mrb[26].mxu1  ;;  %v4588_v25 = vpack.c.bf16 (!%p3924_p6), %v3345_v40, %v3344_v36  ;;  %v4593_v26 = vpack.c.bf16 (!%p3924_p6), %v3347_v50, %v3346_v52  ;;  %v3284_v17 = vld [vmem:[#allocation2 + $0x78] sm:$0xff] (!%p3924_p6)  ;;  %v3301_v36 = vld [vmem:[#allocation2 + $0x100] sm:$0xff] (!%p3924_p6) }
 0x39a   : > { %3259 = vst [vmem:[#allocation2 + $0x1d0] sm:$0xff] %v3195_v7  ;;  %v3196_v18 = vadd.f32 %v4984_v31, %v2709_v23  ;;  %v3109_v15 = vpop.f32.mrb[27].mxu1  ;;  %v3352_v23 = vadd.f32 (!%p3924_p6), %v6844_v37, %v3281_v11  ;;  %v3283_v7 = vld [vmem:[#allocation2 + $0x70] sm:$0xff] (!%p3924_p6)  ;;  %v3353_v31 = vadd.f32 (!%p3924_p6), %v6844_v37, %v3282_v44  ;;  %v3305_v13 = vld [vmem:[#allocation2 + $0x120] sm:$0xff] (!%p3924_p6)  ;;  %v3308_v11 = vld [vmem:[#allocation2 + $0x138] sm:$0xff] (!%p3924_p6) }
 0x39b   : > { %3257 = vst [vmem:[#allocation2 + $0x1c0] sm:$0xff] %v3193_v0  ;;  %v3194_v54 = vadd.f32 %v3109_v15, %v2707_v33  ;;  %v3285_v33 = vld [vmem:[#allocation2 + $0x80] sm:$0xff] (!%p3924_p6)  ;;  %v4598_v0 = vpack.c.bf16 (!%p3924_p6), %v3349_v51, %v3348_v5  ;;  %v3355_v15 = vadd.f32 (!%p3924_p6), %v6844_v37, %v3284_v17  ;;  %4860 = vst [vmem:[%s7022_s7 + $0x10] sm:$0xff] (!%p3924_p6), %v4588_v25   ;;  %v3311_v17 = vld [vmem:[#allocation2 + $0x150] sm:$0xff] (!%p3924_p6) }
 0x39c   : > { %3260 = vst [vmem:[#allocation2 + $0x1d8] sm:$0xff] %v3196_v18  ;;  %v3354_v18 = vadd.f32 (!%p3924_p6), %v6844_v37, %v3283_v7  ;;  %4861 = vst [vmem:[%s7022_s7 + $0x18] sm:$0xff] (!%p3924_p6), %v4593_v26   ;;  %v3372_v5 = vadd.f32 (!%p3924_p6), %v6844_v37, %v3301_v36  ;;  %v3373_v51 = vadd.f32 (!%p3924_p6), %v6844_v37, %v3302_v56  ;;  %v3309_v44 = vld [vmem:[#allocation2 + $0x140] sm:$0xff] (!%p3924_p6)  ;;  %v3310_v7 = vld [vmem:[#allocation2 + $0x148] sm:$0xff] (!%p3924_p6) }
 0x39d   : > { %3258 = vst [vmem:[#allocation2 + $0x1c8] sm:$0xff] %v3194_v54  ;;  %v3286_v54 = vld [vmem:[#allocation2 + $0x88] sm:$0xff] (!%p3924_p6)  ;;  %4862 = vst [vmem:[%s7022_s7 + $0x20] sm:$0xff] (!%p3924_p6), %v4598_v0  }
 0x39e   : > { %v4658_v0 = vpack.c.bf16 (!%p3924_p6), %v3373_v51, %v3372_v5 }
 0x3a0   : > { %4874 = vst [vmem:[%s7022_s7 + $0x80] sm:$0xff] (!%p3924_p6), %v4658_v0  }
 0x3a3   : > { %v3328_v36 = vld [vmem:[#allocation2 + $0x1d8] sm:$0xff] (!%p3924_p6) }
 0x3b1   : > { %v4955_v24 = vpop.f32.mrb[28].mxu0 }
 0x3b2   : > { %v3167_v32 = vadd.f32 %v4955_v24, %v2680_v61  ;;  %v2994_v39 = vpop.f32.mrb[29].mxu0  ;;  %v3287_v61 = vld [vmem:[#allocation2 + $0x90] sm:$0xff] (!%p3924_p6)  ;;  %v4603_v24 = vpack.c.bf16 (!%p3924_p6), %v3351_v58, %v3350_v38  ;;  %v3375_v58 = vadd.f32 (!%p3924_p6), %v6844_v37, %v3304_v34 }
 0x3b3   : > { %v3165_v55 = vadd.f32 %v2994_v39, %v2678_v12  ;;  %v4956_v53 = vpop.f32.mrb[30].mxu0  ;;  %v3288_v12 = vld [vmem:[#allocation2 + $0x98] sm:$0xff] (!%p3924_p6)  ;;  %v3358_v39 = vadd.f32 (!%p3924_p6), %v6844_v37, %v3287_v61  ;;  %v3307_v38 = vld [vmem:[#allocation2 + $0x130] sm:$0xff] (!%p3924_p6)  ;;  %v3314_v61 = vld [vmem:[#allocation2 + $0x168] sm:$0xff] (!%p3924_p6) }
 0x3b4   : > { %3231 = vst [vmem:[#allocation2 + $0xf0] sm:$0xff] %v3167_v32  ;;  %v3168_v4 = vadd.f32 %v4956_v53, %v2681_v1  ;;  %v2997_v48 = vpop.f32.mrb[31].mxu0  ;;  %v3356_v1 = vadd.f32 (!%p3924_p6), %v6844_v37, %v3285_v33  ;;  %v3357_v32 = vadd.f32 (!%p3924_p6), %v6844_v37, %v3286_v54  ;;  %v3291_v53 = vld [vmem:[#allocation2 + $0xb0] sm:$0xff] (!%p3924_p6)  ;;  %4863 = vst [vmem:[%s7022_s7 + $0x28] sm:$0xff] (!%p3924_p6), %v4603_v24   ;;  %v3312_v33 = vld [vmem:[#allocation2 + $0x158] sm:$0xff] (!%p3924_p6) }
 0x3b5   : > { %3229 = vst [vmem:[#allocation2 + $0xe0] sm:$0xff] %v3165_v55  ;;  %v3166_v43 = vadd.f32 %v2997_v48, %v2679_v45  ;;  %v4987_v8 = vpop.f32.mrb[28].mxu1  ;;  %3268 = sbr.rel (%p3924_p6) target bundleno = 972 (0x3cc), region = 56  ;;  %v3289_v45 = vld [vmem:[#allocation2 + $0xa0] sm:$0xff] (!%p3924_p6)  ;;  %v3290_v55 = vld [vmem:[#allocation2 + $0xa8] sm:$0xff] (!%p3924_p6)  ;;  %v3359_v48 = vadd.f32 (!%p3924_p6), %v6844_v37, %v3288_v12  ;;  %v3315_v12 = vld [vmem:[#allocation2 + $0x170] sm:$0xff] (!%p3924_p6)  ;;  %v4663_v24 = vpack.c.bf16 (!%p3924_p6), %v3375_v58, %v3374_v30 }
 0x3b6   : > { %3232 = vst [vmem:[#allocation2 + $0xf8] sm:$0xff] %v3168_v4  ;;  %v3199_v47 = vadd.f32 %v4987_v8, %v2712_v41  ;;  %v3122_v28 = vpop.f32.mrb[29].mxu1  ;;  %v4608_v41 = vpack.c.bf16 (!%p3924_p6), %v3353_v31, %v3352_v23  ;;  %v4613_v4 = vpack.c.bf16 (!%p3924_p6), %v3355_v15, %v3354_v18  ;;  %v3293_v8 = vld [vmem:[#allocation2 + $0xc0] sm:$0xff] (!%p3924_p6)  ;;  %v3376_v23 = vadd.f32 (!%p3924_p6), %v6844_v37, %v3305_v13 }
 0x3b7   : > { %3230 = vst [vmem:[#allocation2 + $0xe8] sm:$0xff] %v3166_v43  ;;  %v3197_v10 = vadd.f32 %v3122_v28, %v2710_v29  ;;  %v4988_v21 = vpop.f32.mrb[30].mxu1  ;;  %v3360_v29 = vadd.f32 (!%p3924_p6), %v6844_v37, %v3289_v45  ;;  %v3292_v43 = vld [vmem:[#allocation2 + $0xb8] sm:$0xff] (!%p3924_p6)  ;;  %v3361_v28 = vadd.f32 (!%p3924_p6), %v6844_v37, %v3290_v55  ;;  %v3364_v3 = vadd.f32 (!%p3924_p6), %v6844_v37, %v3293_v8  ;;  %v3313_v54 = vld [vmem:[#allocation2 + $0x160] sm:$0xff] (!%p3924_p6) }
 0x3b8   : > { %3263 = vst [vmem:[#allocation2 + $0x1f0] sm:$0xff] %v3199_v47  ;;  %v3200_v57 = vadd.f32 %v4988_v21, %v2713_v22  ;;  %v3125_v42 = vpop.f32.mrb[31].mxu1  ;;  %v3294_v22 = vld [vmem:[#allocation2 + $0xc8] sm:$0xff] (!%p3924_p6)  ;;  %v4618_v47 = vpack.c.bf16 (!%p3924_p6), %v3357_v32, %v3356_v1  ;;  %v3295_v21 = vld [vmem:[#allocation2 + $0xd0] sm:$0xff] (!%p3924_p6)  ;;  %4864 = vst [vmem:[%s7022_s7 + $0x30] sm:$0xff] (!%p3924_p6), %v4608_v41   ;;  %v3377_v31 = vadd.f32 (!%p3924_p6), %v6844_v37, %v3306_v60 }
 0x3b9   : > { %3261 = vst [vmem:[#allocation2 + $0x1e0] sm:$0xff] %v3197_v10  ;;  %v3198_v14 = vadd.f32 %v3125_v42, %v2711_v59  ;;  %v3362_v59 = vadd.f32 (!%p3924_p6), %v6844_v37, %v3291_v53  ;;  %v3363_v10 = vadd.f32 (!%p3924_p6), %v6844_v37, %v3292_v43  ;;  %4865 = vst [vmem:[%s7022_s7 + $0x38] sm:$0xff] (!%p3924_p6), %v4613_v4   ;;  %v3316_v45 = vld [vmem:[#allocation2 + $0x178] sm:$0xff] (!%p3924_p6)  ;;  %v3317_v55 = vld [vmem:[#allocation2 + $0x180] sm:$0xff] (!%p3924_p6) }
 0x3ba   : > { %3264 = vst [vmem:[#allocation2 + $0x1f8] sm:$0xff] %v3200_v57  ;;  %v3296_v57 = vld [vmem:[#allocation2 + $0xd8] sm:$0xff] (!%p3924_p6)  ;;  %v3365_v16 = vadd.f32 (!%p3924_p6), %v6844_v37, %v3294_v22  ;;  %v3366_v27 = vadd.f32 (!%p3924_p6), %v6844_v37, %v3295_v21  ;;  %4866 = vst [vmem:[%s7022_s7 + $0x40] sm:$0xff] (!%p3924_p6), %v4618_v47   ;;  %v4628_v6 = vpack.c.bf16 (!%p3924_p6), %v3361_v28, %v3360_v29  ;;  %v3318_v53 = vld [vmem:[#allocation2 + $0x188] sm:$0xff] (!%p3924_p6) }
 0x3bb   : > { %3262 = vst [vmem:[#allocation2 + $0x1e8] sm:$0xff] %v3198_v14  ;;  %v4623_v14 = vpack.c.bf16 (!%p3924_p6), %v3359_v48, %v3358_v39  ;;  %v3299_v19 = vld [vmem:[#allocation2 + $0xf0] sm:$0xff] (!%p3924_p6)  ;;  %v4633_v9 = vpack.c.bf16 (!%p3924_p6), %v3363_v10, %v3362_v59  ;;  %v3367_v49 = vadd.f32 (!%p3924_p6), %v6844_v37, %v3296_v57  ;;  %v3378_v18 = vadd.f32 (!%p3924_p6), %v6844_v37, %v3307_v38  ;;  %v3320_v8 = vld [vmem:[#allocation2 + $0x198] sm:$0xff] (!%p3924_p6)  ;;  %v3321_v22 = vld [vmem:[#allocation2 + $0x1a0] sm:$0xff] (!%p3924_p6) }
 0x3bc   : > { %v3297_v42 = vld [vmem:[#allocation2 + $0xe0] sm:$0xff]  ;;  %v4638_v62 = vpack.c.bf16 %v3365_v16, %v3364_v3  ;;  %v3370_v52 = vadd.f32 %v6844_v37, %v3299_v19  ;;  %4868 = vst [vmem:[%s7022_s7 + $0x50] sm:$0xff] %v4628_v6   ;;  %v3379_v15 = vadd.f32 %v6844_v37, %v3308_v11  ;;  %v3380_v1 = vadd.f32 %v6844_v37, %v3309_v44  ;;  %v3319_v43 = vld [vmem:[#allocation2 + $0x190] sm:$0xff]  ;;  %v3322_v21 = vld [vmem:[#allocation2 + $0x1a8] sm:$0xff] }
 0x3bd   : > { %v3300_v2 = vld [vmem:[#allocation2 + $0xf8] sm:$0xff]  ;;  %v3368_v20 = vadd.f32 %v6844_v37, %v3297_v42  ;;  %4867 = vst [vmem:[%s7022_s7 + $0x48] sm:$0xff] %v4623_v14   ;;  %4869 = vst [vmem:[%s7022_s7 + $0x58] sm:$0xff] %v4633_v9   ;;  %v4643_v46 = vpack.c.bf16 %v3367_v49, %v3366_v27  ;;  %v3381_v32 = vadd.f32 %v6844_v37, %v3310_v7  ;;  %v3323_v57 = vld [vmem:[#allocation2 + $0x1b0] sm:$0xff] }
 0x3be   : > { %v3298_v63 = vld [vmem:[#allocation2 + $0xe8] sm:$0xff]  ;;  %v3371_v50 = vadd.f32 %v6844_v37, %v3300_v2  ;;  %4870 = vst [vmem:[%s7022_s7 + $0x60] sm:$0xff] %v4638_v62   ;;  %v3382_v39 = vadd.f32 %v6844_v37, %v3311_v17  ;;  %v4668_v41 = vpack.c.bf16 %v3377_v31, %v3376_v23  ;;  %v4673_v4 = vpack.c.bf16 %v3379_v15, %v3378_v18  ;;  %v3324_v42 = vld [vmem:[#allocation2 + $0x1b8] sm:$0xff]  ;;  %v3327_v2 = vld [vmem:[#allocation2 + $0x1d0] sm:$0xff] }
 0x3bf   : > { %v3369_v40 = vadd.f32 %v6844_v37, %v3298_v63  ;;  %4871 = vst [vmem:[%s7022_s7 + $0x68] sm:$0xff] %v4643_v46   ;;  %v3383_v48 = vadd.f32 %v6844_v37, %v3312_v33  ;;  %v3384_v29 = vadd.f32 %v6844_v37, %v3313_v54  ;;  %4875 = vst [vmem:[%s7022_s7 + $0x88] sm:$0xff] %v4663_v24   ;;  %v3325_v63 = vld [vmem:[#allocation2 + $0x1c0] sm:$0xff]  ;;  %v3326_v19 = vld [vmem:[#allocation2 + $0x1c8] sm:$0xff] }
 0x3c0   : > { %v4653_v26 = vpack.c.bf16 %v3371_v50, %v3370_v52  ;;  %v4678_v47 = vpack.c.bf16 %v3381_v32, %v3380_v1  ;;  %v3385_v28 = vadd.f32 %v6844_v37, %v3314_v61  ;;  %v3386_v59 = vadd.f32 %v6844_v37, %v3315_v12  ;;  %4876 = vst [vmem:[%s7022_s7 + $0x90] sm:$0xff] %v4668_v41   ;;  %v3329_v56 = vld [vmem:[#allocation2 + $0x1e0] sm:$0xff]  ;;  %v3331_v34 = vld [vmem:[#allocation2 + $0x1f0] sm:$0xff] }
 0x3c1   : > { %v4648_v25 = vpack.c.bf16 %v3369_v40, %v3368_v20  ;;  %v3387_v10 = vadd.f32 %v6844_v37, %v3316_v45  ;;  %4877 = vst [vmem:[%s7022_s7 + $0x98] sm:$0xff] %v4673_v4   ;;  %v4683_v14 = vpack.c.bf16 %v3383_v48, %v3382_v39  ;;  %v3388_v3 = vadd.f32 %v6844_v37, %v3317_v55  ;;  %v3332_v13 = vld [vmem:[#allocation2 + $0x1f8] sm:$0xff] }
 0x3c2   : > { %4873 = vst [vmem:[%s7022_s7 + $0x78] sm:$0xff] %v4653_v26   ;;  %v3389_v16 = vadd.f32 %v6844_v37, %v3318_v53  ;;  %v3390_v27 = vadd.f32 %v6844_v37, %v3319_v43  ;;  %4878 = vst [vmem:[%s7022_s7 + $0xa0] sm:$0xff] %v4678_v47   ;;  %v4688_v6 = vpack.c.bf16 %v3385_v28, %v3384_v29  ;;  %v3330_v50 = vld [vmem:[#allocation2 + $0x1e8] sm:$0xff] }
 0x3c3   : > { %4872 = vst [vmem:[%s7022_s7 + $0x70] sm:$0xff] %v4648_v25   ;;  %v4693_v9 = vpack.c.bf16 %v3387_v10, %v3386_v59  ;;  %v3391_v49 = vadd.f32 %v6844_v37, %v3320_v8  ;;  %v3392_v20 = vadd.f32 %v6844_v37, %v3321_v22  ;;  %4879 = vst [vmem:[%s7022_s7 + $0xa8] sm:$0xff] %v4683_v14  }
 0x3c4   : > { %v4698_v35 = vpack.c.bf16 %v3389_v16, %v3388_v3  ;;  %v3393_v62 = vadd.f32 %v6844_v37, %v3322_v21  ;;  %v3394_v40 = vadd.f32 %v6844_v37, %v3323_v57  ;;  %v3395_v52 = vadd.f32 %v6844_v37, %v3324_v42  ;;  %4880 = vst [vmem:[%s7022_s7 + $0xb0] sm:$0xff] %v4688_v6  }
 0x3c5   : > { %4881 = vst [vmem:[%s7022_s7 + $0xb8] sm:$0xff] %v4693_v9   ;;  %v4703_v60 = vpack.c.bf16 %v3391_v49, %v3390_v27  ;;  %v3396_v46 = vadd.f32 %v6844_v37, %v3325_v63  ;;  %v3397_v5 = vadd.f32 %v6844_v37, %v3326_v19  ;;  %v3398_v51 = vadd.f32 %v6844_v37, %v3327_v2 }
 0x3c6   : > { %4882 = vst [vmem:[%s7022_s7 + $0xc0] sm:$0xff] %v4698_v35   ;;  %v4708_v30 = vpack.c.bf16 %v3393_v62, %v3392_v20  ;;  %v4713_v38 = vpack.c.bf16 %v3395_v52, %v3394_v40  ;;  %v3399_v11 = vadd.f32 %v6844_v37, %v3328_v36  ;;  %v3400_v44 = vadd.f32 %v6844_v37, %v3329_v56 }
 0x3c7   : > { %4883 = vst [vmem:[%s7022_s7 + $0xc8] sm:$0xff] %v4703_v60   ;;  %v4718_v25 = vpack.c.bf16 %v3397_v5, %v3396_v46  ;;  %v3401_v26 = vadd.f32 %v6844_v37, %v3330_v50  ;;  %v3402_v58 = vadd.f32 %v6844_v37, %v3331_v34  ;;  %v3403_v23 = vadd.f32 %v6844_v37, %v3332_v13 }
 0x3c8   : > { %4884 = vst [vmem:[%s7022_s7 + $0xd0] sm:$0xff] %v4708_v30   ;;  %4885 = vst [vmem:[%s7022_s7 + $0xd8] sm:$0xff] %v4713_v38   ;;  %v4723_v7 = vpack.c.bf16 %v3399_v11, %v3398_v51 }
 0x3c9   : > { %4886 = vst [vmem:[%s7022_s7 + $0xe0] sm:$0xff] %v4718_v25   ;;  %v4728_v17 = vpack.c.bf16 %v3401_v26, %v3400_v44  ;;  %v4733_v33 = vpack.c.bf16 %v3403_v23, %v3402_v58 }
 0x3ca   : > { %4887 = vst [vmem:[%s7022_s7 + $0xe8] sm:$0xff] %v4723_v7  }
 0x3cb   : > { %4888 = vst [vmem:[%s7022_s7 + $0xf0] sm:$0xff] %v4728_v17   ;;  %4889 = vst [vmem:[%s7022_s7 + $0xf8] sm:$0xff] %v4733_v33  }
 0x3cc PF: > { %s17_s26 = sadd.s32 1, %s5079_s26   ;;  %s7446_s24 = smov %s5075_s25 }
 0x3cd   : > { %p14_p7 = scmp.ge.s32.totalorder %s17_s26, 11   ;;  %s7447_s25 = smov %s7449_s27 }
 0x3cf   :  { %16 = sbr.rel (!%p14_p7) target bundleno = 2 (0x2), region = 101 }

</bundles_post_ra>
